<compile_context>
chip_gen: v7x
topology: tpu7x:2x2x1
jax: 0.10.0
libtpu: 0.0.40
codegen_flags: <defaults>
</compile_context>

<pallas_src>
from functools import partial

import jax
import jax.numpy as jnp
from jax import lax
from jax.experimental import pallas as pl
from jax.experimental.pallas import tpu as pltpu

EPS = 1e-5


# --------------------------------------------------------------------------
# In-kernel building blocks (operate on flattened (T*F, C) activation slabs,
# rows ordered r = t*F + f, channels on the lane axis).
# --------------------------------------------------------------------------
def _conv3x3_bn_relu(x2, wk_ref, scale_ref, bias_ref, *, T, F):
    """3x3 conv (pad=1) + folded BatchNorm + ReLU on a flattened (T*F, Cin) slab.

    x2:        (T*F, Cin)       activation
    wk_ref:    (3, 3*Cin, Cout) weights; wk_ref[ky][kx*Cin + ci, co] = W[ky,kx,ci,co]
    scale_ref: (1, Cout)        folded BN scale
    bias_ref:  (1, Cout)        folded conv-bias + BN shift
    """
    TF, Cin = x2.shape
    Cout = wk_ref.shape[-1]

    # Column (freq, dx = +-1) shifts: left[r] = x2[r-1], right[r] = x2[r+1],
    # zeroed where the shift crosses an F-row boundary (conv zero padding in F).
    zpad = jnp.zeros((8, Cin), jnp.float32)                 # 8-row pad keeps concat tile-aligned
    xp = jnp.concatenate([zpad, x2, zpad], axis=0)          # (TF + 16, Cin)
    left = lax.slice(xp, (7, 0), (7 + TF, Cin))             # x2 shifted down by 1
    right = lax.slice(xp, (9, 0), (9 + TF, Cin))            # x2 shifted up by 1
    fcol = lax.broadcasted_iota(jnp.int32, (T, F, Cin), 1).reshape(TF, Cin)
    left = jnp.where(fcol == 0, 0.0, left)
    right = jnp.where(fcol == F - 1, 0.0, right)

    # kx-concat along the lane axis -> each matmul gets K = 3*Cin.
    xc = jnp.concatenate([left, x2, right], axis=1)         # (TF, 3*Cin)

    # Row (time, dy) shifts via an F-row zero pad -> aligned slices at 0, F, 2F.
    zrow = jnp.zeros((F, 3 * Cin), jnp.float32)
    xcp = jnp.concatenate([zrow, xc, zrow], axis=0)         # (TF + 2F, 3*Cin)

    acc = jnp.zeros((TF, Cout), jnp.float32)
    for ky in range(3):
        xs = lax.slice(xcp, (ky * F, 0), (ky * F + TF, 3 * Cin))   # aligned offsets
        acc = acc + jnp.dot(xs, wk_ref[ky], preferred_element_type=jnp.float32)

    y = acc * scale_ref[...] + bias_ref[...]                # folded BatchNorm (eval)
    return jnp.maximum(y, 0.0)                              # ReLU


def _pool_time(y, *, T, F):
    """MaxPool2d(kernel=(2,1), stride=(2,1)) over time on a flattened (T*F, C) slab.

    All reshapes/slices stay sublane-aligned (F % 8 == 0)."""
    TF, C = y.shape
    yr = y.reshape(T // 2, 2 * F, C)
    ym = jnp.maximum(yr[:, :F, :], yr[:, F:, :])            # aligned half slices (0 and F)
    return ym.reshape((T // 2) * F, C)


def _vgg_fused_kernel(x9_ref, w1_ref, s1_ref, b1_ref,
                      w2_ref, s2_ref, b2_ref,
                      w3_ref, s3_ref, b3_ref,
                      w4_ref, s4_ref, b4_ref,
                      o_ref, *, T, F):
    """Entire VGGDownsampler for one batch element; activations stay in VMEM."""
    # Layer 1: input was im2col'ed in the wrapper -> one (T*F, 9) x (9, 64) matmul.
    a = jnp.dot(x9_ref[0], w1_ref[...], preferred_element_type=jnp.float32)
    a = jnp.maximum(a * s1_ref[...] + b1_ref[...], 0.0)

    # Layer 2 + pool1 (time /2).
    a = _conv3x3_bn_relu(a, w2_ref, s2_ref, b2_ref, T=T, F=F)
    a = _pool_time(a, T=T, F=F)
    T2 = T // 2

    # Layer 3.
    a = _conv3x3_bn_relu(a, w3_ref, s3_ref, b3_ref, T=T2, F=F)

    # Layer 4 + pool2 (time /2).
    a = _conv3x3_bn_relu(a, w4_ref, s4_ref, b4_ref, T=T2, F=F)
    a = _pool_time(a, T=T2, F=F)

    # Lane-dense (128-wide) final store.
    o_ref[0] = a.astype(o_ref.dtype)


# --------------------------------------------------------------------------
# Host-side glue
# --------------------------------------------------------------------------
def _im2col_input(x_btf, T, F):
    """(B, T, F) single-channel input -> (B, T*F, 9) 3x3 zero-padded patches."""
    B = x_btf.shape[0]
    xp = jnp.pad(x_btf, ((0, 0), (1, 1), (1, 1)))
    taps = [xp[:, ky:ky + T, kx:kx + F] for ky in range(3) for kx in range(3)]
    return jnp.stack(taps, axis=-1).reshape(B, T * F, 9)


def fold_bn(conv_b, gamma, beta, mean, var):
    """Fold conv bias + BatchNorm (inference mode) into scale/bias."""
    s = gamma / jnp.sqrt(var + EPS)
    return s, (conv_b - mean) * s + beta


def init_params(key, input_channels=1, output_channels=128):
    """Deterministic synthetic parameters (PyTorch shapes, HWIO conv layout)."""
    chans = [
        (input_channels, 64),
        (64, 64),
        (64, output_channels),
        (output_channels, output_channels),
    ]
    raw = []
    for cin, cout in chans:
        key, kw, kb, kg, kbe, km, kv = jax.random.split(key, 7)
        w = 0.05 * jax.random.normal(kw, (3, 3, cin, cout), jnp.float32)   # HWIO
        b = 0.05 * jax.random.normal(kb, (cout,), jnp.float32)
        gamma = 1.0 + 0.1 * jax.random.normal(kg, (cout,), jnp.float32)
        beta = 0.1 * jax.random.normal(kbe, (cout,), jnp.float32)
        mean = 0.1 * jax.random.normal(km, (cout,), jnp.float32)
        var = jax.random.uniform(kv, (cout,), jnp.float32, 0.5, 1.5)
        raw.append((w, b, gamma, beta, mean, var))
    return raw


def vgg_downsampler(x_nchw, raw_params):
    """Forward pass: (B, 1, T, F) -> (B, C_out, T/4, F).  Requires T % 4 == 0."""
    B, C0, T, F = x_nchw.shape
    # PyTorch MaxPool2d would floor odd sizes; we require divisibility instead.
    assert C0 == 1 and T % 4 == 0 and F % 8 == 0, (C0, T, F)
    # TODO(synk): BatchNorm is implemented in inference (running-stats) mode.
    # TODO(synk): for large T (or B == 1 on v7x), tile/split the time axis with
    # a 1-row halo instead of one whole (T*F, C) slab per grid step.

    x9 = _im2col_input(x_nchw[:, 0], T, F)                  # (B, T*F, 9)

    ws, scales, biases = [], [], []
    for (w, b, g, be, m, v) in raw_params:
        s, sb = fold_bn(b, g, be, m, v)
        ws.append(w.astype(jnp.float32))
        scales.append(s.reshape(1, -1).astype(jnp.float32))
        biases.append(sb.reshape(1, -1).astype(jnp.float32))

    # Weight layouts consumed by the kernel.
    w1 = ws[0].reshape(9, ws[0].shape[-1])                            # (9, 64)
    w2 = ws[1].reshape(3, 3 * ws[1].shape[2], ws[1].shape[3])         # (3, 192, 64)
    w3 = ws[2].reshape(3, 3 * ws[2].shape[2], ws[2].shape[3])         # (3, 192, 128)
    w4 = ws[3].reshape(3, 3 * ws[3].shape[2], ws[3].shape[3])         # (3, 384, 128)
    Cout = w4.shape[-1]

    def full(shape):
        return pl.BlockSpec(shape, lambda b, _s=shape: (0,) * len(_s))

    out_flat = pl.pallas_call(
        partial(_vgg_fused_kernel, T=T, F=F),
        out_shape=jax.ShapeDtypeStruct((B, (T // 4) * F, Cout), jnp.float32),
        grid_spec=pltpu.PrefetchScalarGridSpec(
            num_scalar_prefetch=0,
            grid=(B,),
            in_specs=[
                pl.BlockSpec((1, T * F, 9), lambda b: (b, 0, 0)),
                full(w1.shape), full(scales[0].shape), full(biases[0].shape),
                full(w2.shape), full(scales[1].shape), full(biases[1].shape),
                full(w3.shape), full(scales[2].shape), full(biases[2].shape),
                full(w4.shape), full(scales[3].shape), full(biases[3].shape),
            ],
            out_specs=pl.BlockSpec((1, (T // 4) * F, Cout), lambda b: (b, 0, 0)),
        ),
        compiler_params=pltpu.CompilerParams(
            dimension_semantics=("parallel",),   # batch items split across TCs (megacore)
        ),
    )(x9, w1, scales[0], biases[0],
      w2, scales[1], biases[1],
      w3, scales[2], biases[2],
      w4, scales[3], biases[3])

    out = out_flat.reshape(B, T // 4, F, Cout)
    return jnp.transpose(out, (0, 3, 1, 2))                 # BTFC -> NCHW


def reference_forward(x_nchw, raw_params):
    """Pure-JAX/XLA reference for correctness checking."""
    x = jnp.transpose(x_nchw, (0, 2, 3, 1))
    pool_flags = (False, True, False, True)
    for (w, b, g, be, m, v), pool in zip(raw_params, pool_flags):
        y = lax.conv_general_dilated(
            x, w, window_strides=(1, 1), padding="SAME",
            dimension_numbers=("NHWC", "HWIO", "NHWC"),
        ) + b
        y = g * (y - m) / jnp.sqrt(v + EPS) + be
        y = jnp.maximum(y, 0.0)
        if pool:
            y = jnp.maximum(y[:, 0::2], y[:, 1::2])
        x = y
    return jnp.transpose(x, (0, 3, 1, 2))


if __name__ == "__main__":
    key = jax.random.PRNGKey(0)
    key, kx = jax.random.split(key)

    B, Cin, T, F = 2, 1, 16, 16          # small shapes consistent with the module
    x = jax.random.normal(kx, (B, Cin, T, F), jnp.float32)
    params = init_params(key, input_channels=Cin, output_channels=128)

    out = jax.block_until_ready(vgg_downsampler(x, params))
    assert out.shape == (B, 128, T // 4, F), out.shape

    ref = jax.block_until_ready(reference_forward(x, params))
    max_err = float(jnp.max(jnp.abs(out - ref)))
    assert jnp.allclose(out, ref, rtol=1e-3, atol=1e-3), max_err

    print("KERNEL_OK")
</pallas_src>

<mosaic_0001>
module attributes {stable_mosaic.version = 11 : i64} {
  func.func @_vgg_fused_kernel(%arg0: i32, %arg1: memref<1x256x9xf32, #tpu.memory_space<vmem>>, %arg2: memref<9x64xf32, #tpu.memory_space<vmem>>, %arg3: memref<1x64xf32, #tpu.memory_space<vmem>>, %arg4: memref<1x64xf32, #tpu.memory_space<vmem>>, %arg5: memref<3x192x64xf32, #tpu.memory_space<vmem>>, %arg6: memref<1x64xf32, #tpu.memory_space<vmem>>, %arg7: memref<1x64xf32, #tpu.memory_space<vmem>>, %arg8: memref<3x192x128xf32, #tpu.memory_space<vmem>>, %arg9: memref<1x128xf32, #tpu.memory_space<vmem>>, %arg10: memref<1x128xf32, #tpu.memory_space<vmem>>, %arg11: memref<3x384x128xf32, #tpu.memory_space<vmem>>, %arg12: memref<1x128xf32, #tpu.memory_space<vmem>>, %arg13: memref<1x128xf32, #tpu.memory_space<vmem>>, %arg14: memref<1x64x128xf32, #tpu.memory_space<vmem>>) attributes {dimension_semantics = [#tpu.dimension_semantics<parallel>], iteration_bounds = array<i64: 2>, scalar_prefetch = 0 : i64, scratch_operands = 0 : i64, tpu.core_type = #tpu.core_type<tc>, window_params = [{transform_indices = @transform_0, window_bounds = array<i64: 1, 256, 9>}, {pipeline_mode = #tpu.pipeline_mode<synchronous>, transform_indices = @transform_1, window_bounds = array<i64: 9, 64>}, {pipeline_mode = #tpu.pipeline_mode<synchronous>, transform_indices = @transform_2, window_bounds = array<i64: 1, 64>}, {pipeline_mode = #tpu.pipeline_mode<synchronous>, transform_indices = @transform_3, window_bounds = array<i64: 1, 64>}, {pipeline_mode = #tpu.pipeline_mode<synchronous>, transform_indices = @transform_4, window_bounds = array<i64: 3, 192, 64>}, {pipeline_mode = #tpu.pipeline_mode<synchronous>, transform_indices = @transform_5, window_bounds = array<i64: 1, 64>}, {pipeline_mode = #tpu.pipeline_mode<synchronous>, transform_indices = @transform_6, window_bounds = array<i64: 1, 64>}, {pipeline_mode = #tpu.pipeline_mode<synchronous>, transform_indices = @transform_7, window_bounds = array<i64: 3, 192, 128>}, {pipeline_mode = #tpu.pipeline_mode<synchronous>, transform_indices = @transform_8, window_bounds = array<i64: 1, 128>}, {pipeline_mode = #tpu.pipeline_mode<synchronous>, transform_indices = @transform_9, window_bounds = array<i64: 1, 128>}, {pipeline_mode = #tpu.pipeline_mode<synchronous>, transform_indices = @transform_10, window_bounds = array<i64: 3, 384, 128>}, {pipeline_mode = #tpu.pipeline_mode<synchronous>, transform_indices = @transform_11, window_bounds = array<i64: 1, 128>}, {pipeline_mode = #tpu.pipeline_mode<synchronous>, transform_indices = @transform_12, window_bounds = array<i64: 1, 128>}, {transform_indices = @transform_13, window_bounds = array<i64: 1, 64, 128>}]} {
    %c0 = arith.constant 0 : index
    %c0_0 = arith.constant 0 : index
    %c0_1 = arith.constant 0 : index
    %0 = vector.load %arg1[%c0, %c0_0, %c0_1] : memref<1x256x9xf32, #tpu.memory_space<vmem>>, vector<1x256x9xf32>
    %1 = vector.shape_cast %0 : vector<1x256x9xf32> to vector<256x9xf32>
    %c0_2 = arith.constant 0 : index
    %c0_3 = arith.constant 0 : index
    %2 = vector.load %arg2[%c0_2, %c0_3] : memref<9x64xf32, #tpu.memory_space<vmem>>, vector<9x64xf32>
    %cst = arith.constant dense<0.000000e+00> : vector<256x64xf32>
    %3 = tpu.matmul %1, %2, %cst {dimension_numbers = #tpu.dot_dimension_numbers<[1], [0], [0], [1], [0, 0, 1, 1], [], []>} : vector<256x9xf32>, vector<9x64xf32>, vector<256x64xf32> -> vector<256x64xf32>
    %c0_4 = arith.constant 0 : index
    %c0_5 = arith.constant 0 : index
    %4 = vector.load %arg3[%c0_4, %c0_5] : memref<1x64xf32, #tpu.memory_space<vmem>>, vector<1x64xf32>
    %5 = vector.broadcast %4 : vector<1x64xf32> to vector<256x64xf32>
    %6 = arith.mulf %3, %5 : vector<256x64xf32>
    %c0_6 = arith.constant 0 : index
    %c0_7 = arith.constant 0 : index
    %7 = vector.load %arg4[%c0_6, %c0_7] : memref<1x64xf32, #tpu.memory_space<vmem>>, vector<1x64xf32>
    %8 = vector.broadcast %7 : vector<1x64xf32> to vector<256x64xf32>
    %9 = arith.addf %6, %8 : vector<256x64xf32>
    %cst_8 = arith.constant 0.000000e+00 : f32
    %10 = vector.broadcast %cst_8 : f32 to vector<256x64xf32>
    %11 = arith.maximumf %9, %10 : vector<256x64xf32>
    %cst_9 = arith.constant 0.000000e+00 : f32
    %12 = vector.broadcast %cst_9 : f32 to vector<8x64xf32>
    %13 = tpu.concatenate %12, %11, %12 in 0 : vector<8x64xf32>, vector<256x64xf32>, vector<8x64xf32> -> vector<272x64xf32>
    %14 = vector.extract_strided_slice %13 {offsets = [7, 0], sizes = [256, 64], strides = [1, 1]} : vector<272x64xf32> to vector<256x64xf32>
    %15 = vector.extract_strided_slice %13 {offsets = [9, 0], sizes = [256, 64], strides = [1, 1]} : vector<272x64xf32> to vector<256x64xf32>
    %16 = tpu.iota {dimensions = array<i32: 1>} : vector<16x16x64xi32>
    %17 = vector.shape_cast %16 : vector<16x16x64xi32> to vector<256x64xi32>
    %c0_i32 = arith.constant 0 : i32
    %18 = vector.broadcast %c0_i32 : i32 to vector<256x64xi32>
    %19 = arith.cmpi eq, %17, %18 : vector<256x64xi32>
    %cst_10 = arith.constant 0.000000e+00 : f32
    %20 = vector.broadcast %cst_10 : f32 to vector<256x64xf32>
    %21 = arith.select %19, %20, %14 : vector<256x64xi1>, vector<256x64xf32>
    %c15_i32 = arith.constant 15 : i32
    %22 = vector.broadcast %c15_i32 : i32 to vector<256x64xi32>
    %23 = arith.cmpi eq, %17, %22 : vector<256x64xi32>
    %cst_11 = arith.constant 0.000000e+00 : f32
    %24 = vector.broadcast %cst_11 : f32 to vector<256x64xf32>
    %25 = arith.select %23, %24, %15 : vector<256x64xi1>, vector<256x64xf32>
    %26 = tpu.concatenate %21, %11, %25 in 1 : vector<256x64xf32>, vector<256x64xf32>, vector<256x64xf32> -> vector<256x192xf32>
    %cst_12 = arith.constant 0.000000e+00 : f32
    %27 = vector.broadcast %cst_12 : f32 to vector<16x192xf32>
    %28 = tpu.concatenate %27, %26, %27 in 0 : vector<16x192xf32>, vector<256x192xf32>, vector<16x192xf32> -> vector<288x192xf32>
    %cst_13 = arith.constant 0.000000e+00 : f32
    %29 = vector.broadcast %cst_13 : f32 to vector<256x64xf32>
    %30 = vector.extract_strided_slice %28 {offsets = [0, 0], sizes = [256, 192], strides = [1, 1]} : vector<288x192xf32> to vector<256x192xf32>
    %c0_14 = arith.constant 0 : index
    %c0_15 = arith.constant 0 : index
    %c0_16 = arith.constant 0 : index
    %31 = vector.load %arg5[%c0_14, %c0_15, %c0_16] : memref<3x192x64xf32, #tpu.memory_space<vmem>>, vector<1x192x64xf32>
    %32 = vector.shape_cast %31 : vector<1x192x64xf32> to vector<192x64xf32>
    %cst_17 = arith.constant dense<0.000000e+00> : vector<256x64xf32>
    %33 = tpu.matmul %30, %32, %cst_17 {dimension_numbers = #tpu.dot_dimension_numbers<[1], [0], [0], [1], [0, 0, 1, 1], [], []>} : vector<256x192xf32>, vector<192x64xf32>, vector<256x64xf32> -> vector<256x64xf32>
    %34 = arith.addf %29, %33 : vector<256x64xf32>
    %35 = vector.extract_strided_slice %28 {offsets = [16, 0], sizes = [256, 192], strides = [1, 1]} : vector<288x192xf32> to vector<256x192xf32>
    %c1 = arith.constant 1 : index
    %c0_18 = arith.constant 0 : index
    %c0_19 = arith.constant 0 : index
    %36 = vector.load %arg5[%c1, %c0_18, %c0_19] : memref<3x192x64xf32, #tpu.memory_space<vmem>>, vector<1x192x64xf32>
    %37 = vector.shape_cast %36 : vector<1x192x64xf32> to vector<192x64xf32>
    %cst_20 = arith.constant dense<0.000000e+00> : vector<256x64xf32>
    %38 = tpu.matmul %35, %37, %cst_20 {dimension_numbers = #tpu.dot_dimension_numbers<[1], [0], [0], [1], [0, 0, 1, 1], [], []>} : vector<256x192xf32>, vector<192x64xf32>, vector<256x64xf32> -> vector<256x64xf32>
    %39 = arith.addf %34, %38 : vector<256x64xf32>
    %40 = vector.extract_strided_slice %28 {offsets = [32, 0], sizes = [256, 192], strides = [1, 1]} : vector<288x192xf32> to vector<256x192xf32>
    %c2 = arith.constant 2 : index
    %c0_21 = arith.constant 0 : index
    %c0_22 = arith.constant 0 : index
    %41 = vector.load %arg5[%c2, %c0_21, %c0_22] : memref<3x192x64xf32, #tpu.memory_space<vmem>>, vector<1x192x64xf32>
    %42 = vector.shape_cast %41 : vector<1x192x64xf32> to vector<192x64xf32>
    %cst_23 = arith.constant dense<0.000000e+00> : vector<256x64xf32>
    %43 = tpu.matmul %40, %42, %cst_23 {dimension_numbers = #tpu.dot_dimension_numbers<[1], [0], [0], [1], [0, 0, 1, 1], [], []>} : vector<256x192xf32>, vector<192x64xf32>, vector<256x64xf32> -> vector<256x64xf32>
    %44 = arith.addf %39, %43 : vector<256x64xf32>
    %c0_24 = arith.constant 0 : index
    %c0_25 = arith.constant 0 : index
    %45 = vector.load %arg6[%c0_24, %c0_25] : memref<1x64xf32, #tpu.memory_space<vmem>>, vector<1x64xf32>
    %46 = vector.broadcast %45 : vector<1x64xf32> to vector<256x64xf32>
    %47 = arith.mulf %44, %46 : vector<256x64xf32>
    %c0_26 = arith.constant 0 : index
    %c0_27 = arith.constant 0 : index
    %48 = vector.load %arg7[%c0_26, %c0_27] : memref<1x64xf32, #tpu.memory_space<vmem>>, vector<1x64xf32>
    %49 = vector.broadcast %48 : vector<1x64xf32> to vector<256x64xf32>
    %50 = arith.addf %47, %49 : vector<256x64xf32>
    %cst_28 = arith.constant 0.000000e+00 : f32
    %51 = vector.broadcast %cst_28 : f32 to vector<256x64xf32>
    %52 = arith.maximumf %50, %51 : vector<256x64xf32>
    %53 = vector.shape_cast %52 : vector<256x64xf32> to vector<8x32x64xf32>
    %54 = vector.extract_strided_slice %53 {offsets = [0, 0, 0], sizes = [8, 16, 64], strides = [1, 1, 1]} : vector<8x32x64xf32> to vector<8x16x64xf32>
    %55 = vector.extract_strided_slice %53 {offsets = [0, 16, 0], sizes = [8, 16, 64], strides = [1, 1, 1]} : vector<8x32x64xf32> to vector<8x16x64xf32>
    %56 = arith.maximumf %54, %55 : vector<8x16x64xf32>
    %57 = vector.shape_cast %56 : vector<8x16x64xf32> to vector<128x64xf32>
    %cst_29 = arith.constant 0.000000e+00 : f32
    %58 = vector.broadcast %cst_29 : f32 to vector<8x64xf32>
    %59 = tpu.concatenate %58, %57, %58 in 0 : vector<8x64xf32>, vector<128x64xf32>, vector<8x64xf32> -> vector<144x64xf32>
    %60 = vector.extract_strided_slice %59 {offsets = [7, 0], sizes = [128, 64], strides = [1, 1]} : vector<144x64xf32> to vector<128x64xf32>
    %61 = vector.extract_strided_slice %59 {offsets = [9, 0], sizes = [128, 64], strides = [1, 1]} : vector<144x64xf32> to vector<128x64xf32>
    %62 = tpu.iota {dimensions = array<i32: 1>} : vector<8x16x64xi32>
    %63 = vector.shape_cast %62 : vector<8x16x64xi32> to vector<128x64xi32>
    %c0_i32_30 = arith.constant 0 : i32
    %64 = vector.broadcast %c0_i32_30 : i32 to vector<128x64xi32>
    %65 = arith.cmpi eq, %63, %64 : vector<128x64xi32>
    %cst_31 = arith.constant 0.000000e+00 : f32
    %66 = vector.broadcast %cst_31 : f32 to vector<128x64xf32>
    %67 = arith.select %65, %66, %60 : vector<128x64xi1>, vector<128x64xf32>
    %c15_i32_32 = arith.constant 15 : i32
    %68 = vector.broadcast %c15_i32_32 : i32 to vector<128x64xi32>
    %69 = arith.cmpi eq, %63, %68 : vector<128x64xi32>
    %cst_33 = arith.constant 0.000000e+00 : f32
    %70 = vector.broadcast %cst_33 : f32 to vector<128x64xf32>
    %71 = arith.select %69, %70, %61 : vector<128x64xi1>, vector<128x64xf32>
    %72 = tpu.concatenate %67, %57, %71 in 1 : vector<128x64xf32>, vector<128x64xf32>, vector<128x64xf32> -> vector<128x192xf32>
    %cst_34 = arith.constant 0.000000e+00 : f32
    %73 = vector.broadcast %cst_34 : f32 to vector<16x192xf32>
    %74 = tpu.concatenate %73, %72, %73 in 0 : vector<16x192xf32>, vector<128x192xf32>, vector<16x192xf32> -> vector<160x192xf32>
    %cst_35 = arith.constant 0.000000e+00 : f32
    %75 = vector.broadcast %cst_35 : f32 to vector<128x128xf32>
    %76 = vector.extract_strided_slice %74 {offsets = [0, 0], sizes = [128, 192], strides = [1, 1]} : vector<160x192xf32> to vector<128x192xf32>
    %c0_36 = arith.constant 0 : index
    %c0_37 = arith.constant 0 : index
    %c0_38 = arith.constant 0 : index
    %77 = vector.load %arg8[%c0_36, %c0_37, %c0_38] : memref<3x192x128xf32, #tpu.memory_space<vmem>>, vector<1x192x128xf32>
    %78 = vector.shape_cast %77 : vector<1x192x128xf32> to vector<192x128xf32>
    %cst_39 = arith.constant dense<0.000000e+00> : vector<128x128xf32>
    %79 = tpu.matmul %76, %78, %cst_39 {dimension_numbers = #tpu.dot_dimension_numbers<[1], [0], [0], [1], [0, 0, 1, 1], [], []>} : vector<128x192xf32>, vector<192x128xf32>, vector<128x128xf32> -> vector<128x128xf32>
    %80 = arith.addf %75, %79 : vector<128x128xf32>
    %81 = vector.extract_strided_slice %74 {offsets = [16, 0], sizes = [128, 192], strides = [1, 1]} : vector<160x192xf32> to vector<128x192xf32>
    %c1_40 = arith.constant 1 : index
    %c0_41 = arith.constant 0 : index
    %c0_42 = arith.constant 0 : index
    %82 = vector.load %arg8[%c1_40, %c0_41, %c0_42] : memref<3x192x128xf32, #tpu.memory_space<vmem>>, vector<1x192x128xf32>
    %83 = vector.shape_cast %82 : vector<1x192x128xf32> to vector<192x128xf32>
    %cst_43 = arith.constant dense<0.000000e+00> : vector<128x128xf32>
    %84 = tpu.matmul %81, %83, %cst_43 {dimension_numbers = #tpu.dot_dimension_numbers<[1], [0], [0], [1], [0, 0, 1, 1], [], []>} : vector<128x192xf32>, vector<192x128xf32>, vector<128x128xf32> -> vector<128x128xf32>
    %85 = arith.addf %80, %84 : vector<128x128xf32>
    %86 = vector.extract_strided_slice %74 {offsets = [32, 0], sizes = [128, 192], strides = [1, 1]} : vector<160x192xf32> to vector<128x192xf32>
    %c2_44 = arith.constant 2 : index
    %c0_45 = arith.constant 0 : index
    %c0_46 = arith.constant 0 : index
    %87 = vector.load %arg8[%c2_44, %c0_45, %c0_46] : memref<3x192x128xf32, #tpu.memory_space<vmem>>, vector<1x192x128xf32>
    %88 = vector.shape_cast %87 : vector<1x192x128xf32> to vector<192x128xf32>
    %cst_47 = arith.constant dense<0.000000e+00> : vector<128x128xf32>
    %89 = tpu.matmul %86, %88, %cst_47 {dimension_numbers = #tpu.dot_dimension_numbers<[1], [0], [0], [1], [0, 0, 1, 1], [], []>} : vector<128x192xf32>, vector<192x128xf32>, vector<128x128xf32> -> vector<128x128xf32>
    %90 = arith.addf %85, %89 : vector<128x128xf32>
    %c0_48 = arith.constant 0 : index
    %c0_49 = arith.constant 0 : index
    %91 = vector.load %arg9[%c0_48, %c0_49] : memref<1x128xf32, #tpu.memory_space<vmem>>, vector<1x128xf32>
    %92 = vector.broadcast %91 : vector<1x128xf32> to vector<128x128xf32>
    %93 = arith.mulf %90, %92 : vector<128x128xf32>
    %c0_50 = arith.constant 0 : index
    %c0_51 = arith.constant 0 : index
    %94 = vector.load %arg10[%c0_50, %c0_51] : memref<1x128xf32, #tpu.memory_space<vmem>>, vector<1x128xf32>
    %95 = vector.broadcast %94 : vector<1x128xf32> to vector<128x128xf32>
    %96 = arith.addf %93, %95 : vector<128x128xf32>
    %cst_52 = arith.constant 0.000000e+00 : f32
    %97 = vector.broadcast %cst_52 : f32 to vector<128x128xf32>
    %98 = arith.maximumf %96, %97 : vector<128x128xf32>
    %cst_53 = arith.constant 0.000000e+00 : f32
    %99 = vector.broadcast %cst_53 : f32 to vector<8x128xf32>
    %100 = tpu.concatenate %99, %98, %99 in 0 : vector<8x128xf32>, vector<128x128xf32>, vector<8x128xf32> -> vector<144x128xf32>
    %101 = vector.extract_strided_slice %100 {offsets = [7, 0], sizes = [128, 128], strides = [1, 1]} : vector<144x128xf32> to vector<128x128xf32>
    %102 = vector.extract_strided_slice %100 {offsets = [9, 0], sizes = [128, 128], strides = [1, 1]} : vector<144x128xf32> to vector<128x128xf32>
    %103 = tpu.iota {dimensions = array<i32: 1>} : vector<8x16x128xi32>
    %104 = vector.shape_cast %103 : vector<8x16x128xi32> to vector<128x128xi32>
    %c0_i32_54 = arith.constant 0 : i32
    %105 = vector.broadcast %c0_i32_54 : i32 to vector<128x128xi32>
    %106 = arith.cmpi eq, %104, %105 : vector<128x128xi32>
    %cst_55 = arith.constant 0.000000e+00 : f32
    %107 = vector.broadcast %cst_55 : f32 to vector<128x128xf32>
    %108 = arith.select %106, %107, %101 : vector<128x128xi1>, vector<128x128xf32>
    %c15_i32_56 = arith.constant 15 : i32
    %109 = vector.broadcast %c15_i32_56 : i32 to vector<128x128xi32>
    %110 = arith.cmpi eq, %104, %109 : vector<128x128xi32>
    %cst_57 = arith.constant 0.000000e+00 : f32
    %111 = vector.broadcast %cst_57 : f32 to vector<128x128xf32>
    %112 = arith.select %110, %111, %102 : vector<128x128xi1>, vector<128x128xf32>
    %113 = tpu.concatenate %108, %98, %112 in 1 : vector<128x128xf32>, vector<128x128xf32>, vector<128x128xf32> -> vector<128x384xf32>
    %cst_58 = arith.constant 0.000000e+00 : f32
    %114 = vector.broadcast %cst_58 : f32 to vector<16x384xf32>
    %115 = tpu.concatenate %114, %113, %114 in 0 : vector<16x384xf32>, vector<128x384xf32>, vector<16x384xf32> -> vector<160x384xf32>
    %cst_59 = arith.constant 0.000000e+00 : f32
    %116 = vector.broadcast %cst_59 : f32 to vector<128x128xf32>
    %117 = vector.extract_strided_slice %115 {offsets = [0, 0], sizes = [128, 384], strides = [1, 1]} : vector<160x384xf32> to vector<128x384xf32>
    %c0_60 = arith.constant 0 : index
    %c0_61 = arith.constant 0 : index
    %c0_62 = arith.constant 0 : index
    %118 = vector.load %arg11[%c0_60, %c0_61, %c0_62] : memref<3x384x128xf32, #tpu.memory_space<vmem>>, vector<1x384x128xf32>
    %119 = vector.shape_cast %118 : vector<1x384x128xf32> to vector<384x128xf32>
    %cst_63 = arith.constant dense<0.000000e+00> : vector<128x128xf32>
    %120 = tpu.matmul %117, %119, %cst_63 {dimension_numbers = #tpu.dot_dimension_numbers<[1], [0], [0], [1], [0, 0, 1, 1], [], []>} : vector<128x384xf32>, vector<384x128xf32>, vector<128x128xf32> -> vector<128x128xf32>
    %121 = arith.addf %116, %120 : vector<128x128xf32>
    %122 = vector.extract_strided_slice %115 {offsets = [16, 0], sizes = [128, 384], strides = [1, 1]} : vector<160x384xf32> to vector<128x384xf32>
    %c1_64 = arith.constant 1 : index
    %c0_65 = arith.constant 0 : index
    %c0_66 = arith.constant 0 : index
    %123 = vector.load %arg11[%c1_64, %c0_65, %c0_66] : memref<3x384x128xf32, #tpu.memory_space<vmem>>, vector<1x384x128xf32>
    %124 = vector.shape_cast %123 : vector<1x384x128xf32> to vector<384x128xf32>
    %cst_67 = arith.constant dense<0.000000e+00> : vector<128x128xf32>
    %125 = tpu.matmul %122, %124, %cst_67 {dimension_numbers = #tpu.dot_dimension_numbers<[1], [0], [0], [1], [0, 0, 1, 1], [], []>} : vector<128x384xf32>, vector<384x128xf32>, vector<128x128xf32> -> vector<128x128xf32>
    %126 = arith.addf %121, %125 : vector<128x128xf32>
    %127 = vector.extract_strided_slice %115 {offsets = [32, 0], sizes = [128, 384], strides = [1, 1]} : vector<160x384xf32> to vector<128x384xf32>
    %c2_68 = arith.constant 2 : index
    %c0_69 = arith.constant 0 : index
    %c0_70 = arith.constant 0 : index
    %128 = vector.load %arg11[%c2_68, %c0_69, %c0_70] : memref<3x384x128xf32, #tpu.memory_space<vmem>>, vector<1x384x128xf32>
    %129 = vector.shape_cast %128 : vector<1x384x128xf32> to vector<384x128xf32>
    %cst_71 = arith.constant dense<0.000000e+00> : vector<128x128xf32>
    %130 = tpu.matmul %127, %129, %cst_71 {dimension_numbers = #tpu.dot_dimension_numbers<[1], [0], [0], [1], [0, 0, 1, 1], [], []>} : vector<128x384xf32>, vector<384x128xf32>, vector<128x128xf32> -> vector<128x128xf32>
    %131 = arith.addf %126, %130 : vector<128x128xf32>
    %c0_72 = arith.constant 0 : index
    %c0_73 = arith.constant 0 : index
    %132 = vector.load %arg12[%c0_72, %c0_73] : memref<1x128xf32, #tpu.memory_space<vmem>>, vector<1x128xf32>
    %133 = vector.broadcast %132 : vector<1x128xf32> to vector<128x128xf32>
    %134 = arith.mulf %131, %133 : vector<128x128xf32>
    %c0_74 = arith.constant 0 : index
    %c0_75 = arith.constant 0 : index
    %135 = vector.load %arg13[%c0_74, %c0_75] : memref<1x128xf32, #tpu.memory_space<vmem>>, vector<1x128xf32>
    %136 = vector.broadcast %135 : vector<1x128xf32> to vector<128x128xf32>
    %137 = arith.addf %134, %136 : vector<128x128xf32>
    %cst_76 = arith.constant 0.000000e+00 : f32
    %138 = vector.broadcast %cst_76 : f32 to vector<128x128xf32>
    %139 = arith.maximumf %137, %138 : vector<128x128xf32>
    %140 = vector.shape_cast %139 : vector<128x128xf32> to vector<4x32x128xf32>
    %141 = vector.extract_strided_slice %140 {offsets = [0, 0, 0], sizes = [4, 16, 128], strides = [1, 1, 1]} : vector<4x32x128xf32> to vector<4x16x128xf32>
    %142 = vector.extract_strided_slice %140 {offsets = [0, 16, 0], sizes = [4, 16, 128], strides = [1, 1, 1]} : vector<4x32x128xf32> to vector<4x16x128xf32>
    %143 = arith.maximumf %141, %142 : vector<4x16x128xf32>
    %144 = vector.shape_cast %143 : vector<4x16x128xf32> to vector<64x128xf32>
    %c0_77 = arith.constant 0 : index
    %c0_78 = arith.constant 0 : index
    %c0_79 = arith.constant 0 : index
    %145 = vector.load %arg14[%c0_77, %c0_78, %c0_79] : memref<1x64x128xf32, #tpu.memory_space<vmem>>, vector<1x64x128xf32>
    %146 = vector.shape_cast %145 : vector<1x64x128xf32> to vector<64x128xf32>
    %147 = vector.shape_cast %144 : vector<64x128xf32> to vector<1x64x128xf32>
    tpu.vector_store %arg14[%c0_77, %c0_78, %c0_79], %147 {strides = array<i32>} : memref<1x64x128xf32, #tpu.memory_space<vmem>>, vector<1x64x128xf32>,
    return
  }
  func.func @transform_0(%arg0: i32) -> (i32, i32, i32) {
    %c0_i32 = arith.constant 0 : i32
    %c0_i32_0 = arith.constant 0 : i32
    %c0_i32_1 = arith.constant 0 : i32
    return %arg0, %c0_i32, %c0_i32_0 : i32, i32, i32
  }
  func.func @transform_1(%arg0: i32) -> (i32, i32) {
    %c0_i32 = arith.constant 0 : i32
    %c0_i32_0 = arith.constant 0 : i32
    %c0_i32_1 = arith.constant 0 : i32
    return %c0_i32, %c0_i32_0 : i32, i32
  }
  func.func @transform_2(%arg0: i32) -> (i32, i32) {
    %c0_i32 = arith.constant 0 : i32
    %c0_i32_0 = arith.constant 0 : i32
    %c0_i32_1 = arith.constant 0 : i32
    return %c0_i32, %c0_i32_0 : i32, i32
  }
  func.func @transform_3(%arg0: i32) -> (i32, i32) {
    %c0_i32 = arith.constant 0 : i32
    %c0_i32_0 = arith.constant 0 : i32
    %c0_i32_1 = arith.constant 0 : i32
    return %c0_i32, %c0_i32_0 : i32, i32
  }
  func.func @transform_4(%arg0: i32) -> (i32, i32, i32) {
    %c0_i32 = arith.constant 0 : i32
    %c0_i32_0 = arith.constant 0 : i32
    %c0_i32_1 = arith.constant 0 : i32
    %c0_i32_2 = arith.constant 0 : i32
    return %c0_i32, %c0_i32_0, %c0_i32_1 : i32, i32, i32
  }
  func.func @transform_5(%arg0: i32) -> (i32, i32) {
    %c0_i32 = arith.constant 0 : i32
    %c0_i32_0 = arith.constant 0 : i32
    %c0_i32_1 = arith.constant 0 : i32
    return %c0_i32, %c0_i32_0 : i32, i32
  }
  func.func @transform_6(%arg0: i32) -> (i32, i32) {
    %c0_i32 = arith.constant 0 : i32
    %c0_i32_0 = arith.constant 0 : i32
    %c0_i32_1 = arith.constant 0 : i32
    return %c0_i32, %c0_i32_0 : i32, i32
  }
  func.func @transform_7(%arg0: i32) -> (i32, i32, i32) {
    %c0_i32 = arith.constant 0 : i32
    %c0_i32_0 = arith.constant 0 : i32
    %c0_i32_1 = arith.constant 0 : i32
    %c0_i32_2 = arith.constant 0 : i32
    return %c0_i32, %c0_i32_0, %c0_i32_1 : i32, i32, i32
  }
  func.func @transform_8(%arg0: i32) -> (i32, i32) {
    %c0_i32 = arith.constant 0 : i32
    %c0_i32_0 = arith.constant 0 : i32
    %c0_i32_1 = arith.constant 0 : i32
    return %c0_i32, %c0_i32_0 : i32, i32
  }
  func.func @transform_9(%arg0: i32) -> (i32, i32) {
    %c0_i32 = arith.constant 0 : i32
    %c0_i32_0 = arith.constant 0 : i32
    %c0_i32_1 = arith.constant 0 : i32
    return %c0_i32, %c0_i32_0 : i32, i32
  }
  func.func @transform_10(%arg0: i32) -> (i32, i32, i32) {
    %c0_i32 = arith.constant 0 : i32
    %c0_i32_0 = arith.constant 0 : i32
    %c0_i32_1 = arith.constant 0 : i32
    %c0_i32_2 = arith.constant 0 : i32
    return %c0_i32, %c0_i32_0, %c0_i32_1 : i32, i32, i32
  }
  func.func @transform_11(%arg0: i32) -> (i32, i32) {
    %c0_i32 = arith.constant 0 : i32
    %c0_i32_0 = arith.constant 0 : i32
    %c0_i32_1 = arith.constant 0 : i32
    return %c0_i32, %c0_i32_0 : i32, i32
  }
  func.func @transform_12(%arg0: i32) -> (i32, i32) {
    %c0_i32 = arith.constant 0 : i32
    %c0_i32_0 = arith.constant 0 : i32
    %c0_i32_1 = arith.constant 0 : i32
    return %c0_i32, %c0_i32_0 : i32, i32
  }
  func.func @transform_13(%arg0: i32) -> (i32, i32, i32) {
    %c0_i32 = arith.constant 0 : i32
    %c0_i32_0 = arith.constant 0 : i32
    %c0_i32_1 = arith.constant 0 : i32
    return %arg0, %c0_i32, %c0_i32_0 : i32, i32, i32
  }
}

</mosaic_0001>

<bundles_post_ra>
// kernel: tpu_custom_call.1
= control target key start
LH: loop header
LB: loop body
LE: loop exit
PB: predicated region body
PF: predicated region fallthrough
CT: control target
= control target key end

     0   :  { %18 = vsyncpa [#allocation3], 0  ;;  %s9366_s0 = inlined_call_operand.vmem [shape: f32[2,256,9], index: 0, kind: input, shape index: {}]   ;;  %s9367_s1 = inlined_call_operand.vmem [shape: f32[9,64], index: 1, kind: input, shape index: {}]   ;;  %s9368_s2 = inlined_call_operand.vmem [shape: f32[1,64], index: 2, kind: input, shape index: {}]   ;;  %s9369_s3 = inlined_call_operand.vmem [shape: f32[1,64], index: 3, kind: input, shape index: {}]   ;;  %s9370_s4 = inlined_call_operand.vmem [shape: f32[3,192,64], index: 4, kind: input, shape index: {}]   ;;  %s9371_s5 = inlined_call_operand.vmem [shape: f32[1,64], index: 5, kind: input, shape index: {}]   ;;  %s9372_s6 = inlined_call_operand.vmem [shape: f32[1,64], index: 6, kind: input, shape index: {}]   ;;  %s9373_s7 = inlined_call_operand.hbm [shape: f32[3,192,128], index: 7, kind: input, shape index: {}]   ;;  %s9374_s8 = inlined_call_operand.vmem [shape: f32[1,128], index: 8, kind: input, shape index: {}]   ;;  %s9375_s9 = inlined_call_operand.vmem [shape: f32[1,128], index: 9, kind: input, shape index: {}]   ;;  %s9376_s10 = inlined_call_operand.vmem [shape: f32[3,384,128], index: 10, kind: input, shape index: {}]   ;;  %s9377_s11 = inlined_call_operand.vmem [shape: f32[1,128], index: 11, kind: input, shape index: {}]   ;;  %s9378_s12 = inlined_call_operand.vmem [shape: f32[1,128], index: 12, kind: input, shape index: {}]   ;;  %s9379_s13 = inlined_call_operand.hbm [shape: f32[2,64,128], index: 13, kind: output, shape index: {}]  }
   0x1   :  { %19 = vsyncpa [#allocation4], 0 }
   0x2   :  { %21 = vsyncpa [#allocation4 + $0x1], 0  ;;  %s6477_s25 = smov 0   ;;  %s6479_s26 = smov 0  }
   0x3   :  { %s6481_s27 = smov 0   ;;  %s6483_s28 = smov 0  }
   0x4 LB: > { %9417 = sst [smem:[#allocation8_spill]] %s6391_s27  ;;  %s6498_s29 = sadd.s32 4294967295, %s6395_s28   ;;  %s6395_s28 = sphi %s6483_s28, %s9485_s28   ;;  %s6391_s27 = sphi %s6481_s27, %s9487_s27   ;;  %s6387_s26 = sphi %s6479_s26, %s9489_s26   ;;  %s6383_s25 = sphi %s6477_s25, %s9488_s25  }
   0x5   : > { %s4542_s30 = sadd.s32 4294967294, %s6395_s28   ;;  %s6502_s14 = sadd.s32 1, %s6395_s28  }
   0x6   : > { %9418 = sst [smem:[#allocation9_spill]] %s6502_s14  ;;  %s312_s15 = sadd.s32 1, %s6391_s27 }
   0x7   : > { %s309_s16 = ssub.s32 %s6395_s28, %s6502_s14  ;;  %p322_p0 = scmp.ne.s32.totalorder %s6391_s27, %s6387_s26 }
   0x8   : > { %p310_p1 = scmp.eq.s32.totalorder %s309_s16, 0  ;;  %p323_p2 = scmp.eq.s32.totalorder %s6498_s29, 1 }
   0x9   : > { %p328_p3 = scmp.ne.s32.totalorder %s6387_s26, %s6383_s25  ;;  %p329_p4 = scmp.eq.s32.totalorder %s4542_s30, 1 }
   0xa   : > { %s6513_s17 = scalar_select %p310_p1, %s6391_s27, %s312_s15  }
   0xb   : > { %p6515_p5 = por %p323_p2, %p322_p0  ;;  %p6519_p6 = por %p329_p4, %p328_p3 }
   0xc   : > { %9419 = sst [smem:[#allocation10_spill]] %s6513_s17  ;;  %p4543_p7 = scmp.ge.s32.totalorder %s6395_s28, 1 }
   0xd   : > { %s9420_s18 = scalar_select %p6515_p5, 1, 0 }
   0xe   : > { %s9421_s19 = scalar_select %p6519_p6, 1, 0 }
   0xf   : > { %p336_p8 = scmp.lt.s32.totalorder %s6395_s28, 3  ;;  %p9383_p9 = scmp.eq.s32.totalorder %s6498_s29, 0 }
  0x10   : > { %s6397_s21 = smov [#allocation2]   ;;  %s6301_s15 = scalar_lea.hbm %s9373_s7, 9216 }
  0x11   : > { %p6526_p10 = pnand %p4543_p7, %p336_p8  ;;  %s366_s22 = sshll.u32 %s6397_s21, 4  ;;  %s367_s22 = int_to_ptr.vmem [resolvable:$true] %s366_s22 }
  0x12   : > { %p6302_p13 = scmp.ne.s32.totalorder %s9373_s7, %s6301_s15  ;;  %p6308_p3 = scmp.lt.u32.totalorder %s6301_s15, %s9373_s7 }
  0x13   : > { %s9422_s20 = scalar_select %p6526_p10, 1, 0 }
  0x14   : > { %p6249_p11 = pneg %p6526_p10 }
  0x16   : > { %p6534_p12 = pnand %p9383_p9, %p6249_p11 }
  0x18   : > { %p6303_p0 = pneg %p6534_p12 }
  0x1a   : > { %p6304_p1 = pnand %p6303_p0, %p6302_p13 }
  0x1c   : > { %p6305_p2 = pneg %p6304_p1 }
  0x1e   : > { %p6310_p4 = pnand %p6308_p3, %p6305_p2 }
  0x20   : > { %6313 = shalt.err (!%p6310_p4)
}
  0x21   : > { %s6314_s14 = scalar_lea.vmem %s367_s22, 9216  ;;  %p6322_p9 = scmp.lt.s32.totalorder %s367_s22, %s367_s22 }
  0x22   : > { %p6315_p7 = scmp.ne.s32.totalorder %s367_s22, %s6314_s14  ;;  %p6323_p6 = scmp.lt.s32.totalorder %s6314_s14, %s6314_s14 }
  0x24   : > { %p6317_p8 = pnand %p6315_p7, %p6303_p0  ;;  %p6324_p5 = por %p6323_p6, %p6322_p9 }
  0x26   : > { %p6318_p11 = pneg %p6317_p8 }
  0x28   : > { %p6325_p10 = pnand %p6324_p5, %p6318_p11 }
  0x2a   : > { %6328 = shalt.err (!%p6325_p10)
}
  0x2b   : > { %s6398_s17 = smov 128   ;;  %s6399_s24 = smov 8  }
  0x2c   : > { %6252 = dma.hbm_to_vmem [thread:$0]  (!%p6534_p12), %s9373_s7, 9216, %s367_s22, [#allocation3], %s6398_s17, %s6398_s17, %s6399_s24  }
  0x2d   : > { %p9424_p13 = scmp.ne.s32.totalorder %s9422_s20, 0 }
  0x2f   : > { %405 = sbr.rel (%p9424_p13) target bundleno = 1863 (0x747), region = 72 }
  0x36   : > { %p9425_p1 = scmp.eq.s32.totalorder %s6498_s29, 0 }
  0x38   : > { %6374 = dma.done.wait (%p9425_p1), [#allocation3], 9216   ;;  %p9426_p0 = pmov %p9425_p1 }
  0x39   : > { %p449_p5 = scmp.lt.s32.totalorder %s6498_s29, 1  ;;  %vm585_vm0 = vcmask 1040384   ;;  %vm488_vm1 = vcmask 72704   ;;  %vm6400_vm2 = vmmov 1   ;;  %v486_v0 = vld [vmem:[%s9367_s1] sm:$0xff]  ;;  %v4587_v36 = vld [vmem:[%s9370_s4 + $0xc8] sm:$0xff] }
  0x3a   : > { %6376 = vsyncadd (%p9426_p0), [#allocation3], 4294958080  ;;  %v487_v1 = vld [vmem:[%s9367_s1 + $0x8] sm:$0x1]  ;;  %v4586_v35 = vld [vmem:[%s9370_s4 + $0xc0] sm:$0xff]  ;;  %v9386_v38 = vmov 0.0|0.0  }
  0x3b   : > { %s450_s27 = scalar_select %p449_p5, %s6498_s29, 1  ;;  %vm5558_vm3 = vmpackc.low %vm585_vm0, %vm6400_vm2  ;;  %v5557_v3 = vpack.c.bf16 %v487_v1, %v486_v0  ;;  %v4588_v37 = vld [vmem:[%s9370_s4 + $0xd0] sm:$0xff]  ;;  %5563 = vmatprep.subr.bf16.mxu1 %v9386_v38  ;;  %v5564_v39 = vpack.c.bf16 %v4587_v36, %v4586_v35  ;;  %v4589_v40 = vld [vmem:[%s9370_s4 + $0xd8] sm:$0xff]  ;;  %vm1093_vm4 = vcmask 1046528   ;;  %vm1319_vm5 = vcmask 523264  }
  0x3c   : > { %v5567_v41 = vpack.c.bf16 %v4589_v40, %v4588_v37  ;;  %v4590_v42 = vld [vmem:[%s9370_s4 + $0xe0] sm:$0xff]  ;;  %v4591_v43 = vld [vmem:[%s9370_s4 + $0xe8] sm:$0xff]  ;;  %v4592_v45 = vld [vmem:[%s9370_s4 + $0xf0] sm:$0xff]  ;;  %s6402_s22 = smov 64   ;;  %s4966_s24 = sshll.u32 %s6498_s29, 10 }
  0x3d   : > { %s4965_s14 = sshll.u32 %s450_s27, 8  ;;  %5559 = vmatprep.subr.msk.bf16.mxu0 %vm5558_vm3, %v5557_v3  ;;  %5565 = vmatpush1.bf16.msra.mxu1 %v5564_v39  ;;  %v5570_v44 = vpack.c.bf16 %v4591_v43, %v4590_v42  ;;  %v4593_v46 = vld [vmem:[%s9370_s4 + $0xf8] sm:$0xff]  ;;  %v4594_v48 = vld [vmem:[%s9370_s4 + $0x100] sm:$0xff]  ;;  %v4595_v49 = vld [vmem:[%s9370_s4 + $0x108] sm:$0xff]  ;;  %p9483_p9 = scmp.ne.s32.totalorder %s9420_s18, 0 }
  0x3e   : > { %s6565_s21 = scalar_lea.vmem %s9366_s0, %s4965_s14  ;;  %5562 = vmatpush3.bf16.msk.msra.mxu0 %vm5558_vm3, %v5557_v3  ;;  %5566 = vmatprep.subr.bf16.mxu1 %v9386_v38  ;;  %v5573_v47 = vpack.c.bf16 %v4593_v46, %v4592_v45  ;;  %v5576_v50 = vpack.c.bf16 %v4595_v49, %v4594_v48  ;;  %v4596_v51 = vld [vmem:[%s9370_s4 + $0x110] sm:$0xff]  ;;  %v4597_v52 = vld [vmem:[%s9370_s4 + $0x118] sm:$0xff]  ;;  %v4598_v54 = vld [vmem:[%s9370_s4 + $0x120] sm:$0xff]  ;;  %s9317_s14 = scalar_lea.hbm %s9379_s13, %s4966_s24 }
  0x3f   : > { %v454_v2 = vld [vmem:[%s6565_s21] sm:$0xff]  ;;  %v455_v4 = vld [vmem:[%s6565_s21 + $0x8] sm:$0xff]  ;;  %v456_v5 = vld [vmem:[%s6565_s21 + $0x10] sm:$0xff]  ;;  %5671 = vmatprep.subr.bf16.mxu0 %v9386_v38  ;;  %v5579_v53 = vpack.c.bf16 %v4597_v52, %v4596_v51  ;;  %s6404_s15 = smov [#allocation5]  }
  0x40   : > { %5341 = vmatprep.mubr.msk.f32.mxu0 %vm488_vm1, %v454_v2  ;;  %v457_v6 = vld [vmem:[%s6565_s21 + $0x18] sm:$0xff]  ;;  %v458_v7 = vld [vmem:[%s6565_s21 + $0x20] sm:$0xff]  ;;  %v459_v8 = vld [vmem:[%s6565_s21 + $0x28] sm:$0xff]  ;;  %s6333_s20 = sshll.u32 %s6404_s15, 4  ;;  %s6334_s20 = int_to_ptr.vmem [resolvable:$false] %s6333_s20 }
  0x41   : > { %5342 = vmatmul.mubr.msk.f32.vlgmr.msra.gmra.mrb[0].mxu0 %vm488_vm1, %v455_v4  ;;  %v460_v9 = vld [vmem:[%s6565_s21 + $0x30] sm:$0xff]  ;;  %v461_v10 = vld [vmem:[%s6565_s21 + $0x38] sm:$0xff]  ;;  %v462_v11 = vld [vmem:[%s6565_s21 + $0x40] sm:$0xff]  ;;  %5568 = vmatpush1.bf16.msra.mxu1 %v5567_v41 }
  0x42   : > { %5344 = vmatprep.mubr.msk.f32.mxu0 %vm488_vm1, %v456_v5  ;;  %v463_v12 = vld [vmem:[%s6565_s21 + $0x48] sm:$0xff]  ;;  %v464_v13 = vld [vmem:[%s6565_s21 + $0x50] sm:$0xff]  ;;  %v465_v14 = vld [vmem:[%s6565_s21 + $0x58] sm:$0xff]  ;;  %5569 = vmatprep.subr.bf16.mxu1 %v9386_v38 }
  0x43   : > { %v466_v15 = vld [vmem:[%s6565_s21 + $0x60] sm:$0xff]  ;;  %v467_v16 = vld [vmem:[%s6565_s21 + $0x68] sm:$0xff]  ;;  %v468_v17 = vld [vmem:[%s6565_s21 + $0x70] sm:$0xff] }
  0x44   : > { %v469_v18 = vld [vmem:[%s6565_s21 + $0x78] sm:$0xff]  ;;  %v470_v19 = vld [vmem:[%s6565_s21 + $0x80] sm:$0xff]  ;;  %v471_v20 = vld [vmem:[%s6565_s21 + $0x88] sm:$0xff] }
  0x45   : > { %5345 = vmatmul.mubr.msk.f32.gmra.mrb[2].mxu0 %vm488_vm1, %v457_v6  ;;  %v472_v21 = vld [vmem:[%s6565_s21 + $0x90] sm:$0xff]  ;;  %v473_v22 = vld [vmem:[%s6565_s21 + $0x98] sm:$0xff]  ;;  %v474_v23 = vld [vmem:[%s6565_s21 + $0xa0] sm:$0xff]  ;;  %5571 = vmatpush1.bf16.msra.mxu1 %v5570_v44 }
  0x46   : > { %5347 = vmatprep.mubr.msk.f32.mxu0 %vm488_vm1, %v458_v7  ;;  %v475_v24 = vld [vmem:[%s6565_s21 + $0xa8] sm:$0xff]  ;;  %v476_v25 = vld [vmem:[%s6565_s21 + $0xb0] sm:$0xff]  ;;  %v477_v26 = vld [vmem:[%s6565_s21 + $0xb8] sm:$0xff]  ;;  %5572 = vmatprep.subr.bf16.mxu1 %v9386_v38 }
  0x47   : > { %v478_v27 = vld [vmem:[%s6565_s21 + $0xc0] sm:$0xff]  ;;  %v479_v28 = vld [vmem:[%s6565_s21 + $0xc8] sm:$0xff]  ;;  %v480_v29 = vld [vmem:[%s6565_s21 + $0xd0] sm:$0xff] }
  0x48   : > { %v481_v30 = vld [vmem:[%s6565_s21 + $0xd8] sm:$0xff]  ;;  %v482_v31 = vld [vmem:[%s6565_s21 + $0xe0] sm:$0xff]  ;;  %v483_v32 = vld [vmem:[%s6565_s21 + $0xe8] sm:$0xff] }
  0x49   : > { %5348 = vmatmul.mubr.msk.f32.gmra.mrb[4].mxu0 %vm488_vm1, %v459_v8  ;;  %v484_v33 = vld [vmem:[%s6565_s21 + $0xf0] sm:$0xff]  ;;  %v485_v34 = vld [vmem:[%s6565_s21 + $0xf8] sm:$0xff]  ;;  %5574 = vmatpush1.bf16.msra.mxu1 %v5573_v47  ;;  %v4599_v55 = vld [vmem:[%s9370_s4 + $0x128] sm:$0xff]  ;;  %s446_s21 = sand.u32 1, %s6387_s26  }
  0x4a   : > { %5350 = vmatprep.mubr.msk.f32.mxu0 %vm488_vm1, %v460_v9  ;;  %5575 = vmatprep.subr.bf16.mxu1 %v9386_v38  ;;  %v5582_v56 = vpack.c.bf16 %v4599_v55, %v4598_v54  ;;  %v4600_v57 = vld [vmem:[%s9370_s4 + $0x130] sm:$0xff]  ;;  %v4601_v58 = vld [vmem:[%s9370_s4 + $0x138] sm:$0xff]  ;;  %v4602_v60 = vld [vmem:[%s9370_s4 + $0x140] sm:$0xff]  ;;  %s9325_s29 = scalar_lea.sflag [#allocation4], %s446_s21 }
  0x4b   : > { %v5585_v59 = vpack.c.bf16 %v4601_v58, %v4600_v57  ;;  %v4603_v61 = vld [vmem:[%s9370_s4 + $0x148] sm:$0xff]  ;;  %v4604_v63 = vld [vmem:[%s9370_s4 + $0x150] sm:$0xff]  ;;  %v4605_v0 = vld [vmem:[%s9370_s4 + $0x158] sm:$0xff] }
  0x4c   : > { %v5588_v62 = vpack.c.bf16 %v4603_v61, %v4602_v60  ;;  %v5591_v1 = vpack.c.bf16 %v4605_v0, %v4604_v63  ;;  %v4606_v2 = vld [vmem:[%s9370_s4 + $0x160] sm:$0xff]  ;;  %v4607_v3 = vld [vmem:[%s9370_s4 + $0x168] sm:$0xff]  ;;  %v4608_v5 = vld [vmem:[%s9370_s4 + $0x170] sm:$0xff] }
  0x4d   : > { %5351 = vmatmul.mubr.msk.f32.gmra.mrb[6].mxu0 %vm488_vm1, %v461_v10  ;;  %5577 = vmatpush1.bf16.msra.mxu1 %v5576_v50  ;;  %v5594_v4 = vpack.c.bf16 %v4607_v3, %v4606_v2  ;;  %v4609_v6 = vld [vmem:[%s9370_s4 + $0x178] sm:$0xff]  ;;  %v6727_v8 = vld [vmem:[%s9368_s2] ss:$0 sm:$0xff] }
  0x4e   : > { %5353 = vmatprep.mubr.msk.f32.mxu0 %vm488_vm1, %v462_v11  ;;  %5578 = vmatprep.subr.bf16.mxu1 %v9386_v38  ;;  %v5597_v7 = vpack.c.bf16 %v4609_v6, %v4608_v5  ;;  %v6732_v10 = vld [vmem:[%s9369_s3] ss:$0 sm:$0xff] }
  0x51   : > { %5354 = vmatmul.mubr.msk.f32.gmra.mrb[8].mxu0 %vm488_vm1, %v463_v12  ;;  %5580 = vmatpush1.bf16.msra.mxu1 %v5579_v53 }
  0x52   : > { %5356 = vmatprep.mubr.msk.f32.mxu0 %vm488_vm1, %v464_v13  ;;  %5581 = vmatprep.subr.bf16.mxu1 %v9386_v38 }
  0x55   : > { %5357 = vmatmul.mubr.msk.f32.gmra.mrb[10].mxu0 %vm488_vm1, %v465_v14  ;;  %5583 = vmatpush1.bf16.msra.mxu1 %v5582_v56 }
  0x56   : > { %5359 = vmatprep.mubr.msk.f32.mxu0 %vm488_vm1, %v466_v15  ;;  %5584 = vmatprep.subr.bf16.mxu1 %v9386_v38 }
  0x59   : > { %5360 = vmatmul.mubr.msk.f32.gmra.mrb[12].mxu0 %vm488_vm1, %v467_v16  ;;  %5586 = vmatpush1.bf16.msra.mxu1 %v5585_v59 }
  0x5a   : > { %5362 = vmatprep.mubr.msk.f32.mxu0 %vm488_vm1, %v468_v17  ;;  %5587 = vmatprep.subr.bf16.mxu1 %v9386_v38 }
  0x5d   : > { %5363 = vmatmul.mubr.msk.f32.gmra.mrb[14].mxu0 %vm488_vm1, %v469_v18  ;;  %5589 = vmatpush1.bf16.msra.mxu1 %v5588_v62 }
  0x5e   : > { %5365 = vmatprep.mubr.msk.f32.mxu0 %vm488_vm1, %v470_v19  ;;  %5590 = vmatprep.subr.bf16.mxu1 %v9386_v38 }
  0x61   : > { %5366 = vmatmul.mubr.msk.f32.gmra.mrb[16].mxu0 %vm488_vm1, %v471_v20  ;;  %5592 = vmatpush1.bf16.msra.mxu1 %v5591_v1 }
  0x62   : > { %5368 = vmatprep.mubr.msk.f32.mxu0 %vm488_vm1, %v472_v21  ;;  %5593 = vmatprep.subr.bf16.mxu1 %v9386_v38 }
  0x65   : > { %5369 = vmatmul.mubr.msk.f32.gmra.mrb[18].mxu0 %vm488_vm1, %v473_v22  ;;  %5595 = vmatpush1.bf16.msra.mxu1 %v5594_v4 }
  0x66   : > { %5371 = vmatprep.mubr.msk.f32.mxu0 %vm488_vm1, %v474_v23  ;;  %5596 = vmatprep.subr.bf16.mxu1 %v9386_v38 }
  0x69   : > { %5372 = vmatmul.mubr.msk.f32.gmra.mrb[20].mxu0 %vm488_vm1, %v475_v24  ;;  %5598 = vmatpush1.bf16.msra.mxu1 %v5597_v7 }
  0x6a   : > { %5374 = vmatprep.mubr.msk.f32.mxu0 %vm488_vm1, %v476_v25  ;;  %5599 = vmatprep.subr.bf16.mxu1 %v9386_v38 }
  0x6d   : > { %5375 = vmatmul.mubr.msk.f32.gmra.mrb[22].mxu0 %vm488_vm1, %v477_v26 }
  0x6e   : > { %5377 = vmatprep.mubr.msk.f32.mxu0 %vm488_vm1, %v478_v27 }
  0x71   : > { %5378 = vmatmul.mubr.msk.f32.gmra.mrb[24].mxu0 %vm488_vm1, %v479_v28 }
  0x72   : > { %5380 = vmatprep.mubr.msk.f32.mxu0 %vm488_vm1, %v480_v29 }
  0x75   : > { %5381 = vmatmul.mubr.msk.f32.gmra.mrb[26].mxu0 %vm488_vm1, %v481_v30 }
  0x76   : > { %5383 = vmatprep.mubr.msk.f32.mxu0 %vm488_vm1, %v482_v31 }
  0x79   : > { %5384 = vmatmul.mubr.msk.f32.gmra.mrb[28].mxu0 %vm488_vm1, %v483_v32 }
  0x7a   : > { %5386 = vmatprep.mubr.msk.f32.mxu0 %vm488_vm1, %v484_v33 }
  0x7d   : > { %5387 = vmatmul.mubr.msk.f32.gmra.mrb[30].mxu0 %vm488_vm1, %v485_v34 }
 0x114   : > { %v5343_v9 = vpop.f32.mrb[0].mxu0 }
 0x115   : > { %v822_v11 = vmul.f32 %v5343_v9, %v6727_v8  ;;  %v655_v12 = vpop.f32.mrb[1].mxu0 }
 0x116   : > { %v821_v13 = vmul.f32 %v6727_v8, %v655_v12 }
 0x117   : > { %v861_v14 = vadd.f32 %v6732_v10, %v822_v11 }
 0x118   : > { %v860_v15 = vadd.f32 %v6732_v10, %v821_v13  ;;  %v5346_v16 = vpop.f32.mrb[2].mxu0 }
 0x119   : > { %v893_v17 = vmax.f32 %v861_v14, 0.0  ;;  %v824_v18 = vmul.f32 %v5346_v16, %v6727_v8  ;;  %v665_v19 = vpop.f32.mrb[3].mxu0 }
 0x11a   : > { %v6739_v20 = vmax.f32 %v860_v15, 0.0  ;;  %v823_v21 = vmul.f32 %v6727_v8, %v665_v19 }
 0x11b   : > { %v863_v22 = vadd.f32 %v6732_v10, %v824_v18  ;;  %v1095_v23 = vrot.slane %v893_v17, 1  ;;  %v965_v24 = vrot.slane %v893_v17, 7 }
 0x11c   : > { %v9388_v25 = vrot.slane %v6739_v20, 7  ;;  %v862_v26 = vadd.f32 %v6732_v10, %v823_v21  ;;  %1223 = vrot.lane.b32.xlu0 %v6739_v20, %s6402_s22  ;;  %v5349_v27 = vpop.f32.mrb[4].mxu0  ;;  %v1094_v28 = vrot.slane %v6739_v20, 1 }
 0x11d   : > { %v895_v29 = vmax.f32 %v863_v22, 0.0  ;;  %v826_v30 = vmul.f32 %v5349_v27, %v6727_v8  ;;  %v675_v31 = vpop.f32.mrb[5].mxu0 }
 0x11e   : > { %v894_v32 = vmax.f32 %v862_v26, 0.0  ;;  %v825_v33 = vmul.f32 %v6727_v8, %v675_v31  ;;  %v6751_v34 = vsel %vm1093_vm4, %v1094_v28, %v1095_v23  ;;  %v6762_v42 = vsel %vm585_vm0, %v9388_v25, %v965_v24 }
 0x11f   : > { %9427 = vst [vmem:[#allocation11_spill] sm:$0xff] %v6751_v34  ;;  %v1099_v35 = vrot.slane %v895_v29, 1  ;;  %v865_v36 = vadd.f32 %v6732_v10, %v826_v30  ;;  %4610 = vmatprep.mubr.msk.f32.mxu1 %vm1319_vm5, %v6751_v34  ;;  %v969_v43 = vrot.slane %v895_v29, 7 }
 0x120   : > { %v967_v37 = vrot.slane %v894_v32, 7  ;;  %v1097_v39 = vrot.slane %v894_v32, 1  ;;  %v864_v40 = vadd.f32 %v6732_v10, %v825_v33  ;;  %1225 = vrot.lane.b32.xlu0 %v893_v17, %s6402_s22  ;;  %1227 = vrot.lane.b32.xlu1 %v894_v32, %s6402_s22  ;;  %v5352_v41 = vpop.f32.mrb[6].mxu0 }
 0x121   : > { %v897_v44 = vmax.f32 %v865_v36, 0.0  ;;  %v828_v45 = vmul.f32 %v5352_v41, %v6727_v8  ;;  %v685_v46 = vpop.f32.mrb[7].mxu0 }
 0x122   : > { %v896_v47 = vmax.f32 %v864_v40, 0.0  ;;  %v827_v48 = vmul.f32 %v6727_v8, %v685_v46  ;;  %v6767_v49 = vsel %vm1093_vm4, %v1095_v23, %v1097_v39  ;;  %v6770_v50 = vsel %vm1093_vm4, %v1097_v39, %v1099_v35 }
 0x123   : > { %9428 = vst [vmem:[#allocation12_spill] sm:$0xff] %v6770_v50  ;;  %v1103_v51 = vrot.slane %v897_v44, 1  ;;  %v867_v52 = vadd.f32 %v6732_v10, %v828_v45  ;;  %v6777_v57 = vsel %vm585_vm0, %v965_v24, %v967_v37  ;;  %v973_v58 = vrot.slane %v897_v44, 7 }
 0x124   : > { %v971_v53 = vrot.slane %v896_v47, 7  ;;  %v1101_v54 = vrot.slane %v896_v47, 1  ;;  %v866_v55 = vadd.f32 %v6732_v10, %v827_v48  ;;  %1229 = vrot.lane.b32.xlu1 %v895_v29, %s6402_s22  ;;  %1231 = vrot.lane.b32.xlu0 %v896_v47, %s6402_s22  ;;  %v5355_v56 = vpop.f32.mrb[8].mxu0  ;;  %v6781_v62 = vsel %vm585_vm0, %v967_v37, %v969_v43 }
 0x125   : > { %v899_v59 = vmax.f32 %v867_v52, 0.0  ;;  %v830_v60 = vmul.f32 %v5355_v56, %v6727_v8  ;;  %v695_v61 = vpop.f32.mrb[9].mxu0 }
 0x126   : > { %v898_v63 = vmax.f32 %v866_v55, 0.0  ;;  %v829_v0 = vmul.f32 %v6727_v8, %v695_v61  ;;  %v6785_v1 = vsel %vm1093_vm4, %v1099_v35, %v1101_v54  ;;  %v6788_v2 = vsel %vm1093_vm4, %v1101_v54, %v1103_v51 }
 0x127   : > { %v1107_v3 = vrot.slane %v899_v59, 1  ;;  %v869_v4 = vadd.f32 %v6732_v10, %v830_v60  ;;  %v977_v5 = vrot.slane %v899_v59, 7  ;;  %v6795_v11 = vsel %vm585_vm0, %v969_v43, %v971_v53 }
 0x128   : > { %v1105_v6 = vrot.slane %v898_v63, 1  ;;  %v868_v7 = vadd.f32 %v6732_v10, %v829_v0  ;;  %1233 = vrot.lane.b32.xlu1 %v897_v44, %s6402_s22  ;;  %1235 = vrot.lane.b32.xlu0 %v898_v63, %s6402_s22  ;;  %v5358_v9 = vpop.f32.mrb[10].mxu0  ;;  %v975_v12 = vrot.slane %v898_v63, 7  ;;  %v6799_v16 = vsel %vm585_vm0, %v971_v53, %v973_v58 }
 0x129   : > { %v901_v13 = vmax.f32 %v869_v4, 0.0  ;;  %v832_v14 = vmul.f32 %v5358_v9, %v6727_v8  ;;  %v705_v15 = vpop.f32.mrb[11].mxu0 }
 0x12a   : > { %v900_v17 = vmax.f32 %v868_v7, 0.0  ;;  %v831_v18 = vmul.f32 %v6727_v8, %v705_v15  ;;  %v6803_v19 = vsel %vm1093_vm4, %v1103_v51, %v1105_v6  ;;  %v6806_v21 = vsel %vm1093_vm4, %v1105_v6, %v1107_v3 }
 0x12b   : > { %v871_v22 = vadd.f32 %v6732_v10, %v832_v14  ;;  %v1111_v23 = vrot.slane %v901_v13, 1  ;;  %v6814_v31 = vsel %vm585_vm0, %v973_v58, %v975_v12  ;;  %v6817_v32 = vsel %vm585_vm0, %v975_v12, %v977_v5 }
 0x12c   : > { %v1109_v24 = vrot.slane %v900_v17, 1  ;;  %v870_v26 = vadd.f32 %v6732_v10, %v831_v18  ;;  %1237 = vrot.lane.b32.xlu1 %v899_v59, %s6402_s22  ;;  %1239 = vrot.lane.b32.xlu0 %v900_v17, %s6402_s22  ;;  %v5361_v27 = vpop.f32.mrb[12].mxu0  ;;  %v979_v28 = vrot.slane %v900_v17, 7  ;;  %v981_v40 = vrot.slane %v901_v13, 7 }
 0x12d   : > { %v834_v29 = vmul.f32 %v5361_v27, %v6727_v8  ;;  %v715_v30 = vpop.f32.mrb[13].mxu0  ;;  %v903_v37 = vmax.f32 %v871_v22, 0.0 }
 0x12e   : > { %v902_v33 = vmax.f32 %v870_v26, 0.0  ;;  %v833_v35 = vmul.f32 %v6727_v8, %v715_v30  ;;  %v6821_v36 = vsel %vm1093_vm4, %v1107_v3, %v1109_v24  ;;  %v6828_v45 = vsel %vm1093_vm4, %v1109_v24, %v1111_v23 }
 0x12f   : > { %v873_v39 = vadd.f32 %v6732_v10, %v834_v29  ;;  %v1115_v46 = vrot.slane %v903_v37, 1  ;;  %v6832_v52 = vsel %vm585_vm0, %v977_v5, %v979_v28  ;;  %v985_v58 = vrot.slane %v903_v37, 7 }
 0x130   : > { %v1113_v41 = vrot.slane %v902_v33, 1  ;;  %v872_v43 = vadd.f32 %v6732_v10, %v833_v35  ;;  %1241 = vrot.lane.b32.xlu1 %v901_v13, %s6402_s22  ;;  %1243 = vrot.lane.b32.xlu0 %v902_v33, %s6402_s22  ;;  %v5364_v44 = vpop.f32.mrb[14].mxu0  ;;  %v983_v47 = vrot.slane %v902_v33, 7  ;;  %v6843_v3 = vsel %vm585_vm0, %v979_v28, %v981_v40 }
 0x131   : > { %v836_v48 = vmul.f32 %v5364_v44, %v6727_v8  ;;  %v725_v51 = vpop.f32.mrb[15].mxu0  ;;  %v905_v53 = vmax.f32 %v873_v39, 0.0 }
 0x132   : > { %v904_v54 = vmax.f32 %v872_v43, 0.0  ;;  %v835_v55 = vmul.f32 %v6727_v8, %v725_v51  ;;  %v6836_v56 = vsel %vm1093_vm4, %v1111_v23, %v1113_v41  ;;  %v6847_v7 = vsel %vm1093_vm4, %v1113_v41, %v1115_v46 }
 0x133   : > { %v875_v59 = vadd.f32 %v6732_v10, %v836_v48  ;;  %v1119_v60 = vrot.slane %v905_v53, 1  ;;  %v6850_v9 = vsel %vm585_vm0, %v981_v40, %v983_v47  ;;  %v989_v17 = vrot.slane %v905_v53, 7 }
 0x134   : > { %v1117_v61 = vrot.slane %v904_v54, 1  ;;  %v874_v63 = vadd.f32 %v6732_v10, %v835_v55  ;;  %1245 = vrot.lane.b32.xlu1 %v903_v37, %s6402_s22  ;;  %1247 = vrot.lane.b32.xlu0 %v904_v54, %s6402_s22  ;;  %v5367_v0 = vpop.f32.mrb[16].mxu0  ;;  %v987_v4 = vrot.slane %v904_v54, 7  ;;  %v6861_v27 = vsel %vm585_vm0, %v983_v47, %v985_v58 }
 0x135   : > { %v838_v5 = vmul.f32 %v5367_v0, %v6727_v8  ;;  %v735_v6 = vpop.f32.mrb[17].mxu0  ;;  %v907_v12 = vmax.f32 %v875_v59, 0.0 }
 0x136   : > { %v906_v13 = vmax.f32 %v874_v63, 0.0  ;;  %v837_v14 = vmul.f32 %v6727_v8, %v735_v6  ;;  %v6854_v15 = vsel %vm1093_vm4, %v1115_v46, %v1117_v61  ;;  %v6865_v33 = vsel %vm1093_vm4, %v1117_v61, %v1119_v60 }
 0x137   : > { %v877_v18 = vadd.f32 %v6732_v10, %v838_v5  ;;  %v1123_v22 = vrot.slane %v907_v12, 1  ;;  %v6868_v35 = vsel %vm585_vm0, %v985_v58, %v987_v4  ;;  %v993_v43 = vrot.slane %v907_v12, 7 }
 0x138   : > { %v1121_v23 = vrot.slane %v906_v13, 1  ;;  %v876_v24 = vadd.f32 %v6732_v10, %v837_v14  ;;  %1249 = vrot.lane.b32.xlu1 %v905_v53, %s6402_s22  ;;  %1251 = vrot.lane.b32.xlu0 %v906_v13, %s6402_s22  ;;  %v5370_v26 = vpop.f32.mrb[18].mxu0  ;;  %v991_v28 = vrot.slane %v906_v13, 7  ;;  %v6880_v59 = vsel %vm585_vm0, %v987_v4, %v989_v17 }
 0x139   : > { %v840_v29 = vmul.f32 %v5370_v26, %v6727_v8  ;;  %v745_v30 = vpop.f32.mrb[19].mxu0  ;;  %v909_v37 = vmax.f32 %v877_v18, 0.0 }
 0x13a   : > { %v908_v39 = vmax.f32 %v876_v24, 0.0  ;;  %v839_v40 = vmul.f32 %v6727_v8, %v745_v30  ;;  %v6872_v41 = vsel %vm1093_vm4, %v1119_v60, %v1121_v23  ;;  %v6883_v60 = vsel %vm1093_vm4, %v1121_v23, %v1123_v22 }
 0x13b   : > { %v879_v44 = vadd.f32 %v6732_v10, %v840_v29  ;;  %v1127_v46 = vrot.slane %v909_v37, 1  ;;  %v6887_v0 = vsel %vm585_vm0, %v989_v17, %v991_v28  ;;  %v6898_v26 = vsel %vm585_vm0, %v991_v28, %v993_v43 }
 0x13c   : > { %v995_v47 = vrot.slane %v908_v39, 7  ;;  %v1125_v48 = vrot.slane %v908_v39, 1  ;;  %v878_v51 = vadd.f32 %v6732_v10, %v839_v40  ;;  %1253 = vrot.lane.b32.xlu1 %v907_v12, %s6402_s22  ;;  %1255 = vrot.lane.b32.xlu0 %v908_v39, %s6402_s22  ;;  %v5373_v53 = vpop.f32.mrb[20].mxu0  ;;  %v997_v12 = vrot.slane %v909_v37, 7 }
 0x13d   : > { %v911_v54 = vmax.f32 %v879_v44, 0.0  ;;  %v842_v55 = vmul.f32 %v5373_v53, %v6727_v8  ;;  %v755_v58 = vpop.f32.mrb[21].mxu0 }
 0x13e   : > { %v910_v61 = vmax.f32 %v878_v51, 0.0  ;;  %v841_v63 = vmul.f32 %v6727_v8, %v755_v58  ;;  %v6890_v5 = vsel %vm1093_vm4, %v1123_v22, %v1125_v48  ;;  %v6901_v22 = vsel %vm1093_vm4, %v1125_v48, %v1127_v46 }
 0x13f   : > { %v881_v6 = vadd.f32 %v6732_v10, %v842_v55  ;;  %v1131_v13 = vrot.slane %v911_v54, 1  ;;  %v6905_v39 = vsel %vm585_vm0, %v993_v43, %v995_v47  ;;  %v1001_v51 = vrot.slane %v911_v54, 7 }
 0x140   : > { %v1129_v14 = vrot.slane %v910_v61, 1  ;;  %v880_v4 = vadd.f32 %v6732_v10, %v841_v63  ;;  %1257 = vrot.lane.b32.xlu1 %v909_v37, %s6402_s22  ;;  %1259 = vrot.lane.b32.xlu0 %v910_v61, %s6402_s22  ;;  %v5376_v18 = vpop.f32.mrb[22].mxu0  ;;  %v999_v23 = vrot.slane %v910_v61, 7  ;;  %v6916_v61 = vsel %vm585_vm0, %v995_v47, %v997_v12 }
 0x141   : > { %v844_v24 = vmul.f32 %v5376_v18, %v6727_v8  ;;  %v765_v17 = vpop.f32.mrb[23].mxu0  ;;  %v913_v40 = vmax.f32 %v881_v6, 0.0 }
 0x142   : > { %v912_v29 = vmax.f32 %v880_v4, 0.0  ;;  %v843_v30 = vmul.f32 %v6727_v8, %v765_v17  ;;  %v6908_v37 = vsel %vm1093_vm4, %v1127_v46, %v1129_v14  ;;  %v6919_v46 = vsel %vm1093_vm4, %v1129_v14, %v1131_v13 }
 0x143   : > { %v883_v44 = vadd.f32 %v6732_v10, %v844_v24  ;;  %v1135_v55 = vrot.slane %v913_v40, 1  ;;  %v6923_v18 = vsel %vm585_vm0, %v997_v12, %v999_v23  ;;  %v1005_v17 = vrot.slane %v913_v40, 7 }
 0x144   : > { %v1133_v53 = vrot.slane %v912_v29, 1  ;;  %v882_v28 = vadd.f32 %v6732_v10, %v843_v30  ;;  %1261 = vrot.lane.b32.xlu1 %v911_v54, %s6402_s22  ;;  %1263 = vrot.lane.b32.xlu0 %v912_v29, %s6402_s22  ;;  %v5379_v48 = vpop.f32.mrb[24].mxu0  ;;  %v1003_v63 = vrot.slane %v912_v29, 7 }
 0x145   : > { %v846_v58 = vmul.f32 %v5379_v48, %v6727_v8  ;;  %v775_v43 = vpop.f32.mrb[25].mxu0  ;;  %v915_v54 = vmax.f32 %v883_v44, 0.0  ;;  %v6934_v44 = vsel %vm585_vm0, %v999_v23, %v1001_v51 }
 0x146   : > { %v914_v6 = vmax.f32 %v882_v28, 0.0  ;;  %v845_v4 = vmul.f32 %v6727_v8, %v775_v43  ;;  %v6930_v14 = vsel %vm1093_vm4, %v1131_v13, %v1133_v53  ;;  %9430 = vst [vmem:[#allocation14_spill] sm:$0xff] %v6934_v44 }
 0x147   : > { %v885_v24 = vadd.f32 %v6732_v10, %v846_v58  ;;  %9429 = vst [vmem:[#allocation13_spill] sm:$0xff] %v6930_v14  ;;  %v1139_v29 = vrot.slane %v915_v54, 1  ;;  %v1009_v34 = vrot.slane %v915_v54, 7 }
 0x148   : > { %v1137_v30 = vrot.slane %v914_v6, 1  ;;  %v884_v48 = vadd.f32 %v6732_v10, %v845_v4  ;;  %1265 = vrot.lane.b32.xlu1 %v913_v40, %s6402_s22  ;;  %1267 = vrot.lane.b32.xlu0 %v914_v6, %s6402_s22  ;;  %v5382_v47 = vpop.f32.mrb[26].mxu0  ;;  %v1007_v28 = vrot.slane %v914_v6, 7  ;;  %v6938_v4 = vsel %vm1093_vm4, %v1133_v53, %v1135_v55 }
 0x149   : > { %v848_v12 = vmul.f32 %v5382_v47, %v6727_v8  ;;  %v785_v43 = vpop.f32.mrb[27].mxu0  ;;  %9431 = vst [vmem:[#allocation15_spill] sm:$0xff] %v6938_v4  ;;  %v6941_v40 = vsel %vm585_vm0, %v1001_v51, %v1003_v63  ;;  %v917_v25 = vmax.f32 %v885_v24, 0.0  ;;  %v6952_v24 = vsel %vm585_vm0, %v1003_v63, %v1005_v17 }
 0x14a   : > { %v916_v58 = vmax.f32 %v884_v48, 0.0  ;;  %v847_v38 = vmul.f32 %v6727_v8, %v785_v43  ;;  %9432 = vst [vmem:[#allocation16_spill] sm:$0xff] %v6941_v40  ;;  %v6948_v48 = vsel %vm1093_vm4, %v1135_v55, %v1137_v30  ;;  %9434 = vst [vmem:[#allocation18_spill] sm:$0xff] %v6952_v24  ;;  %v6971_v24 = vsel %vm585_vm0, %v1007_v28, %v1009_v34 }
 0x14b   : > { %v887_v13 = vadd.f32 %v6732_v10, %v848_v12  ;;  %9433 = vst [vmem:[#allocation17_spill] sm:$0xff] %v6948_v48  ;;  %v1143_v53 = vrot.slane %v917_v25, 1  ;;  %v1013_v48 = vrot.slane %v917_v25, 7 }
 0x14c   : > { %v1141_v6 = vrot.slane %v916_v58, 1  ;;  %v886_v47 = vadd.f32 %v6732_v10, %v847_v38  ;;  %1269 = vrot.lane.b32.xlu1 %v915_v54, %s6402_s22  ;;  %1271 = vrot.lane.b32.xlu0 %v916_v58, %s6402_s22  ;;  %v5385_v23 = vpop.f32.mrb[28].mxu0  ;;  %v6956_v38 = vsel %vm1093_vm4, %v1137_v30, %v1139_v29  ;;  %v6959_v54 = vsel %vm585_vm0, %v1005_v17, %v1007_v28 }
 0x14d   : > { %v919_v43 = vmax.f32 %v887_v13, 0.0  ;;  %v850_v51 = vmul.f32 %v5385_v23, %v6727_v8  ;;  %v795_v40 = vpop.f32.mrb[29].mxu0  ;;  %9435 = vst [vmem:[#allocation19_spill] sm:$0xff] %v6956_v38  ;;  %9436 = vst [vmem:[#allocation20_spill] sm:$0xff] %v6959_v54  ;;  %v1011_v44 = vrot.slane %v916_v58, 7 }
 0x14e   : > { %v918_v12 = vmax.f32 %v886_v47, 0.0  ;;  %v849_v4 = vmul.f32 %v6727_v8, %v795_v40  ;;  %v6966_v40 = vsel %vm1093_vm4, %v1139_v29, %v1141_v6 }
 0x14f   : > { %v889_v55 = vadd.f32 %v6732_v10, %v850_v51  ;;  %v1147_v13 = vrot.slane %v919_v43, 1  ;;  %9437 = vst [vmem:[#allocation21_spill] sm:$0xff] %v6966_v40  ;;  %v6978_v40 = vsel %vm585_vm0, %v1009_v34, %v1011_v44 }
 0x150   : > { %v888_v23 = vadd.f32 %v6732_v10, %v849_v4  ;;  %1273 = vrot.lane.b32.xlu1 %v917_v25, %s6402_s22  ;;  %1275 = vrot.lane.b32.xlu0 %v918_v12, %s6402_s22  ;;  %v5388_v63 = vpop.f32.mrb[30].mxu0  ;;  %v1015_v30 = vrot.slane %v918_v12, 7  ;;  %v1145_v47 = vrot.slane %v918_v12, 1  ;;  %v6974_v25 = vsel %vm1093_vm4, %v1141_v6, %v1143_v53 }
 0x151   : > { %v921_v38 = vmax.f32 %v889_v55, 0.0  ;;  %v852_v17 = vmul.f32 %v5388_v63, %v6727_v8  ;;  %v805_v58 = vpop.f32.mrb[31].mxu0  ;;  %v1017_v4 = vrot.slane %v919_v43, 7  ;;  %v6989_v6 = vsel %vm585_vm0, %v1011_v44, %v1013_v48 }
 0x152   : > { %v920_v54 = vmax.f32 %v888_v23, 0.0  ;;  %v851_v51 = vmul.f32 %v6727_v8, %v805_v58  ;;  %v6986_v28 = vsel %vm1093_vm4, %v1143_v53, %v1145_v47  ;;  %v6992_v34 = vsel %vm1093_vm4, %v1145_v47, %v1147_v13 }
 0x153   : > { %v1021_v14 = vrot.slane %v921_v38, 7  ;;  %v891_v29 = vadd.f32 %v6732_v10, %v852_v17  ;;  %v1151_v12 = vrot.slane %v921_v38, 1  ;;  %v6995_v58 = vsel %vm585_vm0, %v1013_v48, %v1015_v30 }
 0x154   : > { %v1019_v55 = vrot.slane %v920_v54, 7  ;;  %v1149_v63 = vrot.slane %v920_v54, 1  ;;  %v890_v23 = vadd.f32 %v6732_v10, %v851_v51  ;;  %1277 = vrot.lane.b32.xlu1 %v919_v43, %s6402_s22  ;;  %1279 = vrot.lane.b32.xlu0 %v920_v54, %s6402_s22  ;;  %v7005_v44 = vsel %vm585_vm0, %v1015_v30, %v1017_v4 }
 0x155   : > { %v6983_v8 = vmax.f32 %v891_v29, 0.0 }
 0x156   : > { %v922_v17 = vmax.f32 %v890_v23, 0.0  ;;  %v6998_v10 = vsel %vm1093_vm4, %v1147_v13, %v1149_v63  ;;  %v7008_v47 = vsel %vm1093_vm4, %v1149_v63, %v1151_v12  ;;  %v7011_v48 = vsel %vm585_vm0, %v1017_v4, %v1019_v55 }
 0x157   : > { %v1025_v43 = vrot.slane %v6983_v8, 7  ;;  %v9392_v54 = vrot.slane %v6983_v8, 1  ;;  %9438 = vst [vmem:[#allocation22_spill] sm:$0xff] %v7008_v47  ;;  %v7014_v13 = vsel %vm585_vm0, %v1019_v55, %v1021_v14  ;;  %v924_v4 = vlaneseq }
 0x158   : > { %v1023_v51 = vrot.slane %v922_v17, 7  ;;  %v1153_v53 = vrot.slane %v922_v17, 1  ;;  %1281 = vrot.lane.b32.xlu1 %v921_v38, %s6402_s22  ;;  %1283 = vrot.lane.b32.xlu0 %v922_v17, %s6402_s22  ;;  %v9393_v23 = vmov 0.0  }
 0x159   : > { %v7032_v55 = vshrl.u32 %v924_v4, 7 }
 0x15a   : > { %v7017_v29 = vsel %vm1093_vm4, %v1151_v12, %v1153_v53  ;;  %v7022_v38 = vsel %vm1093_vm4, %v1153_v53, %v9392_v54  ;;  %v7025_v30 = vsel %vm585_vm0, %v1021_v14, %v1023_v51  ;;  %v7028_v63 = vsel %vm585_vm0, %v1023_v51, %v1025_v43  ;;  %v1352_v14 = vld [vmem:[%s9370_s4] sm:$0xff]  ;;  %v1353_v43 = vld [vmem:[%s9370_s4 + $0x8] sm:$0xff] }
 0x15b   : > { %9439 = vst [vmem:[#allocation23_spill] sm:$0xff] %v7025_v30  ;;  %9440 = vst [vmem:[#allocation24_spill] sm:$0xff] %v7028_v63  ;;  %v7035_v12 = vrot.slane %v9393_v23, 7  ;;  %v7038_v17 = vadd.s32 8, %v7032_v55  ;;  %vm927_vm6 = vcmp.eq.s32.totalorder %v7032_v55, 0  ;;  %v9443_v51 = vrot.slane %v6739_v20, 7 }
 0x15c   : > { %1285 = vrot.lane.b32.xlu1 %v6983_v8, %s6402_s22  ;;  %v5600_v4 = vpack.c.bf16 %v1353_v43, %v1352_v14  ;;  %v1354_v63 = vld [vmem:[%s9370_s4 + $0x10] sm:$0xff]  ;;  %v1355_v30 = vld [vmem:[%s9370_s4 + $0x18] sm:$0xff]  ;;  %vm8459_vm8 = vmneg %vm927_vm6 }
 0x15d   : > { %9441 = vst [vmem:[#allocation25_spill] sm:$0xff] %v7035_v12  ;;  %9442 = vst [vmem:[#allocation26_spill] sm:$0xff] %v7038_v17  ;;  %v964_v53 = vsel %vm585_vm0, %v7035_v12, %v9443_v51  ;;  %vm1092_vm7 = vcmp.eq.s32.totalorder %v7038_v17, 15  ;;  %v5603_v43 = vpack.c.bf16 %v1355_v30, %v1354_v63  ;;  %v9444_v12 = vmov 0.0|0.0   ;;  %v4810_v55 = vld [vmem:[%s9376_s10 + $0x2a0] sm:$0xff] }
 0x15e   : > { %v1059_v23 = vsel %vm927_vm6, 0.0, %v964_v53  ;;  %v7067_v14 = vsel %vm1092_vm7, 0.0, %v6767_v49  ;;  %v1061_v63 = vsel %vm927_vm6, 0.0, %v6777_v57  ;;  %v7102_v57 = vsel %vm1092_vm7, 0.0, %v6785_v1  ;;  %vm8739_vm9 = vmneg %vm1092_vm7 }
 0x18e   : > { %v1224_v54 = vpop.permute.xlu0 %1223 }
 0x18f   : > { %v7061_v20 = vsel %vm1319_vm5, %v1059_v23, %v1224_v54  ;;  %v1356_v54 = vld [vmem:[%s9370_s4 + $0x20] sm:$0xff]  ;;  %v1357_v23 = vld [vmem:[%s9370_s4 + $0x28] sm:$0xff] }
 0x190   : > { %1562 = vmatmul.mubr.f32.vlgmr.msra.gmra.mrb[0].mxu1 %v7061_v20  ;;  %v5606_v30 = vpack.c.bf16 %v1357_v23, %v1356_v54  ;;  %v1361_v54 = vld [vmem:[%s9370_s4 + $0x48] sm:$0xff] }
 0x191   : > { %5601 = vmatpush1.bf16.msra.mxu1 %v5600_v4  ;;  %4611 = vmatprep.mubr.msk.f32.mxu1 %vm1319_vm5, %v7067_v14  ;;  %v1358_v4 = vld [vmem:[%s9370_s4 + $0x30] sm:$0xff] }
 0x192   : > { %v1226_v51 = vpop.permute.xlu0 %1225  ;;  %v1228_v53 = vpop.permute.xlu1 %1227  ;;  %5602 = vmatprep.subr.bf16.mxu1 %v9444_v12 }
 0x193   : > { %v7080_v49 = vsel %vm1319_vm5, %v6762_v42, %v1226_v51  ;;  %v1359_v42 = vld [vmem:[%s9370_s4 + $0x38] sm:$0xff]  ;;  %v7096_v51 = vsel %vm1319_vm5, %v1061_v63, %v1228_v53  ;;  %v1360_v53 = vld [vmem:[%s9370_s4 + $0x40] sm:$0xff]  ;;  %v1063_v63 = vsel %vm927_vm6, 0.0, %v6795_v11  ;;  %v7137_v11 = vsel %vm1092_vm7, 0.0, %v6803_v19 }
 0x194   : > { %1567 = vmatmul.mubr.f32.gmra.mrb[2].mxu1 %v7080_v49 }
 0x195   : > { %4612 = vmatprep.mubr.msk.f32.mxu1 %vm1319_vm5, %v6770_v50  ;;  %5604 = vmatpush1.bf16.msra.mxu1 %v5603_v43  ;;  %v5609_v43 = vpack.c.bf16 %v1359_v42, %v1358_v4  ;;  %v1362_v4 = vld [vmem:[%s9370_s4 + $0x50] sm:$0xff] }
 0x196   : > { %5605 = vmatprep.subr.bf16.mxu1 %v9444_v12  ;;  %v1230_v50 = vpop.permute.xlu1 %1229  ;;  %v1232_v1 = vpop.permute.xlu0 %1231 }
 0x197   : > { %v7115_v23 = vsel %vm1319_vm5, %v6781_v62, %v1230_v50  ;;  %v1363_v50 = vld [vmem:[%s9370_s4 + $0x58] sm:$0xff]  ;;  %v7131_v62 = vsel %vm1319_vm5, %v1063_v63, %v1232_v1  ;;  %v1065_v63 = vsel %vm927_vm6, 0.0, %v6814_v31  ;;  %v7172_v31 = vsel %vm1092_vm7, 0.0, %v6821_v36 }
 0x198   : > { %1572 = vmatmul.mubr.f32.gmra.mrb[4].mxu1 %v7096_v51 }
 0x199   : > { %4613 = vmatprep.mubr.msk.f32.mxu1 %vm1319_vm5, %v7102_v57  ;;  %5607 = vmatpush1.bf16.msra.mxu1 %v5606_v30  ;;  %v5612_v30 = vpack.c.bf16 %v1361_v54, %v1360_v53  ;;  %v1364_v53 = vld [vmem:[%s9370_s4 + $0x60] sm:$0xff]  ;;  %v1365_v54 = vld [vmem:[%s9370_s4 + $0x68] sm:$0xff] }
 0x19a   : > { %5608 = vmatprep.subr.bf16.mxu1 %v9444_v12  ;;  %v1234_v42 = vpop.permute.xlu1 %1233  ;;  %v1236_v19 = vpop.permute.xlu0 %1235 }
 0x19b   : > { %v7150_v1 = vsel %vm1319_vm5, %v6799_v16, %v1234_v42  ;;  %v1367_v16 = vld [vmem:[%s9370_s4 + $0x78] sm:$0xff] }
 0x19c   : > { %1577 = vmatmul.mubr.f32.gmra.mrb[6].mxu1 %v7115_v23 }
 0x19d   : > { %4614 = vmatprep.mubr.msk.f32.mxu1 %vm1319_vm5, %v6788_v2  ;;  %5610 = vmatpush1.bf16.msra.mxu1 %v5609_v43  ;;  %v5615_v43 = vpack.c.bf16 %v1363_v50, %v1362_v4  ;;  %v1366_v4 = vld [vmem:[%s9370_s4 + $0x70] sm:$0xff]  ;;  %v7166_v50 = vsel %vm1319_vm5, %v1065_v63, %v1236_v19  ;;  %v1067_v63 = vsel %vm927_vm6, 0.0, %v6832_v52  ;;  %v7207_v52 = vsel %vm1092_vm7, 0.0, %v6836_v56 }
 0x19e   : > { %5611 = vmatprep.subr.bf16.mxu1 %v9444_v12  ;;  %v1238_v42 = vpop.permute.xlu1 %1237  ;;  %v1240_v36 = vpop.permute.xlu0 %1239 }
 0x19f   : > { %v7185_v19 = vsel %vm1319_vm5, %v6817_v32, %v1238_v42  ;;  %v1371_v32 = vld [vmem:[%s9370_s4 + $0x98] sm:$0xff] }
 0x1a0   : > { %1582 = vmatmul.mubr.f32.gmra.mrb[8].mxu1 %v7131_v62 }
 0x1a1   : > { %4615 = vmatprep.mubr.msk.f32.mxu1 %vm1319_vm5, %v7137_v11  ;;  %5613 = vmatpush1.bf16.msra.mxu1 %v5612_v30  ;;  %v5618_v30 = vpack.c.bf16 %v1365_v54, %v1364_v53  ;;  %v1368_v53 = vld [vmem:[%s9370_s4 + $0x80] sm:$0xff]  ;;  %v1369_v54 = vld [vmem:[%s9370_s4 + $0x88] sm:$0xff] }
 0x1a2   : > { %5614 = vmatprep.subr.bf16.mxu1 %v9444_v12  ;;  %v1242_v42 = vpop.permute.xlu1 %1241  ;;  %v1244_v56 = vpop.permute.xlu0 %1243 }
 0x1a4   : > { %1587 = vmatmul.mubr.f32.gmra.mrb[10].mxu1 %v7150_v1 }
 0x1a5   : > { %4616 = vmatprep.mubr.msk.f32.mxu1 %vm1319_vm5, %v6806_v21  ;;  %5616 = vmatpush1.bf16.msra.mxu1 %v5615_v43  ;;  %v5621_v43 = vpack.c.bf16 %v1367_v16, %v1366_v4  ;;  %v1370_v4 = vld [vmem:[%s9370_s4 + $0x90] sm:$0xff]  ;;  %v7201_v16 = vsel %vm1319_vm5, %v1067_v63, %v1240_v36  ;;  %v7220_v36 = vsel %vm1319_vm5, %v6843_v3, %v1242_v42  ;;  %v1069_v63 = vsel %vm927_vm6, 0.0, %v6850_v9  ;;  %v1375_v3 = vld [vmem:[%s9370_s4 + $0xb8] sm:$0xff] }
 0x1a6   : > { %5617 = vmatprep.subr.bf16.mxu1 %v9444_v12  ;;  %v1246_v42 = vpop.permute.xlu1 %1245  ;;  %v7242_v9 = vsel %vm1092_vm7, 0.0, %v6854_v15  ;;  %v1071_v15 = vsel %vm927_vm6, 0.0, %v6868_v35 }
 0x1a8   : > { %1592 = vmatmul.mubr.f32.gmra.mrb[12].mxu1 %v7166_v50 }
 0x1a9   : > { %4617 = vmatprep.mubr.msk.f32.mxu1 %vm1319_vm5, %v7172_v31  ;;  %5619 = vmatpush1.bf16.msra.mxu1 %v5618_v30  ;;  %v5624_v30 = vpack.c.bf16 %v1369_v54, %v1368_v53  ;;  %v1372_v53 = vld [vmem:[%s9370_s4 + $0xa0] sm:$0xff]  ;;  %v1373_v54 = vld [vmem:[%s9370_s4 + $0xa8] sm:$0xff] }
 0x1aa   : > { %5620 = vmatprep.subr.bf16.mxu1 %v9444_v12 }
 0x1ac   : > { %1597 = vmatmul.mubr.f32.gmra.mrb[14].mxu1 %v7185_v19 }
 0x1ad   : > { %4618 = vmatprep.mubr.msk.f32.mxu1 %vm1319_vm5, %v6828_v45  ;;  %5622 = vmatpush1.bf16.msra.mxu1 %v5621_v43  ;;  %v5627_v43 = vpack.c.bf16 %v1371_v32, %v1370_v4  ;;  %v1374_v4 = vld [vmem:[%s9370_s4 + $0xb0] sm:$0xff]  ;;  %v7236_v32 = vsel %vm1319_vm5, %v1069_v63, %v1244_v56 }
 0x1ae   : > { %5623 = vmatprep.subr.bf16.mxu1 %v9444_v12 }
 0x1b0   : > { %1602 = vmatmul.mubr.f32.gmra.mrb[16].mxu1 %v7201_v16 }
 0x1b1   : > { %4619 = vmatprep.mubr.msk.f32.mxu1 %vm1319_vm5, %v7207_v52  ;;  %5625 = vmatpush1.bf16.msra.mxu1 %v5624_v30  ;;  %v5630_v30 = vpack.c.bf16 %v1373_v54, %v1372_v53  ;;  %v7249_v53 = vsel %vm1319_vm5, %v6861_v27, %v1246_v42  ;;  %v1248_v54 = vpop.permute.xlu0 %1247  ;;  %v7265_v27 = vsel %vm1092_vm7, 0.0, %v6872_v41 }
 0x1b2   : > { %5626 = vmatprep.subr.bf16.mxu1 %v9444_v12  ;;  %v7259_v56 = vsel %vm1319_vm5, %v1071_v15, %v1248_v54 }
 0x1b4   : > { %1607 = vmatmul.mubr.f32.gmra.mrb[18].mxu1 %v7220_v36 }
 0x1b5   : > { %4620 = vmatprep.mubr.msk.f32.mxu1 %vm1319_vm5, %v6847_v7  ;;  %5628 = vmatpush1.bf16.msra.mxu1 %v5627_v43  ;;  %v5633_v43 = vpack.c.bf16 %v1375_v3, %v1374_v4  ;;  %v1252_v35 = vpop.permute.xlu0 %1251  ;;  %v1073_v4 = vsel %vm927_vm6, 0.0, %v6887_v0  ;;  %v1075_v0 = vsel %vm927_vm6, 0.0, %v6905_v39  ;;  %v1077_v39 = vsel %vm927_vm6, 0.0, %v6923_v18  ;;  %v9449_v18 = vld [vmem:[#allocation15_spill] sm:$0xff] }
 0x1b6   : > { %5629 = vmatprep.subr.bf16.mxu1 %v9444_v12  ;;  %v7280_v41 = vsel %vm1319_vm5, %v1073_v4, %v1252_v35  ;;  %v9445_v4 = vld [vmem:[#allocation13_spill] sm:$0xff] }
 0x1b8   : > { %1612 = vmatmul.mubr.f32.gmra.mrb[20].mxu1 %v7236_v32 }
 0x1b9   : > { %4621 = vmatprep.mubr.msk.f32.mxu1 %vm1319_vm5, %v7242_v9  ;;  %5631 = vmatpush1.bf16.msra.mxu1 %v5630_v30  ;;  %v1250_v30 = vpop.permute.xlu1 %1249 }
 0x1ba   : > { %5632 = vmatprep.subr.bf16.mxu1 %v9444_v12  ;;  %v7271_v63 = vsel %vm1319_vm5, %v6880_v59, %v1250_v30  ;;  %v7286_v59 = vsel %vm1092_vm7, 0.0, %v6890_v5 }
 0x1bc   : > { %1617 = vmatmul.mubr.f32.gmra.mrb[22].mxu1 %v7249_v53 }
 0x1bd   : > { %4622 = vmatprep.mubr.msk.f32.mxu1 %vm1319_vm5, %v6865_v33  ;;  %5634 = vmatpush1.bf16.msra.mxu1 %v5633_v43  ;;  %v1254_v3 = vpop.permute.xlu1 %1253  ;;  %v1256_v43 = vpop.permute.xlu0 %1255 }
 0x1be   : > { %5635 = vmatprep.subr.bf16.mxu1 %v9444_v12  ;;  %v7292_v42 = vsel %vm1319_vm5, %v6898_v26, %v1254_v3  ;;  %v7301_v5 = vsel %vm1319_vm5, %v1075_v0, %v1256_v43  ;;  %v7307_v26 = vsel %vm1092_vm7, 0.0, %v6908_v37  ;;  %v9447_v3 = vld [vmem:[#allocation14_spill] sm:$0xff] }
 0x1c0   : > { %1622 = vmatmul.mubr.f32.gmra.mrb[24].mxu1 %v7259_v56 }
 0x1c1   : > { %4623 = vmatprep.mubr.msk.f32.mxu1 %vm1319_vm5, %v7265_v27  ;;  %v1258_v54 = vpop.permute.xlu1 %1257  ;;  %v1260_v30 = vpop.permute.xlu0 %1259 }
 0x1c2   : > { %v7313_v15 = vsel %vm1319_vm5, %v6916_v61, %v1258_v54  ;;  %v7322_v37 = vsel %vm1319_vm5, %v1077_v39, %v1260_v30  ;;  %v7328_v61 = vsel %vm1092_vm7, 0.0, %v9445_v4  ;;  %v9450_v54 = vld [vmem:[#allocation16_spill] sm:$0xff] }
 0x1c3   : > { %9446 = vst [vmem:[#allocation13_spill] sm:$0xff] %v7328_v61  ;;  %v1079_v30 = vsel %vm927_vm6, 0.0, %v9450_v54  ;;  %v9456_v54 = vld [vmem:[#allocation20_spill] sm:$0xff] }
 0x1c4   : > { %1627 = vmatmul.mubr.f32.gmra.mrb[26].mxu1 %v7271_v63 }
 0x1c5   : > { %4624 = vmatprep.mubr.msk.f32.mxu1 %vm1319_vm5, %v6883_v60  ;;  %v1262_v35 = vpop.permute.xlu1 %1261  ;;  %v1264_v0 = vpop.permute.xlu0 %1263 }
 0x1c6   : > { %v7334_v43 = vsel %vm1319_vm5, %v9447_v3, %v1262_v35  ;;  %v7343_v39 = vsel %vm1319_vm5, %v1079_v30, %v1264_v0  ;;  %v9454_v3 = vld [vmem:[#allocation18_spill] sm:$0xff]  ;;  %v9455_v0 = vld [vmem:[#allocation19_spill] sm:$0xff]  ;;  %v1081_v30 = vsel %vm927_vm6, 0.0, %v9456_v54 }
 0x1c7   : > { %9448 = vst [vmem:[#allocation14_spill] sm:$0xff] %v7334_v43  ;;  %9451 = vst [vmem:[#allocation16_spill] sm:$0xff] %v7343_v39 }
 0x1c8   : > { %1632 = vmatmul.mubr.f32.gmra.mrb[28].mxu1 %v7280_v41 }
 0x1c9   : > { %4625 = vmatprep.mubr.msk.f32.mxu1 %vm1319_vm5, %v7286_v59  ;;  %v1266_v4 = vpop.permute.xlu1 %1265 }
 0x1cc   : > { %1637 = vmatmul.mubr.f32.gmra.mrb[30].mxu1 %v7292_v42 }
 0x1cd   : > { %4626 = vmatprep.mubr.msk.f32.mxu1 %vm1319_vm5, %v6901_v22 }
 0x1d0   : > { %1642 = vmatmul.mubr.f32.gmra.mrb[32].mxu1 %v7301_v5 }
 0x1d1   : > { %4627 = vmatprep.mubr.msk.f32.mxu1 %vm1319_vm5, %v7307_v26 }
 0x1d4   : > { %1647 = vmatmul.mubr.f32.gmra.mrb[34].mxu1 %v7313_v15 }
 0x1d5   : > { %4628 = vmatprep.mubr.msk.f32.mxu1 %vm1319_vm5, %v6919_v46 }
 0x1d8   : > { %1652 = vmatmul.mubr.f32.gmra.mrb[36].mxu1 %v7322_v37 }
 0x1d9   : > { %4629 = vmatprep.mubr.msk.f32.mxu1 %vm1319_vm5, %v7328_v61  ;;  %v9452_v61 = vld [vmem:[#allocation17_spill] sm:$0xff] }
 0x1da   : > { %v7349_v35 = vsel %vm1092_vm7, 0.0, %v9452_v61 }
 0x1db   : > { %9453 = vst [vmem:[#allocation17_spill] sm:$0xff] %v7349_v35 }
 0x1dc   : > { %1657 = vmatmul.mubr.f32.gmra.mrb[38].mxu1 %v7334_v43  ;;  %v1268_v43 = vpop.permute.xlu0 %1267 }
 0x1dd   : > { %4630 = vmatprep.mubr.msk.f32.mxu1 %vm1319_vm5, %v9449_v18  ;;  %v7355_v18 = vsel %vm1319_vm5, %v9454_v3, %v1266_v4  ;;  %v7364_v61 = vsel %vm1319_vm5, %v1081_v30, %v1268_v43  ;;  %v1083_v43 = vsel %vm927_vm6, 0.0, %v6978_v40  ;;  %v1085_v40 = vsel %vm927_vm6, 0.0, %v6995_v58 }
 0x1de   : > { %v1087_v58 = vsel %vm927_vm6, 0.0, %v7011_v48 }
 0x1e0   : > { %1662 = vmatmul.mubr.f32.gmra.mrb[40].mxu1 %v7343_v39  ;;  %v1270_v39 = vpop.permute.xlu1 %1269 }
 0x1e1   : > { %4631 = vmatprep.mubr.msk.f32.mxu1 %vm1319_vm5, %v7349_v35  ;;  %v9457_v35 = vld [vmem:[#allocation21_spill] sm:$0xff]  ;;  %v7376_v3 = vsel %vm1319_vm5, %v6971_v24, %v1270_v39  ;;  %v7391_v24 = vsel %vm1092_vm7, 0.0, %v6986_v28 }
 0x1e2   : > { %v7370_v4 = vsel %vm1092_vm7, 0.0, %v9457_v35 }
 0x1e4   : > { %1667 = vmatmul.mubr.f32.gmra.mrb[42].mxu1 %v7355_v18  ;;  %v1274_v54 = vpop.permute.xlu1 %1273 }
 0x1e5   : > { %4632 = vmatprep.mubr.msk.f32.mxu1 %vm1319_vm5, %v9455_v0  ;;  %v1272_v0 = vpop.permute.xlu0 %1271  ;;  %v7397_v39 = vsel %vm1319_vm5, %v6989_v6, %v1274_v54  ;;  %v7412_v6 = vsel %vm1092_vm7, 0.0, %v6998_v10 }
 0x1e6   : > { %v7385_v35 = vsel %vm1319_vm5, %v1083_v43, %v1272_v0 }
 0x1e8   : > { %1672 = vmatmul.mubr.f32.gmra.mrb[44].mxu1 %v7364_v61  ;;  %v1278_v0 = vpop.permute.xlu1 %1277 }
 0x1e9   : > { %4633 = vmatprep.mubr.msk.f32.mxu1 %vm1319_vm5, %v7370_v4  ;;  %v1276_v30 = vpop.permute.xlu0 %1275  ;;  %v7418_v43 = vsel %vm1319_vm5, %v7005_v44, %v1278_v0  ;;  %v7433_v44 = vsel %vm1092_vm7, 0.0, %v7017_v29  ;;  %v9462_v29 = vrot.slane %v6983_v8, 1  ;;  %v4672_v8 = vld [vmem:[%s9370_s4 + $0x180] sm:$0xff] }
 0x1ea   : > { %v7406_v28 = vsel %vm1319_vm5, %v1085_v40, %v1276_v30  ;;  %9459 = vst [vmem:[#allocation20_spill] sm:$0xff] %v7433_v44  ;;  %v9460_v40 = vmov 0.0  }
 0x1eb   : > { %v7438_v0 = vrot.slane %v9460_v40, 1 }
 0x1ec   : > { %1677 = vmatmul.mubr.f32.gmra.mrb[46].mxu1 %v7376_v3  ;;  %v1282_v30 = vpop.permute.xlu1 %1281 }
 0x1ed   : > { %4634 = vmatprep.mubr.msk.f32.mxu1 %vm1319_vm5, %v6974_v25  ;;  %v1280_v54 = vpop.permute.xlu0 %1279  ;;  %9461 = vst [vmem:[#allocation21_spill] sm:$0xff] %v7438_v0  ;;  %v7442_v48 = vsel %vm1319_vm5, %v7014_v13, %v1282_v30 }
 0x1ee   : > { %v7427_v10 = vsel %vm1319_vm5, %v1087_v58, %v1280_v54  ;;  %v1158_v58 = vsel %vm1093_vm4, %v9462_v29, %v7438_v0  ;;  %v4675_v0 = vld [vmem:[%s9370_s4 + $0x198] sm:$0xff] }
 0x1ef   : > { %9458 = vst [vmem:[#allocation18_spill] sm:$0xff] %v7427_v10  ;;  %v7460_v30 = vsel %vm1092_vm7, 0.0, %v1158_v58  ;;  %v4674_v58 = vld [vmem:[%s9370_s4 + $0x190] sm:$0xff] }
 0x1f0   : > { %1682 = vmatmul.mubr.f32.gmra.mrb[48].mxu1 %v7385_v35  ;;  %v1286_v13 = vpop.permute.xlu1 %1285 }
 0x1f1   : > { %4635 = vmatprep.mubr.msk.f32.mxu1 %vm1319_vm5, %v7391_v24  ;;  %v1284_v54 = vpop.permute.xlu0 %1283 }
 0x1f4   : > { %1687 = vmatmul.mubr.f32.gmra.mrb[50].mxu1 %v7397_v39 }
 0x1f5   : > { %4636 = vmatprep.mubr.msk.f32.mxu1 %vm1319_vm5, %v6992_v34 }
 0x1f8   : > { %1692 = vmatmul.mubr.f32.gmra.mrb[52].mxu1 %v7406_v28 }
 0x1f9   : > { %4637 = vmatprep.mubr.msk.f32.mxu1 %vm1319_vm5, %v7412_v6 }
 0x1fc   : > { %1697 = vmatmul.mubr.f32.gmra.mrb[54].mxu1 %v7418_v43 }
 0x1fd   : > { %4638 = vmatprep.mubr.msk.f32.mxu1 %vm1319_vm5, %v7008_v47 }
 0x200   : > { %1702 = vmatmul.mubr.f32.gmra.mrb[56].mxu1 %v7427_v10  ;;  %v9463_v10 = vld [vmem:[#allocation23_spill] sm:$0xff] }
 0x201   : > { %4639 = vmatprep.mubr.msk.f32.mxu1 %vm1319_vm5, %v7433_v44  ;;  %v1089_v44 = vsel %vm927_vm6, 0.0, %v9463_v10  ;;  %v4673_v10 = vld [vmem:[%s9370_s4 + $0x188] sm:$0xff] }
 0x202   : > { %v7455_v47 = vsel %vm1319_vm5, %v1089_v44, %v1284_v54  ;;  %v9464_v44 = vld [vmem:[#allocation24_spill] sm:$0xff]  ;;  %v5636_v29 = vpack.c.bf16 %v4673_v10, %v4672_v8  ;;  %v4676_v8 = vld [vmem:[%s9370_s4 + $0x1a0] sm:$0xff] }
 0x203   : > { %v7472_v54 = vsel %vm1319_vm5, %v9464_v44, %v1286_v13  ;;  %v5639_v13 = vpack.c.bf16 %v4675_v0, %v4674_v58  ;;  %v4677_v10 = vld [vmem:[%s9370_s4 + $0x1a8] sm:$0xff]  ;;  %v9465_v44 = vld [vmem:[#allocation11_spill] sm:$0xff]  ;;  %v4678_v0 = vld [vmem:[%s9370_s4 + $0x1b0] sm:$0xff] }
 0x204   : > { %1707 = vmatmul.mubr.f32.gmra.mrb[58].mxu1 %v7442_v48  ;;  %v4679_v58 = vld [vmem:[%s9370_s4 + $0x1b8] sm:$0xff] }
 0x205   : > { %4640 = vmatprep.mubr.msk.f32.mxu1 %vm1319_vm5, %v7022_v38  ;;  %v5645_v17 = vpack.c.bf16 %v4679_v58, %v4678_v0  ;;  %v4686_v58 = vld [vmem:[%s9370_s4 + $0x1f0] sm:$0xff] }
 0x208   : > { %1712 = vmatmul.mubr.f32.gmra.mrb[60].mxu1 %v7455_v47 }
 0x209   : > { %4641 = vmatprep.mubr.msk.f32.mxu1 %vm1319_vm5, %v7460_v30 }
 0x20c   : > { %1717 = vmatmul.mubr.f32.gmra.mrb[62].mxu1 %v7472_v54 }
 0x20d   : > { %1788 = vmatprep.mubr.f32.mxu1 %v9460_v40 }
 0x210   : > { %1789 = vmatmul.mubr.f32.vlgmr.msra.gmra.mrb[0].mxu1 %v9460_v40 }
 0x211   : > { %5637 = vmatpush1.bf16.msra.mxu1 %v5636_v29  ;;  %1793 = vmatprep.mubr.f32.mxu1 %v9460_v40  ;;  %v5642_v29 = vpack.c.bf16 %v4677_v10, %v4676_v8  ;;  %v4681_v8 = vld [vmem:[%s9370_s4 + $0x1c8] sm:$0xff] }
 0x212   : > { %5638 = vmatprep.subr.bf16.mxu1 %v9444_v12  ;;  %v9466_v10 = vld [vmem:[#allocation12_spill] sm:$0xff] }
 0x214   : > { %1794 = vmatmul.mubr.f32.gmra.mrb[2].mxu1 %v9460_v40 }
 0x215   : > { %4642 = vmatprep.mubr.msk.f32.mxu1 %vm1319_vm5, %v9465_v44  ;;  %5640 = vmatpush1.bf16.msra.mxu1 %v5639_v13  ;;  %v4680_v13 = vld [vmem:[%s9370_s4 + $0x1c0] sm:$0xff]  ;;  %v4683_v44 = vld [vmem:[%s9370_s4 + $0x1d8] sm:$0xff] }
 0x216   : > { %5641 = vmatprep.subr.bf16.mxu1 %v9444_v12 }
 0x218   : > { %1799 = vmatmul.mubr.f32.gmra.mrb[4].mxu1 %v7061_v20  ;;  %v5648_v20 = vpack.c.bf16 %v4681_v8, %v4680_v13  ;;  %v4687_v13 = vld [vmem:[%s9370_s4 + $0x1f8] sm:$0xff] }
 0x219   : > { %4643 = vmatprep.mubr.msk.f32.mxu1 %vm1319_vm5, %v7067_v14  ;;  %5643 = vmatpush1.bf16.msra.mxu1 %v5642_v29  ;;  %v4682_v14 = vld [vmem:[%s9370_s4 + $0x1d0] sm:$0xff]  ;;  %v4685_v29 = vld [vmem:[%s9370_s4 + $0x1e8] sm:$0xff]  ;;  %v5657_v8 = vpack.c.bf16 %v4687_v13, %v4686_v58 }
 0x21a   : > { %5644 = vmatprep.subr.bf16.mxu1 %v9444_v12  ;;  %v4693_v58 = vld [vmem:[%s9370_s4 + $0x228] sm:$0xff] }
 0x21c   : > { %1804 = vmatmul.mubr.f32.gmra.mrb[6].mxu1 %v7080_v49  ;;  %v5651_v49 = vpack.c.bf16 %v4683_v44, %v4682_v14  ;;  %v4689_v14 = vld [vmem:[%s9370_s4 + $0x208] sm:$0xff] }
 0x21d   : > { %4644 = vmatprep.mubr.msk.f32.mxu1 %vm1319_vm5, %v9466_v10  ;;  %5646 = vmatpush1.bf16.msra.mxu1 %v5645_v17  ;;  %v4684_v17 = vld [vmem:[%s9370_s4 + $0x1e0] sm:$0xff] }
 0x21e   : > { %5647 = vmatprep.subr.bf16.mxu1 %v9444_v12  ;;  %v5654_v0 = vpack.c.bf16 %v4685_v29, %v4684_v17  ;;  %v4691_v17 = vld [vmem:[%s9370_s4 + $0x218] sm:$0xff] }
 0x220   : > { %1809 = vmatmul.mubr.f32.gmra.mrb[8].mxu1 %v7096_v51 }
 0x221   : > { %4645 = vmatprep.mubr.msk.f32.mxu1 %vm1319_vm5, %v7102_v57  ;;  %5649 = vmatpush1.bf16.msra.mxu1 %v5648_v20  ;;  %v4688_v20 = vld [vmem:[%s9370_s4 + $0x200] sm:$0xff] }
 0x222   : > { %5650 = vmatprep.subr.bf16.mxu1 %v9444_v12  ;;  %v5660_v44 = vpack.c.bf16 %v4689_v14, %v4688_v20  ;;  %v4695_v20 = vld [vmem:[%s9370_s4 + $0x238] sm:$0xff] }
 0x224   : > { %1814 = vmatmul.mubr.f32.gmra.mrb[10].mxu1 %v7115_v23 }
 0x225   : > { %4646 = vmatprep.mubr.msk.f32.mxu1 %vm1319_vm5, %v6788_v2  ;;  %5652 = vmatpush1.bf16.msra.mxu1 %v5651_v49  ;;  %v4690_v49 = vld [vmem:[%s9370_s4 + $0x210] sm:$0xff] }
 0x226   : > { %5653 = vmatprep.subr.bf16.mxu1 %v9444_v12  ;;  %v5663_v29 = vpack.c.bf16 %v4691_v17, %v4690_v49  ;;  %v9468_v49 = vld [vmem:[#allocation14_spill] sm:$0xff]  ;;  %v9469_v17 = vld [vmem:[#allocation15_spill] sm:$0xff] }
 0x228   : > { %1819 = vmatmul.mubr.f32.gmra.mrb[12].mxu1 %v7131_v62 }
 0x229   : > { %4647 = vmatprep.mubr.msk.f32.mxu1 %vm1319_vm5, %v7137_v11  ;;  %5655 = vmatpush1.bf16.msra.mxu1 %v5654_v0  ;;  %v4692_v0 = vld [vmem:[%s9370_s4 + $0x220] sm:$0xff] }
 0x22a   : > { %5656 = vmatprep.subr.bf16.mxu1 %v9444_v12  ;;  %v5666_v13 = vpack.c.bf16 %v4693_v58, %v4692_v0  ;;  %v9471_v0 = vld [vmem:[#allocation17_spill] sm:$0xff]  ;;  %v9472_v58 = vld [vmem:[#allocation19_spill] sm:$0xff] }
 0x22c   : > { %1824 = vmatmul.mubr.f32.gmra.mrb[14].mxu1 %v7150_v1 }
 0x22d   : > { %4648 = vmatprep.mubr.msk.f32.mxu1 %vm1319_vm5, %v6806_v21  ;;  %5658 = vmatpush1.bf16.msra.mxu1 %v5657_v8  ;;  %v4694_v8 = vld [vmem:[%s9370_s4 + $0x230] sm:$0xff] }
 0x22e   : > { %5659 = vmatprep.subr.bf16.mxu1 %v9444_v12  ;;  %v5669_v14 = vpack.c.bf16 %v4695_v20, %v4694_v8  ;;  %v9474_v8 = vld [vmem:[#allocation18_spill] sm:$0xff]  ;;  %v9475_v20 = vld [vmem:[#allocation20_spill] sm:$0xff] }
 0x230   : > { %1829 = vmatmul.mubr.f32.gmra.mrb[16].mxu1 %v7166_v50 }
 0x231   : > { %4649 = vmatprep.mubr.msk.f32.mxu1 %vm1319_vm5, %v7172_v31  ;;  %5661 = vmatpush1.bf16.msra.mxu1 %v5660_v44  ;;  %v9467_v44 = vld [vmem:[#allocation13_spill] sm:$0xff] }
 0x232   : > { %5662 = vmatprep.subr.bf16.mxu1 %v9444_v12 }
 0x234   : > { %1834 = vmatmul.mubr.f32.gmra.mrb[18].mxu1 %v7185_v19 }
 0x235   : > { %4650 = vmatprep.mubr.msk.f32.mxu1 %vm1319_vm5, %v6828_v45  ;;  %5664 = vmatpush1.bf16.msra.mxu1 %v5663_v29  ;;  %v9470_v29 = vld [vmem:[#allocation16_spill] sm:$0xff] }
 0x236   : > { %5665 = vmatprep.subr.bf16.mxu1 %v9444_v12 }
 0x238   : > { %1839 = vmatmul.mubr.f32.gmra.mrb[20].mxu1 %v7201_v16 }
 0x239   : > { %4651 = vmatprep.mubr.msk.f32.mxu1 %vm1319_vm5, %v7207_v52  ;;  %5667 = vmatpush1.bf16.msra.mxu1 %v5666_v13  ;;  %v9473_v13 = vld [vmem:[#allocation22_spill] sm:$0xff] }
 0x23a   : > { %5668 = vmatprep.subr.bf16.mxu1 %v9444_v12 }
 0x23c   : > { %1844 = vmatmul.mubr.f32.gmra.mrb[22].mxu1 %v7220_v36 }
 0x23d   : > { %4652 = vmatprep.mubr.msk.f32.mxu1 %vm1319_vm5, %v6847_v7  ;;  %5670 = vmatpush1.bf16.msra.mxu1 %v5669_v14 }
 0x240   : > { %1849 = vmatmul.mubr.f32.gmra.mrb[24].mxu1 %v7236_v32 }
 0x241   : > { %4653 = vmatprep.mubr.msk.f32.mxu1 %vm1319_vm5, %v7242_v9 }
 0x244   : > { %1854 = vmatmul.mubr.f32.gmra.mrb[26].mxu1 %v7249_v53 }
 0x245   : > { %4654 = vmatprep.mubr.msk.f32.mxu1 %vm1319_vm5, %v6865_v33 }
 0x248   : > { %1859 = vmatmul.mubr.f32.gmra.mrb[28].mxu1 %v7259_v56 }
 0x249   : > { %4655 = vmatprep.mubr.msk.f32.mxu1 %vm1319_vm5, %v7265_v27 }
 0x24c   : > { %1864 = vmatmul.mubr.f32.gmra.mrb[30].mxu1 %v7271_v63 }
 0x24d   : > { %4656 = vmatprep.mubr.msk.f32.mxu1 %vm1319_vm5, %v6883_v60 }
 0x250   : > { %1869 = vmatmul.mubr.f32.gmra.mrb[32].mxu1 %v7280_v41 }
 0x251   : > { %4657 = vmatprep.mubr.msk.f32.mxu1 %vm1319_vm5, %v7286_v59 }
 0x254   : > { %1874 = vmatmul.mubr.f32.gmra.mrb[34].mxu1 %v7292_v42 }
 0x255   : > { %4658 = vmatprep.mubr.msk.f32.mxu1 %vm1319_vm5, %v6901_v22 }
 0x258   : > { %1879 = vmatmul.mubr.f32.gmra.mrb[36].mxu1 %v7301_v5 }
 0x259   : > { %4659 = vmatprep.mubr.msk.f32.mxu1 %vm1319_vm5, %v7307_v26 }
 0x25c   : > { %1884 = vmatmul.mubr.f32.gmra.mrb[38].mxu1 %v7313_v15 }
 0x25d   : > { %4660 = vmatprep.mubr.msk.f32.mxu1 %vm1319_vm5, %v6919_v46 }
 0x260   : > { %1889 = vmatmul.mubr.f32.gmra.mrb[40].mxu1 %v7322_v37 }
 0x261   : > { %4661 = vmatprep.mubr.msk.f32.mxu1 %vm1319_vm5, %v9467_v44 }
 0x264   : > { %1894 = vmatmul.mubr.f32.gmra.mrb[42].mxu1 %v9468_v49 }
 0x265   : > { %4662 = vmatprep.mubr.msk.f32.mxu1 %vm1319_vm5, %v9469_v17 }
 0x268   : > { %1899 = vmatmul.mubr.f32.gmra.mrb[44].mxu1 %v9470_v29 }
 0x269   : > { %4663 = vmatprep.mubr.msk.f32.mxu1 %vm1319_vm5, %v9471_v0 }
 0x26c   : > { %1904 = vmatmul.mubr.f32.gmra.mrb[46].mxu1 %v7355_v18 }
 0x26d   : > { %4664 = vmatprep.mubr.msk.f32.mxu1 %vm1319_vm5, %v9472_v58 }
 0x270   : > { %1909 = vmatmul.mubr.f32.gmra.mrb[48].mxu1 %v7364_v61 }
 0x271   : > { %4665 = vmatprep.mubr.msk.f32.mxu1 %vm1319_vm5, %v7370_v4 }
 0x274   : > { %1914 = vmatmul.mubr.f32.gmra.mrb[50].mxu1 %v7376_v3 }
 0x275   : > { %4666 = vmatprep.mubr.msk.f32.mxu1 %vm1319_vm5, %v6974_v25 }
 0x278   : > { %1919 = vmatmul.mubr.f32.gmra.mrb[52].mxu1 %v7385_v35 }
 0x279   : > { %4667 = vmatprep.mubr.msk.f32.mxu1 %vm1319_vm5, %v7391_v24 }
 0x27c   : > { %1924 = vmatmul.mubr.f32.gmra.mrb[54].mxu1 %v7397_v39 }
 0x27d   : > { %4668 = vmatprep.mubr.msk.f32.mxu1 %vm1319_vm5, %v6992_v34 }
 0x280   : > { %1929 = vmatmul.mubr.f32.gmra.mrb[56].mxu1 %v7406_v28 }
 0x281   : > { %4669 = vmatprep.mubr.msk.f32.mxu1 %vm1319_vm5, %v7412_v6 }
 0x284   : > { %1934 = vmatmul.mubr.f32.gmra.mrb[58].mxu1 %v7418_v43 }
 0x285   : > { %4670 = vmatprep.mubr.msk.f32.mxu1 %vm1319_vm5, %v9473_v13 }
 0x288   : > { %1939 = vmatmul.mubr.f32.gmra.mrb[60].mxu1 %v9474_v8 }
 0x289   : > { %4671 = vmatprep.mubr.msk.f32.mxu1 %vm1319_vm5, %v9475_v20 }
 0x28c   : > { %1944 = vmatmul.mubr.f32.gmra.mrb[62].mxu1 %v7442_v48 }
 0x28d   : > { %4696 = vmatprep.mubr.msk.f32.mxu1 %vm1319_vm5, %v9466_v10 }
 0x290   : > { %2039 = vmatmul.mubr.f32.vlgmr.msra.gmra.mrb[0].mxu1 %v7096_v51  ;;  %v2598_v51 = vld [vmem:[#allocation2 + $0x100] sm:$0xff] }
 0x291   : > { %4697 = vmatprep.mubr.msk.f32.mxu1 %vm1319_vm5, %v7102_v57  ;;  %v2599_v57 = vld [vmem:[#allocation2 + $0x108] sm:$0xff] }
 0x294   : > { %2044 = vmatmul.mubr.f32.gmra.mrb[2].mxu1 %v7115_v23  ;;  %v5684_v23 = vpack.c.bf16 %v2599_v57, %v2598_v51 }
 0x295   : > { %4698 = vmatprep.mubr.msk.f32.mxu1 %vm1319_vm5, %v6788_v2  ;;  %v2590_v2 = vld [vmem:[#allocation2 + $0xc0] sm:$0xff] }
 0x298   : > { %2049 = vmatmul.mubr.f32.gmra.mrb[4].mxu1 %v7131_v62  ;;  %v2600_v62 = vld [vmem:[#allocation2 + $0x110] sm:$0xff] }
 0x299   : > { %4699 = vmatprep.mubr.msk.f32.mxu1 %vm1319_vm5, %v7137_v11  ;;  %v2601_v11 = vld [vmem:[#allocation2 + $0x118] sm:$0xff] }
 0x29c   : > { %2054 = vmatmul.mubr.f32.gmra.mrb[6].mxu1 %v7150_v1  ;;  %v5687_v1 = vpack.c.bf16 %v2601_v11, %v2600_v62 }
 0x29d   : > { %4700 = vmatprep.mubr.msk.f32.mxu1 %vm1319_vm5, %v6806_v21  ;;  %v2591_v21 = vld [vmem:[#allocation2 + $0xc8] sm:$0xff] }
 0x2a0   : > { %2059 = vmatmul.mubr.f32.gmra.mrb[8].mxu1 %v7166_v50  ;;  %v2602_v50 = vld [vmem:[#allocation2 + $0x120] sm:$0xff] }
 0x2a1   : > { %4701 = vmatprep.mubr.msk.f32.mxu1 %vm1319_vm5, %v7172_v31  ;;  %v2603_v31 = vld [vmem:[#allocation2 + $0x128] sm:$0xff] }
 0x2a4   : > { %2064 = vmatmul.mubr.f32.gmra.mrb[10].mxu1 %v7185_v19  ;;  %v5690_v19 = vpack.c.bf16 %v2603_v31, %v2602_v50 }
 0x2a5   : > { %4702 = vmatprep.mubr.msk.f32.mxu1 %vm1319_vm5, %v6828_v45  ;;  %v5672_v45 = vpack.c.bf16 %v2591_v21, %v2590_v2 }
 0x2a7   : > { %5673 = vmatpush1.bf16.msra.mxu0 %v5672_v45 }
 0x2a8   : > { %2069 = vmatmul.mubr.f32.gmra.mrb[12].mxu1 %v7201_v16  ;;  %5674 = vmatprep.subr.bf16.mxu0 %v9444_v12  ;;  %v2604_v16 = vld [vmem:[#allocation2 + $0x130] sm:$0xff] }
 0x2a9   : > { %4703 = vmatprep.mubr.msk.f32.mxu1 %vm1319_vm5, %v7207_v52  ;;  %v2605_v52 = vld [vmem:[#allocation2 + $0x138] sm:$0xff] }
 0x2ac   : > { %2074 = vmatmul.mubr.f32.gmra.mrb[14].mxu1 %v7220_v36  ;;  %v5693_v36 = vpack.c.bf16 %v2605_v52, %v2604_v16 }
 0x2ad   : > { %4704 = vmatprep.mubr.msk.f32.mxu1 %vm1319_vm5, %v6847_v7  ;;  %v2592_v7 = vld [vmem:[#allocation2 + $0xd0] sm:$0xff] }
 0x2b0   : > { %2079 = vmatmul.mubr.f32.gmra.mrb[16].mxu1 %v7236_v32  ;;  %v2606_v32 = vld [vmem:[#allocation2 + $0x140] sm:$0xff] }
 0x2b1   : > { %4705 = vmatprep.mubr.msk.f32.mxu1 %vm1319_vm5, %v7242_v9  ;;  %v2607_v9 = vld [vmem:[#allocation2 + $0x148] sm:$0xff] }
 0x2b4   : > { %2084 = vmatmul.mubr.f32.gmra.mrb[18].mxu1 %v7249_v53  ;;  %v5696_v53 = vpack.c.bf16 %v2607_v9, %v2606_v32 }
 0x2b5   : > { %4706 = vmatprep.mubr.msk.f32.mxu1 %vm1319_vm5, %v6865_v33  ;;  %v2593_v33 = vld [vmem:[#allocation2 + $0xd8] sm:$0xff] }
 0x2b8   : > { %2089 = vmatmul.mubr.f32.gmra.mrb[20].mxu1 %v7259_v56  ;;  %v2608_v56 = vld [vmem:[#allocation2 + $0x150] sm:$0xff] }
 0x2b9   : > { %4707 = vmatprep.mubr.msk.f32.mxu1 %vm1319_vm5, %v7265_v27  ;;  %v2609_v27 = vld [vmem:[#allocation2 + $0x158] sm:$0xff] }
 0x2bc   : > { %2094 = vmatmul.mubr.f32.gmra.mrb[22].mxu1 %v7271_v63  ;;  %v5699_v63 = vpack.c.bf16 %v2609_v27, %v2608_v56 }
 0x2bd   : > { %4708 = vmatprep.mubr.msk.f32.mxu1 %vm1319_vm5, %v6883_v60  ;;  %v5675_v60 = vpack.c.bf16 %v2593_v33, %v2592_v7 }
 0x2bf   : > { %5676 = vmatpush1.bf16.msra.mxu0 %v5675_v60 }
 0x2c0   : > { %2099 = vmatmul.mubr.f32.gmra.mrb[24].mxu1 %v7280_v41  ;;  %5677 = vmatprep.subr.bf16.mxu0 %v9444_v12  ;;  %v2610_v41 = vld [vmem:[#allocation2 + $0x160] sm:$0xff] }
 0x2c1   : > { %4709 = vmatprep.mubr.msk.f32.mxu1 %vm1319_vm5, %v7286_v59  ;;  %v2611_v59 = vld [vmem:[#allocation2 + $0x168] sm:$0xff] }
 0x2c4   : > { %2104 = vmatmul.mubr.f32.gmra.mrb[26].mxu1 %v7292_v42  ;;  %v5702_v42 = vpack.c.bf16 %v2611_v59, %v2610_v41 }
 0x2c5   : > { %4710 = vmatprep.mubr.msk.f32.mxu1 %vm1319_vm5, %v6901_v22  ;;  %v2594_v22 = vld [vmem:[#allocation2 + $0xe0] sm:$0xff] }
 0x2c8   : > { %2109 = vmatmul.mubr.f32.gmra.mrb[28].mxu1 %v7301_v5 }
 0x2c9   : > { %4711 = vmatprep.mubr.msk.f32.mxu1 %vm1319_vm5, %v7307_v26 }
 0x2cc   : > { %2114 = vmatmul.mubr.f32.gmra.mrb[30].mxu1 %v7313_v15  ;;  %v2612_v15 = vld [vmem:[#allocation2 + $0x170] sm:$0xff] }
 0x2cd   : > { %4712 = vmatprep.mubr.msk.f32.mxu1 %vm1319_vm5, %v6919_v46  ;;  %v2595_v46 = vld [vmem:[#allocation2 + $0xe8] sm:$0xff] }
 0x2d0   : > { %2119 = vmatmul.mubr.f32.gmra.mrb[32].mxu1 %v7322_v37  ;;  %v2613_v37 = vld [vmem:[#allocation2 + $0x178] sm:$0xff] }
 0x2d1   : > { %4713 = vmatprep.mubr.msk.f32.mxu1 %vm1319_vm5, %v9467_v44 }
 0x2d4   : > { %2124 = vmatmul.mubr.f32.gmra.mrb[34].mxu1 %v9468_v49 }
 0x2d5   : > { %4714 = vmatprep.mubr.msk.f32.mxu1 %vm1319_vm5, %v9469_v17 }
 0x2d8   : > { %2129 = vmatmul.mubr.f32.gmra.mrb[36].mxu1 %v9470_v29 }
 0x2d9   : > { %4715 = vmatprep.mubr.msk.f32.mxu1 %vm1319_vm5, %v9471_v0 }
 0x2dc   : > { %2134 = vmatmul.mubr.f32.gmra.mrb[38].mxu1 %v7355_v18  ;;  %v7754_v18 = vld [vmem:[%s9371_s5] ss:$0 sm:$0xff] }
 0x2dd   : > { %4716 = vmatprep.mubr.msk.f32.mxu1 %vm1319_vm5, %v9472_v58 }
 0x2e0   : > { %2139 = vmatmul.mubr.f32.gmra.mrb[40].mxu1 %v7364_v61  ;;  %v5705_v61 = vpack.c.bf16 %v2613_v37, %v2612_v15 }
 0x2e1   : > { %4717 = vmatprep.mubr.msk.f32.mxu1 %vm1319_vm5, %v7370_v4 }
 0x2e4   : > { %2144 = vmatmul.mubr.f32.gmra.mrb[42].mxu1 %v7376_v3 }
 0x2e5   : > { %4718 = vmatprep.mubr.msk.f32.mxu1 %vm1319_vm5, %v6974_v25  ;;  %v5678_v25 = vpack.c.bf16 %v2595_v46, %v2594_v22 }
 0x2e7   : > { %5679 = vmatpush1.bf16.msra.mxu0 %v5678_v25 }
 0x2e8   : > { %2149 = vmatmul.mubr.f32.gmra.mrb[44].mxu1 %v7385_v35  ;;  %5680 = vmatprep.subr.bf16.mxu0 %v9444_v12 }
 0x2e9   : > { %4719 = vmatprep.mubr.msk.f32.mxu1 %vm1319_vm5, %v7391_v24  ;;  %v7761_v24 = vld [vmem:[%s9372_s6] ss:$0 sm:$0xff] }
 0x2ec   : > { %2154 = vmatmul.mubr.f32.gmra.mrb[46].mxu1 %v7397_v39 }
 0x2ed   : > { %4720 = vmatprep.mubr.msk.f32.mxu1 %vm1319_vm5, %v6992_v34  ;;  %v2596_v34 = vld [vmem:[#allocation2 + $0xf0] sm:$0xff] }
 0x2f0   : > { %2159 = vmatmul.mubr.f32.gmra.mrb[48].mxu1 %v7406_v28 }
 0x2f1   : > { %4721 = vmatprep.mubr.msk.f32.mxu1 %vm1319_vm5, %v7412_v6 }
 0x2f4   : > { %2164 = vmatmul.mubr.f32.gmra.mrb[50].mxu1 %v7418_v43 }
 0x2f5   : > { %4722 = vmatprep.mubr.msk.f32.mxu1 %vm1319_vm5, %v9473_v13 }
 0x2f8   : > { %2169 = vmatmul.mubr.f32.gmra.mrb[52].mxu1 %v9474_v8 }
 0x2f9   : > { %4723 = vmatprep.mubr.msk.f32.mxu1 %vm1319_vm5, %v9475_v20 }
 0x2fc   : > { %2174 = vmatmul.mubr.f32.gmra.mrb[54].mxu1 %v7442_v48 }
 0x2fd   : > { %4724 = vmatprep.mubr.msk.f32.mxu1 %vm1319_vm5, %v7022_v38 }
 0x300   : > { %2179 = vmatmul.mubr.f32.gmra.mrb[56].mxu1 %v7455_v47  ;;  %v2597_v47 = vld [vmem:[#allocation2 + $0xf8] sm:$0xff] }
 0x301   : > { %4725 = vmatprep.mubr.msk.f32.mxu1 %vm1319_vm5, %v7460_v30  ;;  %v5681_v38 = vpack.c.bf16 %v2597_v47, %v2596_v34 }
 0x303   : > { %5682 = vmatpush1.bf16.msra.mxu0 %v5681_v38 }
 0x304   : > { %2184 = vmatmul.mubr.f32.gmra.mrb[58].mxu1 %v7472_v54  ;;  %5683 = vmatprep.subr.bf16.mxu0 %v9444_v12 }
 0x305   : > { %2188 = vmatprep.mubr.f32.mxu1 %v9460_v40 }
 0x307   : > { %5685 = vmatpush1.bf16.msra.mxu0 %v5684_v23 }
 0x308   : > { %2189 = vmatmul.mubr.f32.gmra.mrb[60].mxu1 %v9460_v40  ;;  %5686 = vmatprep.subr.bf16.mxu0 %v9444_v12 }
 0x309   : > { %2193 = vmatprep.mubr.f32.mxu1 %v9460_v40 }
 0x30b   : > { %5688 = vmatpush1.bf16.msra.mxu0 %v5687_v1 }
 0x30c   : > { %2194 = vmatmul.mubr.f32.gmra.mrb[62].mxu1 %v9460_v40  ;;  %5689 = vmatprep.subr.bf16.mxu0 %v9444_v12 }
 0x30f   : > { %5691 = vmatpush1.bf16.msra.mxu0 %v5690_v19 }
 0x310   : > { %5692 = vmatprep.subr.bf16.mxu0 %v9444_v12 }
 0x313   : > { %5694 = vmatpush1.bf16.msra.mxu0 %v5693_v36 }
 0x314   : > { %5695 = vmatprep.subr.bf16.mxu0 %v9444_v12 }
 0x317   : > { %5697 = vmatpush1.bf16.msra.mxu0 %v5696_v53 }
 0x318   : > { %5698 = vmatprep.subr.bf16.mxu0 %v9444_v12 }
 0x31b   : > { %5700 = vmatpush1.bf16.msra.mxu0 %v5699_v63 }
 0x31c   : > { %5701 = vmatprep.subr.bf16.mxu0 %v9444_v12 }
 0x31f   : > { %5703 = vmatpush1.bf16.msra.mxu0 %v5702_v42 }
 0x320   : > { %5704 = vmatprep.subr.bf16.mxu0 %v9444_v12 }
 0x323   : > { %5706 = vmatpush1.bf16.msra.mxu0 %v5705_v61 }
 0x324   : > { %5707 = vmatprep.subr.bf16.mxu0 %v9444_v12 }
 0x363   : > { %v2040_v5 = vpop.f32.mrb[0].mxu1 }
 0x364   : > { %v2042_v26 = vpop.f32.mrb[1].mxu1  ;;  %v2238_v3 = vmul.f32 %v7754_v18, %v2040_v5 }
 0x366   : > { %v2277_v28 = vadd.f32 %v7761_v24, %v2238_v3 }
 0x367   : > { %v2045_v4 = vpop.f32.mrb[2].mxu1 }
 0x368   : > { %v2047_v35 = vpop.f32.mrb[3].mxu1  ;;  %v2239_v6 = vmul.f32 %v7754_v18, %v2045_v4  ;;  %v2309_v10 = vmax.f32 %v2277_v28, 0.0 }
 0x36a   : > { %v2278_v14 = vadd.f32 %v7761_v24, %v2239_v6 }
 0x36b   : > { %v2050_v39 = vpop.f32.mrb[4].mxu1 }
 0x36c   : > { %v2240_v43 = vmul.f32 %v7754_v18, %v2050_v39  ;;  %v2052_v48 = vpop.f32.mrb[5].mxu1  ;;  %v2310_v13 = vmax.f32 %v2278_v14, 0.0 }
 0x36e   : > { %v2279_v30 = vadd.f32 %v7761_v24, %v2240_v43 }
 0x36f   : > { %v2055_v54 = vpop.f32.mrb[6].mxu1 }
 0x370   : > { %v2311_v44 = vmax.f32 %v2279_v30, 0.0  ;;  %v2241_v49 = vmul.f32 %v7754_v18, %v2055_v54  ;;  %v2057_v17 = vpop.f32.mrb[7].mxu1 }
 0x372   : > { %v2280_v29 = vadd.f32 %v7761_v24, %v2241_v49  ;;  %v7770_v0 = vmax.f32 %v2309_v10, %v2311_v44 }
 0x373   : > { %v2060_v58 = vpop.f32.mrb[8].mxu1 }
 0x374   : > { %v2312_v8 = vmax.f32 %v2280_v29, 0.0  ;;  %2501 = vrot.lane.b32.xlu0 %v7770_v0, %s6402_s22  ;;  %v2062_v20 = vpop.f32.mrb[9].mxu1  ;;  %v2242_v21 = vmul.f32 %v7754_v18, %v2060_v58  ;;  %v2373_v7 = vrot.slane %v7770_v0, 7  ;;  %v2437_v60 = vrot.slane %v7770_v0, 1 }
 0x376   : > { %v2342_v2 = vmax.f32 %v2310_v13, %v2312_v8  ;;  %v2281_v38 = vadd.f32 %v7761_v24, %v2242_v21 }
 0x377   : > { %v2065_v45 = vpop.f32.mrb[10].mxu1 }
 0x378   : > { %2503 = vrot.lane.b32.xlu1 %v2342_v2, %s6402_s22  ;;  %v2067_v33 = vpop.f32.mrb[11].mxu1  ;;  %v2438_v22 = vrot.slane %v2342_v2, 1  ;;  %v2375_v46 = vrot.slane %v2342_v2, 7  ;;  %v2243_v51 = vmul.f32 %v7754_v18, %v2065_v45  ;;  %v2313_v1 = vmax.f32 %v2281_v38, 0.0 }
 0x37a   : > { %v7779_v25 = vsel %vm1093_vm4, %v2437_v60, %v2438_v22  ;;  %v7784_v34 = vsel %vm585_vm0, %v2373_v7, %v2375_v46  ;;  %v2282_v50 = vadd.f32 %v7761_v24, %v2243_v51 }
 0x37b   : > { %v2070_v47 = vpop.f32.mrb[12].mxu1  ;;  %4728 = vmatprep.mubr.msk.f32.mxu0 %vm1319_vm5, %v7779_v25 }
 0x37c   : > { %v2244_v57 = vmul.f32 %v7754_v18, %v2070_v47  ;;  %v2072_v23 = vpop.f32.mrb[13].mxu1  ;;  %v2314_v9 = vmax.f32 %v2282_v50, 0.0 }
 0x37e   : > { %v2283_v62 = vadd.f32 %v7761_v24, %v2244_v57 }
 0x37f   : > { %v2075_v11 = vpop.f32.mrb[14].mxu1 }
 0x380   : > { %v2315_v31 = vmax.f32 %v2283_v62, 0.0  ;;  %v2245_v19 = vmul.f32 %v7754_v18, %v2075_v11  ;;  %v2077_v16 = vpop.f32.mrb[15].mxu1 }
 0x382   : > { %v2284_v52 = vadd.f32 %v7761_v24, %v2245_v19  ;;  %v2343_v36 = vmax.f32 %v2313_v1, %v2315_v31 }
 0x383   : > { %v2080_v32 = vpop.f32.mrb[16].mxu1 }
 0x384   : > { %v2316_v53 = vmax.f32 %v2284_v52, 0.0  ;;  %2505 = vrot.lane.b32.xlu0 %v2343_v36, %s6402_s22  ;;  %v2377_v56 = vrot.slane %v2343_v36, 7  ;;  %v2440_v27 = vrot.slane %v2343_v36, 1  ;;  %v2082_v63 = vpop.f32.mrb[17].mxu1  ;;  %v2246_v26 = vmul.f32 %v7754_v18, %v2080_v32 }
 0x386   : > { %v2344_v41 = vmax.f32 %v2314_v9, %v2316_v53  ;;  %v7797_v59 = vsel %vm1093_vm4, %v2438_v22, %v2440_v27  ;;  %v7800_v42 = vsel %vm585_vm0, %v2375_v46, %v2377_v56  ;;  %v2285_v39 = vadd.f32 %v7761_v24, %v2246_v26 }
 0x387   : > { %v2085_v5 = vpop.f32.mrb[18].mxu1 }
 0x388   : > { %2507 = vrot.lane.b32.xlu1 %v2344_v41, %s6402_s22  ;;  %v2087_v15 = vpop.f32.mrb[19].mxu1  ;;  %v2442_v37 = vrot.slane %v2344_v41, 1  ;;  %v2379_v61 = vrot.slane %v2344_v41, 7  ;;  %v2247_v28 = vmul.f32 %v7754_v18, %v2085_v5  ;;  %v2317_v54 = vmax.f32 %v2285_v39, 0.0 }
 0x38a   : > { %v7805_v4 = vsel %vm1093_vm4, %v2440_v27, %v2442_v37  ;;  %v7808_v3 = vsel %vm585_vm0, %v2377_v56, %v2379_v61  ;;  %v2286_v10 = vadd.f32 %v7761_v24, %v2247_v28 }
 0x38b   : > { %v2090_v35 = vpop.f32.mrb[20].mxu1 }
 0x38c   : > { %v2248_v6 = vmul.f32 %v7754_v18, %v2090_v35  ;;  %v2092_v43 = vpop.f32.mrb[21].mxu1  ;;  %v2318_v13 = vmax.f32 %v2286_v10, 0.0 }
 0x38e   : > { %v2287_v48 = vadd.f32 %v7761_v24, %v2248_v6 }
 0x38f   : > { %v2095_v30 = vpop.f32.mrb[22].mxu1 }
 0x390   : > { %v2319_v14 = vmax.f32 %v2287_v48, 0.0  ;;  %v2249_v44 = vmul.f32 %v7754_v18, %v2095_v30  ;;  %v2097_v49 = vpop.f32.mrb[23].mxu1 }
 0x392   : > { %v2288_v17 = vadd.f32 %v7761_v24, %v2249_v44  ;;  %v2345_v29 = vmax.f32 %v2317_v54, %v2319_v14 }
 0x393   : > { %v2100_v58 = vpop.f32.mrb[24].mxu1 }
 0x394   : > { %v2320_v8 = vmax.f32 %v2288_v17, 0.0  ;;  %2509 = vrot.lane.b32.xlu0 %v2345_v29, %s6402_s22  ;;  %v2381_v20 = vrot.slane %v2345_v29, 7  ;;  %v2444_v2 = vrot.slane %v2345_v29, 1  ;;  %v2102_v21 = vpop.f32.mrb[25].mxu1  ;;  %v2250_v46 = vmul.f32 %v7754_v18, %v2100_v58 }
 0x396   : > { %v2346_v45 = vmax.f32 %v2318_v13, %v2320_v8  ;;  %v7819_v33 = vsel %vm1093_vm4, %v2442_v37, %v2444_v2  ;;  %v7822_v60 = vsel %vm585_vm0, %v2379_v61, %v2381_v20  ;;  %v2289_v11 = vadd.f32 %v7761_v24, %v2250_v46 }
 0x397   : > { %v2105_v22 = vpop.f32.mrb[26].mxu1 }
 0x398   : > { %2511 = vrot.lane.b32.xlu1 %v2346_v45, %s6402_s22  ;;  %v2107_v47 = vpop.f32.mrb[27].mxu1  ;;  %v2446_v38 = vrot.slane %v2346_v45, 1  ;;  %v2383_v51 = vrot.slane %v2346_v45, 7  ;;  %v2251_v1 = vmul.f32 %v7754_v18, %v2105_v22  ;;  %v2321_v52 = vmax.f32 %v2289_v11, 0.0 }
 0x39a   : > { %v7827_v57 = vsel %vm1093_vm4, %v2444_v2, %v2446_v38  ;;  %v7830_v23 = vsel %vm585_vm0, %v2381_v20, %v2383_v51  ;;  %v2290_v36 = vadd.f32 %v7761_v24, %v2251_v1 }
 0x39b   : > { %v2110_v62 = vpop.f32.mrb[28].mxu1 }
 0x39c   : > { %v2252_v50 = vmul.f32 %v7754_v18, %v2110_v62  ;;  %v2112_v31 = vpop.f32.mrb[29].mxu1  ;;  %v2322_v41 = vmax.f32 %v2290_v36, 0.0 }
 0x39e   : > { %v2291_v19 = vadd.f32 %v7761_v24, %v2252_v50 }
 0x39f   : > { %v2115_v16 = vpop.f32.mrb[30].mxu1 }
 0x3a0   : > { %v2323_v32 = vmax.f32 %v2291_v19, 0.0  ;;  %v2253_v9 = vmul.f32 %v7754_v18, %v2115_v16  ;;  %v2117_v53 = vpop.f32.mrb[31].mxu1 }
 0x3a2   : > { %v2292_v56 = vadd.f32 %v7761_v24, %v2253_v9  ;;  %v2347_v27 = vmax.f32 %v2321_v52, %v2323_v32 }
 0x3a3   : > { %v2120_v63 = vpop.f32.mrb[32].mxu1 }
 0x3a4   : > { %v2324_v5 = vmax.f32 %v2292_v56, 0.0  ;;  %2513 = vrot.lane.b32.xlu0 %v2347_v27, %s6402_s22  ;;  %v2385_v26 = vrot.slane %v2347_v27, 7  ;;  %v2448_v15 = vrot.slane %v2347_v27, 1  ;;  %v2122_v37 = vpop.f32.mrb[33].mxu1  ;;  %v2254_v6 = vmul.f32 %v7754_v18, %v2120_v63 }
 0x3a6   : > { %v2348_v61 = vmax.f32 %v2322_v41, %v2324_v5  ;;  %v7841_v35 = vsel %vm1093_vm4, %v2446_v38, %v2448_v15  ;;  %v7844_v39 = vsel %vm585_vm0, %v2383_v51, %v2385_v26  ;;  %v2293_v44 = vadd.f32 %v7761_v24, %v2254_v6 }
 0x3a7   : > { %v2125_v28 = vpop.f32.mrb[34].mxu1 }
 0x3a8   : > { %2515 = vrot.lane.b32.xlu1 %v2348_v61, %s6402_s22  ;;  %v2127_v43 = vpop.f32.mrb[35].mxu1  ;;  %v2450_v48 = vrot.slane %v2348_v61, 1  ;;  %v2387_v30 = vrot.slane %v2348_v61, 7  ;;  %v2255_v49 = vmul.f32 %v7754_v18, %v2125_v28  ;;  %v2325_v8 = vmax.f32 %v2293_v44, 0.0 }
 0x3aa   : > { %v7849_v54 = vsel %vm1093_vm4, %v2448_v15, %v2450_v48  ;;  %v7852_v10 = vsel %vm585_vm0, %v2385_v26, %v2387_v30  ;;  %v2294_v20 = vadd.f32 %v7761_v24, %v2255_v49 }
 0x3ab   : > { %v2130_v14 = vpop.f32.mrb[36].mxu1 }
 0x3ac   : > { %v2256_v17 = vmul.f32 %v7754_v18, %v2130_v14  ;;  %v2132_v29 = vpop.f32.mrb[37].mxu1  ;;  %v2326_v38 = vmax.f32 %v2294_v20, 0.0 }
 0x3ae   : > { %v2295_v58 = vadd.f32 %v7761_v24, %v2256_v17 }
 0x3af   : > { %v2135_v13 = vpop.f32.mrb[38].mxu1 }
 0x3b0   : > { %v2327_v2 = vmax.f32 %v2295_v58, 0.0  ;;  %v2257_v21 = vmul.f32 %v7754_v18, %v2135_v13  ;;  %v2137_v45 = vpop.f32.mrb[39].mxu1 }
 0x3b2   : > { %v2296_v22 = vadd.f32 %v7761_v24, %v2257_v21  ;;  %v2349_v46 = vmax.f32 %v2325_v8, %v2327_v2 }
 0x3b3   : > { %v2140_v47 = vpop.f32.mrb[40].mxu1 }
 0x3b4   : > { %v2328_v51 = vmax.f32 %v2296_v22, 0.0  ;;  %2517 = vrot.lane.b32.xlu0 %v2349_v46, %s6402_s22  ;;  %v2389_v62 = vrot.slane %v2349_v46, 7  ;;  %v2452_v11 = vrot.slane %v2349_v46, 1  ;;  %v2142_v1 = vpop.f32.mrb[41].mxu1  ;;  %v2258_v52 = vmul.f32 %v7754_v18, %v2140_v47 }
 0x3b6   : > { %v2350_v50 = vmax.f32 %v2326_v38, %v2328_v51  ;;  %v7863_v31 = vsel %vm1093_vm4, %v2450_v48, %v2452_v11  ;;  %v7866_v19 = vsel %vm585_vm0, %v2387_v30, %v2389_v62  ;;  %v2297_v63 = vadd.f32 %v7761_v24, %v2258_v52 }
 0x3b7   : > { %v2145_v16 = vpop.f32.mrb[42].mxu1 }
 0x3b8   : > { %2519 = vrot.lane.b32.xlu1 %v2350_v50, %s6402_s22  ;;  %v2147_v36 = vpop.f32.mrb[43].mxu1  ;;  %v2454_v32 = vrot.slane %v2350_v50, 1  ;;  %v2391_v9 = vrot.slane %v2350_v50, 7  ;;  %v2259_v41 = vmul.f32 %v7754_v18, %v2145_v16  ;;  %v2329_v61 = vmax.f32 %v2297_v63, 0.0 }
 0x3ba   : > { %v7871_v53 = vsel %vm1093_vm4, %v2452_v11, %v2454_v32  ;;  %v7874_v56 = vsel %vm585_vm0, %v2389_v62, %v2391_v9  ;;  %v2298_v28 = vadd.f32 %v7761_v24, %v2259_v41 }
 0x3bb   : > { %v2150_v27 = vpop.f32.mrb[44].mxu1 }
 0x3bc   : > { %v2260_v5 = vmul.f32 %v7754_v18, %v2150_v27  ;;  %v2152_v26 = vpop.f32.mrb[45].mxu1  ;;  %v2330_v49 = vmax.f32 %v2298_v28, 0.0 }
 0x3be   : > { %v2299_v15 = vadd.f32 %v7761_v24, %v2260_v5 }
 0x3bf   : > { %v2155_v37 = vpop.f32.mrb[46].mxu1 }
 0x3c0   : > { %v2331_v6 = vmax.f32 %v2299_v15, 0.0  ;;  %v2261_v43 = vmul.f32 %v7754_v18, %v2155_v37  ;;  %v2157_v48 = vpop.f32.mrb[47].mxu1 }
 0x3c2   : > { %v2300_v30 = vadd.f32 %v7761_v24, %v2261_v43  ;;  %v2351_v14 = vmax.f32 %v2329_v61, %v2331_v6 }
 0x3c3   : > { %v2160_v44 = vpop.f32.mrb[48].mxu1 }
 0x3c4   : > { %v2332_v17 = vmax.f32 %v2300_v30, 0.0  ;;  %2521 = vrot.lane.b32.xlu0 %v2351_v14, %s6402_s22  ;;  %v2393_v29 = vrot.slane %v2351_v14, 7  ;;  %v2456_v58 = vrot.slane %v2351_v14, 1  ;;  %v2162_v13 = vpop.f32.mrb[49].mxu1  ;;  %v2262_v45 = vmul.f32 %v7754_v18, %v2160_v44 }
 0x3c6   : > { %v2352_v8 = vmax.f32 %v2330_v49, %v2332_v17  ;;  %v7885_v20 = vsel %vm1093_vm4, %v2454_v32, %v2456_v58  ;;  %v7888_v2 = vsel %vm585_vm0, %v2391_v9, %v2393_v29  ;;  %v2301_v11 = vadd.f32 %v7761_v24, %v2262_v45 }
 0x3c7   : > { %v2165_v21 = vpop.f32.mrb[50].mxu1 }
 0x3c8   : > { %2523 = vrot.lane.b32.xlu1 %v2352_v8, %s6402_s22  ;;  %v2167_v22 = vpop.f32.mrb[51].mxu1  ;;  %v2458_v46 = vrot.slane %v2352_v8, 1  ;;  %v2395_v47 = vrot.slane %v2352_v8, 7  ;;  %v2263_v1 = vmul.f32 %v7754_v18, %v2165_v21  ;;  %v2333_v32 = vmax.f32 %v2301_v11, 0.0 }
 0x3ca   : > { %v7893_v38 = vsel %vm1093_vm4, %v2456_v58, %v2458_v46  ;;  %v7896_v51 = vsel %vm585_vm0, %v2393_v29, %v2395_v47  ;;  %v2302_v9 = vadd.f32 %v7761_v24, %v2263_v1 }
 0x3cb   : > { %v2170_v62 = vpop.f32.mrb[52].mxu1 }
 0x3cc   : > { %v2264_v50 = vmul.f32 %v7754_v18, %v2170_v62  ;;  %v2172_v16 = vpop.f32.mrb[53].mxu1  ;;  %v2334_v37 = vmax.f32 %v2302_v9, 0.0 }
 0x3ce   : > { %v2303_v52 = vadd.f32 %v7761_v24, %v2264_v50 }
 0x3cf   : > { %v2175_v36 = vpop.f32.mrb[54].mxu1 }
 0x3d0   : > { %v2335_v27 = vmax.f32 %v2303_v52, 0.0  ;;  %v2265_v63 = vmul.f32 %v7754_v18, %v2175_v36  ;;  %v2177_v41 = vpop.f32.mrb[55].mxu1 }
 0x3d1   : > { %v9476_v41 = vld [vmem:[#allocation25_spill] sm:$0xff] }
 0x3d2   : > { %v2304_v5 = vadd.f32 %v7761_v24, %v2265_v63  ;;  %v2353_v26 = vmax.f32 %v2333_v32, %v2335_v27  ;;  %v2565_v27 = vld [vmem:[#allocation2] sm:$0xff]  ;;  %v2566_v63 = vld [vmem:[#allocation2 + $0x8] sm:$0xff] }
 0x3d3   : > { %v2180_v15 = vpop.f32.mrb[56].mxu1 }
 0x3d4   : > { %v2336_v61 = vmax.f32 %v2304_v5, 0.0  ;;  %2525 = vrot.lane.b32.xlu0 %v2353_v26, %s6402_s22  ;;  %v2397_v28 = vrot.slane %v2353_v26, 7  ;;  %v2460_v6 = vrot.slane %v2353_v26, 1  ;;  %v2182_v43 = vpop.f32.mrb[57].mxu1  ;;  %v2266_v49 = vmul.f32 %v7754_v18, %v2180_v15 }
 0x3d5   : > { %v2374_v5 = vsel %vm585_vm0, %v9476_v41, %v2373_v7  ;;  %v2567_v43 = vld [vmem:[#allocation2 + $0x10] sm:$0xff] }
 0x3d6   : > { %v2354_v48 = vmax.f32 %v2334_v37, %v2336_v61  ;;  %v7907_v30 = vsel %vm1093_vm4, %v2458_v46, %v2460_v6  ;;  %v7910_v14 = vsel %vm585_vm0, %v2395_v47, %v2397_v28  ;;  %v2305_v45 = vadd.f32 %v7761_v24, %v2266_v49 }
 0x3d7   : > { %v2185_v44 = vpop.f32.mrb[58].mxu1 }
 0x3d8   : > { %2527 = vrot.lane.b32.xlu1 %v2354_v48, %s6402_s22  ;;  %v2187_v17 = vpop.f32.mrb[59].mxu1  ;;  %v2462_v29 = vrot.slane %v2354_v48, 1  ;;  %v2399_v58 = vrot.slane %v2354_v48, 7  ;;  %v2267_v22 = vmul.f32 %v7754_v18, %v2185_v44  ;;  %v2337_v1 = vmax.f32 %v2305_v45, 0.0  ;;  %v2568_v48 = vld [vmem:[#allocation2 + $0x18] sm:$0xff] }
 0x3d9   : > { %v7951_v17 = vsel %vm1092_vm7, 0.0, %v7797_v59 }
 0x3da   : > { %v7915_v13 = vsel %vm1093_vm4, %v2460_v6, %v2462_v29  ;;  %v7918_v8 = vsel %vm585_vm0, %v2397_v28, %v2399_v58  ;;  %v2306_v50 = vadd.f32 %v7761_v24, %v2267_v22  ;;  %v5708_v28 = vpack.c.bf16 %v2566_v63, %v2565_v27  ;;  %v2569_v22 = vld [vmem:[#allocation2 + $0x20] sm:$0xff]  ;;  %v2575_v27 = vld [vmem:[#allocation2 + $0x50] sm:$0xff]  ;;  %v2576_v63 = vld [vmem:[#allocation2 + $0x58] sm:$0xff] }
 0x3db   : > { %v2190_v21 = vpop.f32.mrb[60].mxu1 }
 0x3dc   : > { %v2268_v46 = vmul.f32 %v7754_v18, %v2190_v21  ;;  %v2192_v47 = vpop.f32.mrb[61].mxu1  ;;  %v2338_v26 = vmax.f32 %v2306_v50, 0.0  ;;  %v2572_v50 = vld [vmem:[#allocation2 + $0x38] sm:$0xff] }
 0x3de   : > { %v2307_v62 = vadd.f32 %v7761_v24, %v2268_v46  ;;  %v2570_v46 = vld [vmem:[#allocation2 + $0x28] sm:$0xff] }
 0x3df   : > { %v2195_v11 = vpop.f32.mrb[62].mxu1 }
 0x3e0   : > { %v2339_v16 = vmax.f32 %v2307_v62, 0.0  ;;  %v2269_v52 = vmul.f32 %v7754_v18, %v2195_v11  ;;  %v2197_v36 = vpop.f32.mrb[63].mxu1  ;;  %v2421_v18 = vsel %vm927_vm6, 0.0, %v2374_v5  ;;  %v5714_v11 = vpack.c.bf16 %v2570_v46, %v2569_v22  ;;  %v2583_v22 = vld [vmem:[#allocation2 + $0x90] sm:$0xff]  ;;  %v2584_v46 = vld [vmem:[#allocation2 + $0x98] sm:$0xff] }
 0x3e1   : > { %v2574_v36 = vld [vmem:[#allocation2 + $0x48] sm:$0xff] }
 0x3e2   : > { %v2308_v32 = vadd.f32 %v7761_v24, %v2269_v52  ;;  %v2355_v9 = vmax.f32 %v2337_v1, %v2339_v16  ;;  %v2571_v1 = vld [vmem:[#allocation2 + $0x30] sm:$0xff]  ;;  %v2573_v52 = vld [vmem:[#allocation2 + $0x40] sm:$0xff] }
 0x3e3   : > { %v5717_v16 = vpack.c.bf16 %v2572_v50, %v2571_v1  ;;  %v8011_v1 = vsel %vm1092_vm7, 0.0, %v7841_v35  ;;  %v5735_v50 = vpack.c.bf16 %v2584_v46, %v2583_v22 }
 0x3e4   : > { %v2340_v15 = vmax.f32 %v2308_v32, 0.0  ;;  %2529 = vrot.lane.b32.xlu0 %v2355_v9, %s6402_s22  ;;  %v2401_v37 = vrot.slane %v2355_v9, 7  ;;  %v2464_v61 = vrot.slane %v2355_v9, 1  ;;  %v2423_v9 = vsel %vm927_vm6, 0.0, %v7800_v42 }
 0x3e6   : > { %v2502_v6 = vpop.permute.xlu0 %2501  ;;  %v7934_v24 = vmax.f32 %v2338_v26, %v2340_v15  ;;  %v7937_v0 = vsel %vm1093_vm4, %v2462_v29, %v2464_v61  ;;  %v7940_v7 = vsel %vm585_vm0, %v2399_v58, %v2401_v37  ;;  %v5711_v58 = vpack.c.bf16 %v2568_v48, %v2567_v43  ;;  %v2581_v48 = vld [vmem:[#allocation2 + $0x80] sm:$0xff] }
 0x3e7   : > { %v7943_v44 = vsel %vm1319_vm5, %v2421_v18, %v2502_v6  ;;  %v7986_v26 = vsel %vm1092_vm7, 0.0, %v7819_v33  ;;  %v5723_v15 = vpack.c.bf16 %v2576_v63, %v2575_v27  ;;  %v2579_v6 = vld [vmem:[#allocation2 + $0x70] sm:$0xff]  ;;  %v2580_v18 = vld [vmem:[#allocation2 + $0x78] sm:$0xff]  ;;  %v2435_v22 = vsel %vm927_vm6, 0.0, %v7940_v7 }
 0x3e8   : > { %2727 = vmatmul.mubr.f32.vlgmr.msra.gmra.mrb[32].mxu0 %v7943_v44  ;;  %2531 = vrot.lane.b32.xlu1 %v7934_v24, %s6402_s22  ;;  %v2466_v21 = vrot.slane %v7934_v24, 1  ;;  %v2403_v29 = vrot.slane %v7934_v24, 7  ;;  %v5729_v43 = vpack.c.bf16 %v2580_v18, %v2579_v6  ;;  %v2431_v18 = vsel %vm927_vm6, 0.0, %v7888_v2  ;;  %s4548_s22 = sshll.u32 %s446_s21, 6 }
 0x3e9   : > { %4729 = vmatprep.mubr.msk.f32.mxu0 %vm1319_vm5, %v7951_v17  ;;  %5709 = vmatpush1.bf16.msra.mxu0 %v5708_v28  ;;  %s9274_s17 = scalar_lea.vmem [#allocation5], %s4548_s22  ;;  %s6335_s22 = scalar_lea.vmem %s6334_s20, 2048 }
 0x3ea   : > { %v2504_v45 = vpop.permute.xlu1 %2503  ;;  %5710 = vmatprep.subr.bf16.mxu0 %v9444_v12  ;;  %v7961_v47 = vsel %vm1093_vm4, %v2464_v61, %v2466_v21  ;;  %v7964_v59 = vsel %vm585_vm0, %v2401_v37, %v2403_v29  ;;  %v2577_v37 = vld [vmem:[#allocation2 + $0x60] sm:$0xff]  ;;  %v2578_v61 = vld [vmem:[#allocation2 + $0x68] sm:$0xff]  ;;  %s4468_s30 = sshll.u32 %s9274_s17, 4  ;;  %s9319_s30 = int_to_ptr.vmem [resolvable:$true] %s4468_s30 }
 0x3eb   : > { %v7968_v62 = vsel %vm1319_vm5, %v7784_v34, %v2504_v45  ;;  %v5720_v34 = vpack.c.bf16 %v2574_v36, %v2573_v52  ;;  %v5726_v33 = vpack.c.bf16 %v2578_v61, %v2577_v37  ;;  %v2582_v29 = vld [vmem:[#allocation2 + $0x88] sm:$0xff]  ;;  %v2425_v45 = vsel %vm927_vm6, 0.0, %v7822_v60  ;;  %s6329_s23 = scalar_lea.vmem %s9319_s30, 1024  ;;  %p6336_p2 = scmp.lt.s32.totalorder %s9319_s30, %s6334_s20 }
 0x3ec   : > { %2732 = vmatmul.mubr.f32.gmra.mrb[34].mxu0 %v7968_v62  ;;  %v2586_v52 = vld [vmem:[#allocation2 + $0xa8] sm:$0xff]  ;;  %v2429_v61 = vsel %vm927_vm6, 0.0, %v7866_v19  ;;  %p6330_p6 = scmp.ne.s32.totalorder %s9319_s30, %s6329_s23  ;;  %p6337_p3 = scmp.lt.s32.totalorder %s6335_s22, %s6329_s23 }
 0x3ed   : > { %4730 = vmatprep.mubr.msk.f32.mxu0 %vm1319_vm5, %v7805_v4  ;;  %5712 = vmatpush1.bf16.msra.mxu0 %v5711_v58 }
 0x3ee   : > { %5713 = vmatprep.subr.bf16.mxu0 %v9444_v12  ;;  %p6331_p10 = pnand %p6330_p6, %p9483_p9  ;;  %p6338_p4 = por %p6337_p3, %p6336_p2 }
 0x3f0   : > { %p6332_p12 = pneg %p6331_p10 }
 0x3f1   : > { %5715 = vmatpush1.bf16.msra.mxu0 %v5714_v11 }
 0x3f2   : > { %5716 = vmatprep.subr.bf16.mxu0 %v9444_v12  ;;  %p6339_p7 = pnand %p6338_p4, %p6332_p12 }
 0x3f5   : > { %5718 = vmatpush1.bf16.msra.mxu0 %v5717_v16  ;;  %v2585_v16 = vld [vmem:[#allocation2 + $0xa0] sm:$0xff] }
 0x3f6   : > { %v2506_v32 = vpop.permute.xlu0 %2505  ;;  %5719 = vmatprep.subr.bf16.mxu0 %v9444_v12  ;;  %v5738_v35 = vpack.c.bf16 %v2586_v52, %v2585_v16  ;;  %v2955_v16 = vld [vmem:[#allocation2 + $0x190] sm:$0xff]  ;;  %v2956_v52 = vld [vmem:[#allocation2 + $0x198] sm:$0xff] }
 0x3f7   : > { %v7980_v5 = vsel %vm1319_vm5, %v2423_v9, %v2506_v32  ;;  %v2588_v32 = vld [vmem:[#allocation2 + $0xb8] sm:$0xff] }
 0x3f8   : > { %2737 = vmatmul.mubr.f32.gmra.mrb[36].mxu0 %v7980_v5 }
 0x3f9   : > { %4731 = vmatprep.mubr.msk.f32.mxu0 %vm1319_vm5, %v7986_v26  ;;  %5721 = vmatpush1.bf16.msra.mxu0 %v5720_v34  ;;  %v2587_v34 = vld [vmem:[#allocation2 + $0xb0] sm:$0xff] }
 0x3fa   : > { %v2508_v42 = vpop.permute.xlu1 %2507  ;;  %5722 = vmatprep.subr.bf16.mxu0 %v9444_v12  ;;  %v5741_v9 = vpack.c.bf16 %v2588_v32, %v2587_v34  ;;  %v2957_v34 = vld [vmem:[#allocation2 + $0x1a0] sm:$0xff]  ;;  %v2958_v32 = vld [vmem:[#allocation2 + $0x1a8] sm:$0xff] }
 0x3fb   : > { %v7993_v28 = vsel %vm1319_vm5, %v7808_v3, %v2508_v42  ;;  %v5732_v3 = vpack.c.bf16 %v2582_v29, %v2581_v48  ;;  %v2433_v29 = vsel %vm927_vm6, 0.0, %v7910_v14  ;;  %v9478_v14 = vld [vmem:[#allocation21_spill] sm:$0xff] }
 0x3fc   : > { %2742 = vmatmul.mubr.f32.gmra.mrb[38].mxu0 %v7993_v28 }
 0x3fd   : > { %4732 = vmatprep.mubr.msk.f32.mxu0 %vm1319_vm5, %v7827_v57  ;;  %5724 = vmatpush1.bf16.msra.mxu0 %v5723_v15  ;;  %v8036_v15 = vsel %vm1092_vm7, 0.0, %v7863_v31 }
 0x3fe   : > { %5725 = vmatprep.subr.bf16.mxu0 %v9444_v12 }
 0x401   : > { %5727 = vmatpush1.bf16.msra.mxu0 %v5726_v33 }
 0x402   : > { %5728 = vmatprep.subr.bf16.mxu0 %v9444_v12 }
 0x405   : > { %5730 = vmatpush1.bf16.msra.mxu0 %v5729_v43 }
 0x406   : > { %v2510_v58 = vpop.permute.xlu0 %2509  ;;  %5731 = vmatprep.subr.bf16.mxu0 %v9444_v12 }
 0x407   : > { %v8005_v11 = vsel %vm1319_vm5, %v2425_v45, %v2510_v58  ;;  %v2468_v45 = vsel %vm1093_vm4, %v2466_v21, %v9478_v14  ;;  %v2954_v21 = vld [vmem:[#allocation2 + $0x188] sm:$0xff] }
 0x408   : > { %2747 = vmatmul.mubr.f32.gmra.mrb[40].mxu0 %v8005_v11 }
 0x409   : > { %4733 = vmatprep.mubr.msk.f32.mxu0 %vm1319_vm5, %v8011_v1  ;;  %5733 = vmatpush1.bf16.msra.mxu0 %v5732_v3 }
 0x40a   : > { %v2512_v60 = vpop.permute.xlu1 %2511  ;;  %5734 = vmatprep.subr.bf16.mxu0 %v9444_v12 }
 0x40b   : > { %v8018_v36 = vsel %vm1319_vm5, %v7830_v23, %v2512_v60  ;;  %v2427_v23 = vsel %vm927_vm6, 0.0, %v7844_v39 }
 0x40c   : > { %2752 = vmatmul.mubr.f32.gmra.mrb[42].mxu0 %v8018_v36 }
 0x40d   : > { %4734 = vmatprep.mubr.msk.f32.mxu0 %vm1319_vm5, %v7849_v54  ;;  %5736 = vmatpush1.bf16.msra.mxu0 %v5735_v50  ;;  %v2953_v50 = vld [vmem:[#allocation2 + $0x180] sm:$0xff] }
 0x40e   : > { %5737 = vmatprep.subr.bf16.mxu0 %v9444_v12  ;;  %v5744_v7 = vpack.c.bf16 %v2954_v21, %v2953_v50  ;;  %v2961_v50 = vld [vmem:[#allocation2 + $0x1c0] sm:$0xff]  ;;  %v2962_v21 = vld [vmem:[#allocation2 + $0x1c8] sm:$0xff] }
 0x411   : > { %5739 = vmatpush1.bf16.msra.mxu0 %v5738_v35  ;;  %v5747_v35 = vpack.c.bf16 %v2956_v52, %v2955_v16  ;;  %v4905_v16 = vld [vmem:[%s9376_s10 + $0x3b8] sm:$0xff] }
 0x412   : > { %5740 = vmatprep.subr.bf16.mxu0 %v9444_v12 }
 0x415   : > { %5742 = vmatpush1.bf16.msra.mxu0 %v5741_v9  ;;  %v4898_v9 = vld [vmem:[%s9376_s10 + $0x380] sm:$0xff] }
 0x416   : > { %v2514_v27 = vpop.permute.xlu0 %2513  ;;  %5743 = vmatprep.subr.bf16.mxu0 %v9444_v12 }
 0x417   : > { %v8030_v63 = vsel %vm1319_vm5, %v2427_v23, %v2514_v27  ;;  %v4899_v27 = vld [vmem:[%s9376_s10 + $0x388] sm:$0xff]  ;;  %v4882_v23 = vld [vmem:[%s9376_s10 + $0x300] sm:$0xff] }
 0x418   : > { %2757 = vmatmul.mubr.f32.gmra.mrb[44].mxu0 %v8030_v63 }
 0x419   : > { %4735 = vmatprep.mubr.msk.f32.mxu0 %vm1319_vm5, %v8036_v15 }
 0x41a   : > { %v2516_v42 = vpop.permute.xlu1 %2515 }
 0x41b   : > { %v8042_v37 = vsel %vm1319_vm5, %v7852_v10, %v2516_v42  ;;  %v8057_v10 = vsel %vm1092_vm7, 0.0, %v7885_v20  ;;  %v5750_v42 = vpack.c.bf16 %v2958_v32, %v2957_v34  ;;  %v4888_v34 = vld [vmem:[%s9376_s10 + $0x330] sm:$0xff]  ;;  %v4889_v32 = vld [vmem:[%s9376_s10 + $0x338] sm:$0xff] }
 0x41c   : > { %2762 = vmatmul.mubr.f32.gmra.mrb[46].mxu0 %v8042_v37 }
 0x41d   : > { %4736 = vmatprep.mubr.msk.f32.mxu0 %vm1319_vm5, %v7871_v53 }
 0x426   : > { %v2518_v39 = vpop.permute.xlu0 %2517 }
 0x427   : > { %v8051_v31 = vsel %vm1319_vm5, %v2429_v61, %v2518_v39  ;;  %v5907_v39 = vpack.c.bf16 %v4899_v27, %v4898_v9  ;;  %v4883_v61 = vld [vmem:[%s9376_s10 + $0x308] sm:$0xff]  ;;  %v2964_v9 = vld [vmem:[#allocation2 + $0x1d8] sm:$0xff]  ;;  %v5921_v27 = vpack.c.bf16 %v4889_v32, %v4888_v34 }
 0x428   : > { %2767 = vmatmul.mubr.f32.gmra.mrb[48].mxu0 %v8051_v31  ;;  %v4793_v34 = vld [vmem:[%s9376_s10 + $0x218] sm:$0xff] }
 0x429   : > { %4737 = vmatprep.mubr.msk.f32.mxu0 %vm1319_vm5, %v8057_v10  ;;  %5908 = vmatprep.subr.bf16.mxu1 %v5907_v39  ;;  %v2966_v39 = vld [vmem:[#allocation2 + $0x1e8] sm:$0xff] }
 0x42a   : > { %v2520_v33 = vpop.permute.xlu1 %2519 }
 0x42b   : > { %v8063_v6 = vsel %vm1319_vm5, %v7874_v56, %v2520_v33  ;;  %v8078_v56 = vsel %vm1092_vm7, 0.0, %v7907_v30  ;;  %v4900_v33 = vld [vmem:[%s9376_s10 + $0x390] sm:$0xff] }
 0x42c   : > { %2772 = vmatmul.mubr.f32.gmra.mrb[50].mxu0 %v8063_v6 }
 0x42d   : > { %4738 = vmatprep.mubr.msk.f32.mxu0 %vm1319_vm5, %v7893_v38 }
 0x436   : > { %v2522_v19 = vpop.permute.xlu0 %2521 }
 0x437   : > { %v8072_v20 = vsel %vm1319_vm5, %v2431_v18, %v2522_v19  ;;  %v4901_v19 = vld [vmem:[%s9376_s10 + $0x398] sm:$0xff] }
 0x438   : > { %2777 = vmatmul.mubr.f32.gmra.mrb[52].mxu0 %v8072_v20  ;;  %v2960_v18 = vld [vmem:[#allocation2 + $0x1b8] sm:$0xff] }
 0x439   : > { %4739 = vmatprep.mubr.msk.f32.mxu0 %vm1319_vm5, %v8078_v56 }
 0x43a   : > { %v2524_v43 = vpop.permute.xlu1 %2523 }
 0x43b   : > { %v8084_v48 = vsel %vm1319_vm5, %v7896_v51, %v2524_v43  ;;  %v8099_v51 = vsel %vm1092_vm7, 0.0, %v7937_v0  ;;  %v5909_v43 = vpack.c.bf16 %v4883_v61, %v4882_v23 }
 0x43c   : > { %2782 = vmatmul.mubr.f32.gmra.mrb[54].mxu0 %v8084_v48 }
 0x43d   : > { %4740 = vmatprep.mubr.msk.f32.mxu0 %vm1319_vm5, %v7915_v13  ;;  %5910 = vmatpush3.bf16.msra.mxu1 %v5909_v43  ;;  %v2969_v43 = vld [vmem:[#allocation2 + $0x200] sm:$0xff] }
 0x446   : > { %v2526_v2 = vpop.permute.xlu0 %2525 }
 0x447   : > { %v8093_v30 = vsel %vm1319_vm5, %v2433_v29, %v2526_v2  ;;  %v4884_v2 = vld [vmem:[%s9376_s10 + $0x310] sm:$0xff]  ;;  %v4885_v29 = vld [vmem:[%s9376_s10 + $0x318] sm:$0xff] }
 0x448   : > { %2787 = vmatmul.mubr.f32.gmra.mrb[56].mxu0 %v8093_v30 }
 0x449   : > { %4741 = vmatprep.mubr.msk.f32.mxu0 %vm1319_vm5, %v8099_v51 }
 0x44a   : > { %v2528_v3 = vpop.permute.xlu1 %2527 }
 0x44b   : > { %v8105_v58 = vsel %vm1319_vm5, %v7918_v8, %v2528_v3  ;;  %v8123_v8 = vsel %vm1092_vm7, 0.0, %v2468_v45  ;;  %v5913_v3 = vpack.c.bf16 %v4885_v29, %v4884_v2  ;;  %v4902_v45 = vld [vmem:[%s9376_s10 + $0x3a0] sm:$0xff]  ;;  %v2971_v29 = vld [vmem:[#allocation2 + $0x210] sm:$0xff] }
 0x44c   : > { %2792 = vmatmul.mubr.f32.gmra.mrb[58].mxu0 %v8105_v58 }
 0x44d   : > { %4742 = vmatprep.mubr.msk.f32.mxu0 %vm1319_vm5, %v7961_v47 }
 0x456   : > { %v2530_v0 = vpop.permute.xlu0 %2529 }
 0x457   : > { %v8118_v46 = vsel %vm1319_vm5, %v2435_v22, %v2530_v0  ;;  %v4903_v0 = vld [vmem:[%s9376_s10 + $0x3a8] sm:$0xff] }
 0x458   : > { %2797 = vmatmul.mubr.f32.gmra.mrb[60].mxu0 %v8118_v46 }
 0x459   : > { %4743 = vmatprep.mubr.msk.f32.mxu0 %vm1319_vm5, %v8123_v8 }
 0x45a   : > { %v2532_v24 = vpop.permute.xlu1 %2531 }
 0x45b   : > { %v8129_v60 = vsel %vm1319_vm5, %v7964_v59, %v2532_v24  ;;  %v2959_v59 = vld [vmem:[#allocation2 + $0x1b0] sm:$0xff]  ;;  %v4886_v24 = vld [vmem:[%s9376_s10 + $0x320] sm:$0xff] }
 0x45c   : > { %2802 = vmatmul.mubr.f32.gmra.mrb[62].mxu0 %v8129_v60  ;;  %v5753_v22 = vpack.c.bf16 %v2960_v18, %v2959_v59  ;;  %v2963_v59 = vld [vmem:[#allocation2 + $0x1d0] sm:$0xff] }
 0x45d   : > { %2871 = vmatprep.mubr.f32.mxu0 %v9460_v40  ;;  %v5759_v23 = vpack.c.bf16 %v2964_v9, %v2963_v59  ;;  %v4776_v9 = vld [vmem:[%s9376_s10 + $0x190] sm:$0xff] }
 0x460   : > { %2872 = vmatmul.mubr.f32.vlgmr.msra.gmra.mrb[32].mxu0 %v9460_v40 }
 0x461   : > { %5745 = vmatpush1.bf16.msra.mxu0 %v5744_v7  ;;  %2876 = vmatprep.mubr.f32.mxu0 %v9460_v40  ;;  %v5915_v7 = vpack.c.bf16 %v4903_v0, %v4902_v45  ;;  %v2973_v0 = vld [vmem:[#allocation2 + $0x220] sm:$0xff] }
 0x462   : > { %5746 = vmatprep.subr.bf16.mxu0 %v9444_v12 }
 0x464   : > { %2877 = vmatmul.mubr.f32.gmra.mrb[34].mxu0 %v9460_v40 }
 0x465   : > { %4744 = vmatprep.mubr.msk.f32.mxu0 %vm1319_vm5, %v7779_v25  ;;  %5748 = vmatpush1.bf16.msra.mxu0 %v5747_v35  ;;  %v5911_v25 = vpack.c.bf16 %v4901_v19, %v4900_v33  ;;  %v5756_v35 = vpack.c.bf16 %v2962_v21, %v2961_v50  ;;  %v2967_v33 = vld [vmem:[#allocation2 + $0x1f0] sm:$0xff]  ;;  %v2968_v19 = vld [vmem:[#allocation2 + $0x1f8] sm:$0xff]  ;;  %v4790_v21 = vld [vmem:[%s9376_s10 + $0x200] sm:$0xff] }
 0x466   : > { %5749 = vmatprep.subr.bf16.mxu0 %v9444_v12  ;;  %v5765_v18 = vpack.c.bf16 %v2968_v19, %v2967_v33  ;;  %v2976_v50 = vld [vmem:[#allocation2 + $0x238] sm:$0xff]  ;;  %v4796_v33 = vld [vmem:[%s9376_s10 + $0x230] sm:$0xff] }
 0x467   : > { %5912 = vmatprep.subr.bf16.mxu1 %v5911_v25  ;;  %v2970_v25 = vld [vmem:[#allocation2 + $0x208] sm:$0xff] }
 0x468   : > { %2882 = vmatmul.mubr.f32.gmra.mrb[36].mxu0 %v7943_v44  ;;  %v4887_v44 = vld [vmem:[%s9376_s10 + $0x328] sm:$0xff]  ;;  %5914 = vmatpush3.bf16.msra.mxu1 %v5913_v3  ;;  %v5768_v2 = vpack.c.bf16 %v2970_v25, %v2969_v43  ;;  %v2972_v3 = vld [vmem:[#allocation2 + $0x218] sm:$0xff]  ;;  %v4798_v25 = vld [vmem:[%s9376_s10 + $0x240] sm:$0xff] }
 0x469   : > { %4745 = vmatprep.mubr.msk.f32.mxu0 %vm1319_vm5, %v7951_v17  ;;  %5751 = vmatpush1.bf16.msra.mxu0 %v5750_v42  ;;  %v4904_v17 = vld [vmem:[%s9376_s10 + $0x3b0] sm:$0xff]  ;;  %v5917_v52 = vpack.c.bf16 %v4887_v44, %v4886_v24  ;;  %v2965_v42 = vld [vmem:[#allocation2 + $0x1e0] sm:$0xff]  ;;  %v5771_v45 = vpack.c.bf16 %v2972_v3, %v2971_v29  ;;  %v4781_v43 = vld [vmem:[%s9376_s10 + $0x1b8] sm:$0xff] }
 0x46a   : > { %5752 = vmatprep.subr.bf16.mxu0 %v9444_v12  ;;  %5916 = vmatprep.subr.bf16.mxu1 %v5915_v7  ;;  %v5762_v61 = vpack.c.bf16 %v2966_v39, %v2965_v42  ;;  %v2975_v44 = vld [vmem:[#allocation2 + $0x230] sm:$0xff]  ;;  %v4791_v7 = vld [vmem:[%s9376_s10 + $0x208] sm:$0xff]  ;;  %v4778_v39 = vld [vmem:[%s9376_s10 + $0x1a0] sm:$0xff] }
 0x46b   : > { %v4782_v29 = vld [vmem:[%s9376_s10 + $0x1c0] sm:$0xff]  ;;  %v4783_v3 = vld [vmem:[%s9376_s10 + $0x1c8] sm:$0xff] }
 0x46c   : > { %2887 = vmatmul.mubr.f32.gmra.mrb[38].mxu0 %v7968_v62  ;;  %v5919_v62 = vpack.c.bf16 %v4905_v16, %v4904_v17  ;;  %5918 = vmatpush3.bf16.msra.mxu1 %v5917_v52  ;;  %v5777_v17 = vpack.c.bf16 %v2976_v50, %v2975_v44  ;;  %v5779_v16 = vpack.c.bf16 %v4791_v7, %v4790_v21  ;;  %v4775_v52 = vld [vmem:[%s9376_s10 + $0x188] sm:$0xff]  ;;  %v4802_v44 = vld [vmem:[%s9376_s10 + $0x260] sm:$0xff] }
 0x46d   : > { %4746 = vmatprep.mubr.msk.f32.mxu0 %vm1319_vm5, %v7805_v4  ;;  %5754 = vmatpush1.bf16.msra.mxu0 %v5753_v22  ;;  %v2974_v22 = vld [vmem:[#allocation2 + $0x228] sm:$0xff]  ;;  %v4786_v21 = vld [vmem:[%s9376_s10 + $0x1e0] sm:$0xff] }
 0x46e   : > { %5755 = vmatprep.subr.bf16.mxu0 %v9444_v12  ;;  %5920 = vmatprep.subr.bf16.mxu1 %v5919_v62  ;;  %v5774_v24 = vpack.c.bf16 %v2974_v22, %v2973_v0  ;;  %v4777_v62 = vld [vmem:[%s9376_s10 + $0x198] sm:$0xff]  ;;  %v4784_v22 = vld [vmem:[%s9376_s10 + $0x1d0] sm:$0xff]  ;;  %v4787_v7 = vld [vmem:[%s9376_s10 + $0x1e8] sm:$0xff] }
 0x470   : > { %2892 = vmatmul.mubr.f32.gmra.mrb[40].mxu0 %v7980_v5  ;;  %5922 = vmatpush3.bf16.msra.mxu1 %v5921_v27  ;;  %v4794_v27 = vld [vmem:[%s9376_s10 + $0x220] sm:$0xff] }
 0x471   : > { %4747 = vmatprep.mubr.msk.f32.mxu0 %vm1319_vm5, %v7986_v26  ;;  %5757 = vmatpush1.bf16.msra.mxu0 %v5756_v35  ;;  %v4792_v35 = vld [vmem:[%s9376_s10 + $0x210] sm:$0xff] }
 0x472   : > { %5758 = vmatprep.subr.bf16.mxu0 %v9444_v12  ;;  %v5783_v59 = vpack.c.bf16 %v4793_v34, %v4792_v35  ;;  %v4895_v35 = vld [vmem:[%s9376_s10 + $0x368] sm:$0xff] }
 0x474   : > { %2897 = vmatmul.mubr.f32.gmra.mrb[42].mxu0 %v7993_v28 }
 0x475   : > { %4748 = vmatprep.mubr.msk.f32.mxu0 %vm1319_vm5, %v7827_v57  ;;  %5760 = vmatpush1.bf16.msra.mxu0 %v5759_v23  ;;  %v4795_v23 = vld [vmem:[%s9376_s10 + $0x228] sm:$0xff] }
 0x476   : > { %5761 = vmatprep.subr.bf16.mxu0 %v9444_v12  ;;  %v5787_v42 = vpack.c.bf16 %v4795_v23, %v4794_v27  ;;  %v4913_v27 = vld [vmem:[%s9376_s10 + $0x3f8] sm:$0xff]  ;;  %v4896_v23 = vld [vmem:[%s9376_s10 + $0x370] sm:$0xff] }
 0x478   : > { %2902 = vmatmul.mubr.f32.gmra.mrb[44].mxu0 %v8005_v11 }
 0x479   : > { %4749 = vmatprep.mubr.msk.f32.mxu0 %vm1319_vm5, %v8011_v1  ;;  %5763 = vmatpush1.bf16.msra.mxu0 %v5762_v61  ;;  %v4779_v61 = vld [vmem:[%s9376_s10 + $0x1a8] sm:$0xff] }
 0x47a   : > { %5764 = vmatprep.subr.bf16.mxu0 %v9444_v12 }
 0x47c   : > { %2907 = vmatmul.mubr.f32.gmra.mrb[46].mxu0 %v8018_v36 }
 0x47d   : > { %4750 = vmatprep.mubr.msk.f32.mxu0 %vm1319_vm5, %v7849_v54  ;;  %5766 = vmatpush1.bf16.msra.mxu0 %v5765_v18  ;;  %v4780_v18 = vld [vmem:[%s9376_s10 + $0x1b0] sm:$0xff] }
 0x47e   : > { %5767 = vmatprep.subr.bf16.mxu0 %v9444_v12 }
 0x480   : > { %2912 = vmatmul.mubr.f32.gmra.mrb[48].mxu0 %v8030_v63 }
 0x481   : > { %4751 = vmatprep.mubr.msk.f32.mxu0 %vm1319_vm5, %v8036_v15  ;;  %5769 = vmatpush1.bf16.msra.mxu0 %v5768_v2 }
 0x482   : > { %5770 = vmatprep.subr.bf16.mxu0 %v9444_v12 }
 0x484   : > { %2917 = vmatmul.mubr.f32.gmra.mrb[50].mxu0 %v8042_v37 }
 0x485   : > { %4752 = vmatprep.mubr.msk.f32.mxu0 %vm1319_vm5, %v7871_v53  ;;  %5772 = vmatpush1.bf16.msra.mxu0 %v5771_v45  ;;  %v4800_v45 = vld [vmem:[%s9376_s10 + $0x250] sm:$0xff] }
 0x486   : > { %5773 = vmatprep.subr.bf16.mxu0 %v9444_v12 }
 0x488   : > { %2922 = vmatmul.mubr.f32.gmra.mrb[52].mxu0 %v8051_v31 }
 0x489   : > { %4753 = vmatprep.mubr.msk.f32.mxu0 %vm1319_vm5, %v8057_v10  ;;  %5775 = vmatpush1.bf16.msra.mxu0 %v5774_v24  ;;  %v4785_v24 = vld [vmem:[%s9376_s10 + $0x1d8] sm:$0xff] }
 0x48a   : > { %5776 = vmatprep.subr.bf16.mxu0 %v9444_v12  ;;  %v4774_v12 = vld [vmem:[%s9376_s10 + $0x180] sm:$0xff] }
 0x48b   : > { %v5781_v32 = vpack.c.bf16 %v4775_v52, %v4774_v12  ;;  %v4894_v52 = vld [vmem:[%s9376_s10 + $0x360] sm:$0xff] }
 0x48c   : > { %2927 = vmatmul.mubr.f32.gmra.mrb[54].mxu0 %v8063_v6  ;;  %v5933_v34 = vpack.c.bf16 %v4895_v35, %v4894_v52 }
 0x48d   : > { %4754 = vmatprep.mubr.msk.f32.mxu0 %vm1319_vm5, %v7893_v38  ;;  %5778 = vmatpush1.bf16.msra.mxu0 %v5777_v17  ;;  %v4910_v17 = vld [vmem:[%s9376_s10 + $0x3e0] sm:$0xff] }
 0x48e   : > { %5780 = vmatprep.subr.bf16.mxu0 %v5779_v16  ;;  %v4911_v16 = vld [vmem:[%s9376_s10 + $0x3e8] sm:$0xff] }
 0x48f   : > { %v5931_v12 = vpack.c.bf16 %v4911_v16, %v4910_v17 }
 0x490   : > { %2932 = vmatmul.mubr.f32.gmra.mrb[56].mxu0 %v8072_v20 }
 0x491   : > { %4755 = vmatprep.mubr.msk.f32.mxu0 %vm1319_vm5, %v8078_v56 }
 0x494   : > { %2937 = vmatmul.mubr.f32.gmra.mrb[58].mxu0 %v8084_v48 }
 0x495   : > { %4756 = vmatprep.mubr.msk.f32.mxu0 %vm1319_vm5, %v7915_v13 }
 0x498   : > { %2942 = vmatmul.mubr.f32.gmra.mrb[60].mxu0 %v8093_v30 }
 0x499   : > { %4757 = vmatprep.mubr.msk.f32.mxu0 %vm1319_vm5, %v8099_v51 }
 0x49c   : > { %2947 = vmatmul.mubr.f32.gmra.mrb[62].mxu0 %v8105_v58 }
 0x49d   : > { %4758 = vmatprep.mubr.msk.f32.mxu0 %vm1319_vm5, %v7805_v4  ;;  %v5785_v4 = vpack.c.bf16 %v4777_v62, %v4776_v9  ;;  %v4912_v9 = vld [vmem:[%s9376_s10 + $0x3f0] sm:$0xff] }
 0x4a0   : > { %3042 = vmatmul.mubr.f32.vlgmr.msra.gmra.mrb[32].mxu0 %v7980_v5  ;;  %v4797_v5 = vld [vmem:[%s9376_s10 + $0x238] sm:$0xff] }
 0x4a1   : > { %4759 = vmatprep.mubr.msk.f32.mxu0 %vm1319_vm5, %v7986_v26  ;;  %5782 = vmatpush3.bf16.msra.mxu0 %v5781_v32  ;;  %v5789_v26 = vpack.c.bf16 %v4779_v61, %v4778_v39  ;;  %v5791_v19 = vpack.c.bf16 %v4797_v5, %v4796_v33  ;;  %v4806_v32 = vld [vmem:[%s9376_s10 + $0x280] sm:$0xff] }
 0x4a2   : > { %5784 = vmatprep.subr.bf16.mxu0 %v5783_v59  ;;  %v4807_v59 = vld [vmem:[%s9376_s10 + $0x288] sm:$0xff]  ;;  %v8436_v61 = vld [vmem:[%s9374_s8] ss:$0 sm:$0xff] }
 0x4a3   : > { %v5811_v62 = vpack.c.bf16 %v4807_v59, %v4806_v32  ;;  %v8441_v5 = vld [vmem:[%s9375_s9] ss:$0 sm:$0xff]  ;;  %v4817_v32 = vld [vmem:[%s9376_s10 + $0x2d8] sm:$0xff] }
 0x4a4   : > { %3047 = vmatmul.mubr.f32.gmra.mrb[34].mxu0 %v7993_v28  ;;  %v5793_v28 = vpack.c.bf16 %v4781_v43, %v4780_v18 }
 0x4a5   : > { %4760 = vmatprep.mubr.msk.f32.mxu0 %vm1319_vm5, %v7827_v57  ;;  %5786 = vmatpush3.bf16.msra.mxu0 %v5785_v4  ;;  %v4799_v57 = vld [vmem:[%s9376_s10 + $0x248] sm:$0xff]  ;;  %v4897_v4 = vld [vmem:[%s9376_s10 + $0x378] sm:$0xff] }
 0x4a6   : > { %5788 = vmatprep.subr.bf16.mxu0 %v5787_v42  ;;  %v5795_v2 = vpack.c.bf16 %v4799_v57, %v4798_v25  ;;  %v5935_v42 = vpack.c.bf16 %v4913_v27, %v4912_v9  ;;  %v5937_v39 = vpack.c.bf16 %v4897_v4, %v4896_v23 }
 0x4a8   : > { %3052 = vmatmul.mubr.f32.gmra.mrb[36].mxu0 %v8005_v11  ;;  %v4801_v11 = vld [vmem:[%s9376_s10 + $0x258] sm:$0xff] }
 0x4a9   : > { %4761 = vmatprep.mubr.msk.f32.mxu0 %vm1319_vm5, %v8011_v1  ;;  %5790 = vmatpush3.bf16.msra.mxu0 %v5789_v26  ;;  %v5797_v1 = vpack.c.bf16 %v4783_v3, %v4782_v29  ;;  %v5799_v0 = vpack.c.bf16 %v4801_v11, %v4800_v45  ;;  %v4809_v29 = vld [vmem:[%s9376_s10 + $0x298] sm:$0xff]  ;;  %v4918_v11 = vld [vmem:[%s9376_s10 + $0x420] sm:$0xff] }
 0x4aa   : > { %5792 = vmatprep.subr.bf16.mxu0 %v5791_v19 }
 0x4ac   : > { %3057 = vmatmul.mubr.f32.gmra.mrb[38].mxu0 %v8018_v36  ;;  %v5801_v36 = vpack.c.bf16 %v4785_v24, %v4784_v22 }
 0x4ad   : > { %4762 = vmatprep.mubr.msk.f32.mxu0 %vm1319_vm5, %v7849_v54  ;;  %5794 = vmatpush3.bf16.msra.mxu0 %v5793_v28  ;;  %v4803_v54 = vld [vmem:[%s9376_s10 + $0x268] sm:$0xff] }
 0x4ae   : > { %5796 = vmatprep.subr.bf16.mxu0 %v5795_v2  ;;  %v5803_v50 = vpack.c.bf16 %v4803_v54, %v4802_v44  ;;  %v4808_v2 = vld [vmem:[%s9376_s10 + $0x290] sm:$0xff] }
 0x4b0   : > { %3062 = vmatmul.mubr.f32.gmra.mrb[40].mxu0 %v8030_v63  ;;  %v5805_v63 = vpack.c.bf16 %v4787_v7, %v4786_v21 }
 0x4b1   : > { %4763 = vmatprep.mubr.msk.f32.mxu0 %vm1319_vm5, %v8036_v15  ;;  %5798 = vmatpush3.bf16.msra.mxu0 %v5797_v1  ;;  %v4891_v15 = vld [vmem:[%s9376_s10 + $0x348] sm:$0xff] }
 0x4b2   : > { %5800 = vmatprep.subr.bf16.mxu0 %v5799_v0  ;;  %v5815_v0 = vpack.c.bf16 %v4809_v29, %v4808_v2 }
 0x4b4   : > { %3067 = vmatmul.mubr.f32.gmra.mrb[42].mxu0 %v8042_v37 }
 0x4b5   : > { %4764 = vmatprep.mubr.msk.f32.mxu0 %vm1319_vm5, %v7871_v53  ;;  %5802 = vmatpush3.bf16.msra.mxu0 %v5801_v36  ;;  %v4906_v53 = vld [vmem:[%s9376_s10 + $0x3c0] sm:$0xff]  ;;  %v4811_v36 = vld [vmem:[%s9376_s10 + $0x2a8] sm:$0xff] }
 0x4b6   : > { %5804 = vmatprep.subr.bf16.mxu0 %v5803_v50 }
 0x4b8   : > { %3072 = vmatmul.mubr.f32.gmra.mrb[44].mxu0 %v8051_v31  ;;  %v4804_v31 = vld [vmem:[%s9376_s10 + $0x270] sm:$0xff] }
 0x4b9   : > { %4765 = vmatprep.mubr.msk.f32.mxu0 %vm1319_vm5, %v8057_v10  ;;  %5806 = vmatpush3.bf16.msra.mxu0 %v5805_v63  ;;  %v4805_v10 = vld [vmem:[%s9376_s10 + $0x278] sm:$0xff] }
 0x4bc   : > { %3077 = vmatmul.mubr.f32.gmra.mrb[46].mxu0 %v8063_v6  ;;  %v4908_v6 = vld [vmem:[%s9376_s10 + $0x3d0] sm:$0xff] }
 0x4bd   : > { %4766 = vmatprep.mubr.msk.f32.mxu0 %vm1319_vm5, %v7893_v38  ;;  %v4907_v38 = vld [vmem:[%s9376_s10 + $0x3c8] sm:$0xff] }
 0x4c0   : > { %3082 = vmatmul.mubr.f32.gmra.mrb[48].mxu0 %v8072_v20  ;;  %v5807_v20 = vpack.c.bf16 %v4805_v10, %v4804_v31 }
 0x4c1   : > { %4767 = vmatprep.mubr.msk.f32.mxu0 %vm1319_vm5, %v8078_v56  ;;  %v4788_v56 = vld [vmem:[%s9376_s10 + $0x1f0] sm:$0xff] }
 0x4c2   : > { %5808 = vmatprep.subr.bf16.mxu0 %v5807_v20 }
 0x4c4   : > { %3087 = vmatmul.mubr.f32.gmra.mrb[50].mxu0 %v8084_v48  ;;  %v4789_v48 = vld [vmem:[%s9376_s10 + $0x1f8] sm:$0xff] }
 0x4c5   : > { %4768 = vmatprep.mubr.msk.f32.mxu0 %vm1319_vm5, %v7915_v13  ;;  %v5923_v13 = vpack.c.bf16 %v4907_v38, %v4906_v53 }
 0x4c7   : > { %5924 = vmatprep.subr.bf16.mxu1 %v5923_v13  ;;  %v5819_v13 = vpack.c.bf16 %v4811_v36, %v4810_v55 }
 0x4c8   : > { %3092 = vmatmul.mubr.f32.gmra.mrb[52].mxu0 %v8093_v30  ;;  %v4909_v30 = vld [vmem:[%s9376_s10 + $0x3d8] sm:$0xff] }
 0x4c9   : > { %4769 = vmatprep.mubr.msk.f32.mxu0 %vm1319_vm5, %v8099_v51  ;;  %v5809_v51 = vpack.c.bf16 %v4789_v48, %v4788_v56 }
 0x4cb   : > { %5810 = vmatpush3.bf16.msra.mxu0 %v5809_v51  ;;  %v4814_v51 = vld [vmem:[%s9376_s10 + $0x2c0] sm:$0xff] }
 0x4cc   : > { %3097 = vmatmul.mubr.f32.gmra.mrb[54].mxu0 %v8105_v58  ;;  %v5927_v58 = vpack.c.bf16 %v4909_v30, %v4908_v6  ;;  %5812 = vmatprep.subr.bf16.mxu0 %v5811_v62 }
 0x4cd   : > { %4770 = vmatprep.mubr.msk.f32.mxu0 %vm1319_vm5, %v7961_v47  ;;  %v4890_v47 = vld [vmem:[%s9376_s10 + $0x340] sm:$0xff] }
 0x4ce   : > { %v5925_v37 = vpack.c.bf16 %v4891_v15, %v4890_v47  ;;  %v4812_v47 = vld [vmem:[%s9376_s10 + $0x2b0] sm:$0xff]  ;;  %v4813_v15 = vld [vmem:[%s9376_s10 + $0x2b8] sm:$0xff] }
 0x4cf   : > { %v5823_v30 = vpack.c.bf16 %v4813_v15, %v4812_v47 }
 0x4d0   : > { %3102 = vmatmul.mubr.f32.gmra.mrb[56].mxu0 %v8118_v46  ;;  %5926 = vmatpush3.bf16.msra.mxu1 %v5925_v37  ;;  %v4892_v46 = vld [vmem:[%s9376_s10 + $0x350] sm:$0xff] }
 0x4d1   : > { %4771 = vmatprep.mubr.msk.f32.mxu0 %vm1319_vm5, %v8123_v8  ;;  %v4893_v8 = vld [vmem:[%s9376_s10 + $0x358] sm:$0xff]  ;;  %5928 = vmatprep.subr.bf16.mxu1 %v5927_v58  ;;  %v4815_v58 = vld [vmem:[%s9376_s10 + $0x2c8] sm:$0xff] }
 0x4d2   : > { %v5827_v35 = vpack.c.bf16 %v4815_v58, %v4814_v51 }
 0x4d4   : > { %3107 = vmatmul.mubr.f32.gmra.mrb[58].mxu0 %v8129_v60  ;;  %v5929_v60 = vpack.c.bf16 %v4893_v8, %v4892_v46 }
 0x4d5   : > { %3111 = vmatprep.mubr.f32.mxu0 %v9460_v40 }
 0x4d6   : > { %5930 = vmatpush3.bf16.msra.mxu1 %v5929_v60 }
 0x4d7   : > { %5932 = vmatprep.subr.bf16.mxu1 %v5931_v12 }
 0x4d8   : > { %3112 = vmatmul.mubr.f32.gmra.mrb[60].mxu0 %v9460_v40 }
 0x4d9   : > { %3116 = vmatprep.mubr.f32.mxu0 %v9460_v40 }
 0x4da   : > { %5934 = vmatpush3.bf16.msra.mxu1 %v5933_v34  ;;  %v4816_v34 = vld [vmem:[%s9376_s10 + $0x2d0] sm:$0xff] }
 0x4db   : > { %5936 = vmatprep.subr.bf16.mxu1 %v5935_v42 }
 0x4dc   : > { %3117 = vmatmul.mubr.f32.gmra.mrb[62].mxu0 %v9460_v40 }
 0x4de   : > { %5938 = vmatpush3.bf16.msra.mxu1 %v5937_v39  ;;  %v5831_v39 = vpack.c.bf16 %v4817_v32, %v4816_v34 }
 0x573   : > { %v3043_v33 = vpop.f32.mrb[32].mxu0 }
 0x574   : > { %v3145_v26 = vmul.f32 %v8436_v61, %v3043_v33  ;;  %v3045_v19 = vpop.f32.mrb[33].mxu0  ;;  %v4818_v33 = vld [vmem:[%s9376_s10 + $0x2e0] sm:$0xff] }
 0x576   : > { %v3168_v18 = vadd.f32 %v8441_v5, %v3145_v26  ;;  %v4819_v26 = vld [vmem:[%s9376_s10 + $0x2e8] sm:$0xff] }
 0x577   : > { %v3048_v43 = vpop.f32.mrb[34].mxu0 }
 0x578   : > { %v8445_v25 = vmax.f32 %v3168_v18, 0.0  ;;  %v3146_v57 = vmul.f32 %v8436_v61, %v3048_v43  ;;  %v3050_v28 = vpop.f32.mrb[35].mxu0 }
 0x57a   : > { %v3216_v3 = vrot.slane %v8445_v25, 7  ;;  %v3169_v45 = vadd.f32 %v8441_v5, %v3146_v57  ;;  %3505 = vmatprep.mubr.f32.mxu0 %v8445_v25 }
 0x57b   : > { %v3053_v1 = vpop.f32.mrb[36].mxu0 }
 0x57c   : > { %v8463_v22 = vmax.f32 %v3169_v45, 0.0  ;;  %v3147_v24 = vmul.f32 %v8436_v61, %v3053_v1  ;;  %v3055_v44 = vpop.f32.mrb[37].mxu0  ;;  %v8468_v54 = vsel %vm585_vm0, %v9476_v41, %v3216_v3  ;;  %v4820_v45 = vld [vmem:[%s9376_s10 + $0x2f0] sm:$0xff]  ;;  %v4821_v1 = vld [vmem:[%s9376_s10 + $0x2f8] sm:$0xff] }
 0x57d   : > { %4823 = vmatmul.mubr.msk.f32.vlgmr.msra.gmra.mrb[64].mxu0 %vm8459_vm8, %v8468_v54 }
 0x57e   : > { %v3170_v50 = vadd.f32 %v8441_v5, %v3147_v24  ;;  %5814 = vmatpush3.bf16.msra.mxu0 %v5811_v62  ;;  %3510 = vmatprep.mubr.f32.mxu0 %v8463_v22  ;;  %v3218_v41 = vrot.slane %v8463_v22, 7 }
 0x57f   : > { %v3058_v21 = vpop.f32.mrb[38].mxu0  ;;  %5816 = vmatprep.subr.bf16.mxu0 %v5815_v0 }
 0x580   : > { %v8482_v7 = vmax.f32 %v3170_v50, 0.0  ;;  %v3148_v63 = vmul.f32 %v8436_v61, %v3058_v21  ;;  %v3060_v53 = vpop.f32.mrb[39].mxu0  ;;  %v8486_v38 = vsel %vm585_vm0, %v3216_v3, %v3218_v41  ;;  %v5835_v3 = vpack.c.bf16 %v4819_v26, %v4818_v33 }
 0x581   : > { %3511 = vmatmul.mubr.f32.gmra.mrb[66].mxu0 %v8486_v38  ;;  %v5839_v21 = vpack.c.bf16 %v4821_v1, %v4820_v45  ;;  %v3361_v53 = vld [vmem:[%s9376_s10 + $0x88] sm:$0xff] }
 0x582   : > { %v3171_v37 = vadd.f32 %v8441_v5, %v3148_v63  ;;  %3515 = vmatprep.mubr.f32.mxu0 %v8482_v7  ;;  %4134 = vmatprep.mubr.f32.mxu1 %v8482_v7  ;;  %v3220_v31 = vrot.slane %v8482_v7, 7  ;;  %v3360_v63 = vld [vmem:[%s9376_s10 + $0x80] sm:$0xff] }
 0x583   : > { %v3063_v10 = vpop.f32.mrb[40].mxu0  ;;  %5818 = vmatpush3.bf16.msra.mxu0 %v5815_v0 }
 0x584   : > { %v8499_v6 = vmax.f32 %v3171_v37, 0.0  ;;  %v3149_v20 = vmul.f32 %v8436_v61, %v3063_v10  ;;  %v3065_v56 = vpop.f32.mrb[41].mxu0  ;;  %v8503_v48 = vsel %vm585_vm0, %v3218_v41, %v3220_v31  ;;  %5820 = vmatprep.subr.bf16.mxu0 %v5819_v13 }
 0x585   : > { %4825 = vmatmul.mubr.msk.f32.gmra.mrb[68].mxu0 %vm8459_vm8, %v8503_v48  ;;  %4931 = vmatmul.mubr.msk.f32.vlgmr.msra.gmra.mrb[64].mxu1 %vm8459_vm8, %v8503_v48  ;;  %v5843_v56 = vpack.c.bf16 %v3361_v53, %v3360_v63 }
 0x586   : > { %v3172_v46 = vadd.f32 %v8441_v5, %v3149_v20  ;;  %3520 = vmatprep.mubr.f32.mxu0 %v8499_v6  ;;  %4139 = vmatprep.mubr.f32.mxu1 %v8499_v6  ;;  %v3222_v8 = vrot.slane %v8499_v6, 7 }
 0x587   : > { %v3068_v60 = vpop.f32.mrb[42].mxu0  ;;  %5822 = vmatpush3.bf16.msra.mxu0 %v5819_v13 }
 0x588   : > { %v8521_v17 = vmax.f32 %v3172_v46, 0.0  ;;  %v3150_v16 = vmul.f32 %v8436_v61, %v3068_v60  ;;  %v3070_v12 = vpop.f32.mrb[43].mxu0  ;;  %v8525_v52 = vsel %vm585_vm0, %v3220_v31, %v3222_v8  ;;  %5824 = vmatprep.subr.bf16.mxu0 %v5823_v30 }
 0x589   : > { %3521 = vmatmul.mubr.f32.gmra.mrb[70].mxu0 %v8525_v52  ;;  %4140 = vmatmul.mubr.f32.gmra.mrb[66].mxu1 %v8525_v52 }
 0x58a   : > { %v3173_v59 = vadd.f32 %v8441_v5, %v3150_v16  ;;  %3525 = vmatprep.mubr.f32.mxu0 %v8521_v17  ;;  %4144 = vmatprep.mubr.f32.mxu1 %v8521_v17  ;;  %v3224_v9 = vrot.slane %v8521_v17, 7  ;;  %v3287_v49 = vrot.slane %v8521_v17, 1 }
 0x58b   : > { %v3073_v62 = vpop.f32.mrb[44].mxu0  ;;  %5826 = vmatpush3.bf16.msra.mxu0 %v5823_v30 }
 0x58c   : > { %v8539_v27 = vmax.f32 %v3173_v59, 0.0  ;;  %v3151_v23 = vmul.f32 %v8436_v61, %v3073_v62  ;;  %v3075_v4 = vpop.f32.mrb[45].mxu0  ;;  %v8543_v42 = vsel %vm585_vm0, %v3222_v8, %v3224_v9  ;;  %5828 = vmatprep.subr.bf16.mxu0 %v5827_v35 }
 0x58d   : > { %4827 = vmatmul.mubr.msk.f32.gmra.mrb[72].mxu0 %vm8459_vm8, %v8543_v42  ;;  %4933 = vmatmul.mubr.msk.f32.gmra.mrb[68].mxu1 %vm8459_vm8, %v8543_v42 }
 0x58e   : > { %v3174_v19 = vadd.f32 %v8441_v5, %v3151_v23  ;;  %3530 = vmatprep.mubr.f32.mxu0 %v8539_v27  ;;  %4149 = vmatprep.mubr.f32.mxu1 %v8539_v27  ;;  %v3226_v18 = vrot.slane %v8539_v27, 7 }
 0x58f   : > { %v3078_v43 = vpop.f32.mrb[46].mxu0  ;;  %5830 = vmatpush3.bf16.msra.mxu0 %v5827_v35 }
 0x590   : > { %v8561_v57 = vmax.f32 %v3174_v19, 0.0  ;;  %v3152_v28 = vmul.f32 %v8436_v61, %v3078_v43  ;;  %v3080_v2 = vpop.f32.mrb[47].mxu0  ;;  %v8565_v29 = vsel %vm585_vm0, %v3224_v9, %v3226_v18  ;;  %5832 = vmatprep.subr.bf16.mxu0 %v5831_v39 }
 0x591   : > { %3531 = vmatmul.mubr.f32.gmra.mrb[74].mxu0 %v8565_v29  ;;  %4150 = vmatmul.mubr.f32.gmra.mrb[70].mxu1 %v8565_v29 }
 0x592   : > { %v3175_v0 = vadd.f32 %v8441_v5, %v3152_v28  ;;  %3535 = vmatprep.mubr.f32.mxu0 %v8561_v57  ;;  %4154 = vmatprep.mubr.f32.mxu1 %v8561_v57  ;;  %v3228_v24 = vrot.slane %v8561_v57, 7 }
 0x593   : > { %v3083_v44 = vpop.f32.mrb[48].mxu0  ;;  %5834 = vmatpush3.bf16.msra.mxu0 %v5831_v39 }
 0x594   : > { %v8579_v55 = vmax.f32 %v3175_v0, 0.0  ;;  %v3153_v36 = vmul.f32 %v8436_v61, %v3083_v44  ;;  %v3085_v50 = vpop.f32.mrb[49].mxu0  ;;  %v8583_v41 = vsel %vm585_vm0, %v3226_v18, %v3228_v24  ;;  %5836 = vmatprep.subr.bf16.mxu0 %v5835_v3 }
 0x595   : > { %4829 = vmatmul.mubr.msk.f32.gmra.mrb[76].mxu0 %vm8459_vm8, %v8583_v41  ;;  %4935 = vmatmul.mubr.msk.f32.gmra.mrb[72].mxu1 %vm8459_vm8, %v8583_v41 }
 0x596   : > { %v3176_v13 = vadd.f32 %v8441_v5, %v3153_v36  ;;  %3540 = vmatprep.mubr.f32.mxu0 %v8579_v55  ;;  %4159 = vmatprep.mubr.f32.mxu1 %v8579_v55  ;;  %v3230_v47 = vrot.slane %v8579_v55, 7 }
 0x597   : > { %v3088_v15 = vpop.f32.mrb[50].mxu0  ;;  %5838 = vmatpush3.bf16.msra.mxu0 %v5835_v3 }
 0x598   : > { %v8601_v37 = vmax.f32 %v3176_v13, 0.0  ;;  %v3154_v31 = vmul.f32 %v8436_v61, %v3088_v15  ;;  %v3090_v10 = vpop.f32.mrb[51].mxu0  ;;  %v8605_v20 = vsel %vm585_vm0, %v3228_v24, %v3230_v47  ;;  %5840 = vmatprep.subr.bf16.mxu0 %v5839_v21 }
 0x599   : > { %3541 = vmatmul.mubr.f32.gmra.mrb[78].mxu0 %v8605_v20  ;;  %4160 = vmatmul.mubr.f32.gmra.mrb[74].mxu1 %v8605_v20 }
 0x59a   : > { %v3177_v30 = vadd.f32 %v8441_v5, %v3154_v31  ;;  %3545 = vmatprep.mubr.f32.mxu0 %v8601_v37  ;;  %4164 = vmatprep.mubr.f32.mxu1 %v8601_v37  ;;  %v3232_v51 = vrot.slane %v8601_v37, 7 }
 0x59b   : > { %v3093_v58 = vpop.f32.mrb[52].mxu0  ;;  %5842 = vmatpush3.bf16.msra.mxu0 %v5839_v21 }
 0x59c   : > { %v8613_v46 = vmax.f32 %v3177_v30, 0.0  ;;  %v3155_v8 = vmul.f32 %v8436_v61, %v3093_v58  ;;  %v3095_v60 = vpop.f32.mrb[53].mxu0  ;;  %v8617_v16 = vsel %vm585_vm0, %v3230_v47, %v3232_v51  ;;  %5844 = vmatprep.subr.bf16.mxu0 %v5843_v56 }
 0x59d   : > { %4831 = vmatmul.mubr.msk.f32.gmra.mrb[80].mxu0 %vm8459_vm8, %v8617_v16  ;;  %4937 = vmatmul.mubr.msk.f32.gmra.mrb[76].mxu1 %vm8459_vm8, %v8617_v16  ;;  %v3281_v60 = vrot.slane %v8463_v22, 1 }
 0x59e   : > { %v3178_v12 = vadd.f32 %v8441_v5, %v3155_v8  ;;  %3550 = vmatprep.mubr.f32.mxu0 %v8613_v46  ;;  %4169 = vmatprep.mubr.f32.mxu1 %v8613_v46  ;;  %v3234_v35 = vrot.slane %v8613_v46, 7 }
 0x59f   : > { %v3098_v34 = vpop.f32.mrb[54].mxu0 }
 0x5a0   : > { %v8629_v32 = vmax.f32 %v3178_v12, 0.0  ;;  %v3156_v59 = vmul.f32 %v8436_v61, %v3098_v34  ;;  %v3100_v9 = vpop.f32.mrb[55].mxu0  ;;  %v8633_v62 = vsel %vm585_vm0, %v3232_v51, %v3234_v35  ;;  %v3280_v34 = vrot.slane %v8445_v25, 1 }
 0x5a1   : > { %3551 = vmatmul.mubr.f32.gmra.mrb[82].mxu0 %v8633_v62  ;;  %4170 = vmatmul.mubr.f32.gmra.mrb[78].mxu1 %v8633_v62  ;;  %v3345_v9 = vld [vmem:[%s9376_s10 + $0x8] sm:$0xff] }
 0x5a2   : > { %v3179_v23 = vadd.f32 %v8441_v5, %v3156_v59  ;;  %3555 = vmatprep.mubr.f32.mxu0 %v8629_v32  ;;  %4174 = vmatprep.mubr.f32.mxu1 %v8629_v32  ;;  %v3236_v4 = vrot.slane %v8629_v32, 7  ;;  %v3344_v59 = vld [vmem:[%s9376_s10] sm:$0xff] }
 0x5a3   : > { %v3103_v39 = vpop.f32.mrb[56].mxu0 }
 0x5a4   : > { %v8641_v33 = vmax.f32 %v3179_v23, 0.0  ;;  %v3157_v26 = vmul.f32 %v8436_v61, %v3103_v39  ;;  %v3105_v19 = vpop.f32.mrb[57].mxu0  ;;  %v8645_v18 = vsel %vm585_vm0, %v3234_v35, %v3236_v4  ;;  %v3362_v39 = vld [vmem:[%s9376_s10 + $0x90] sm:$0xff] }
 0x5a5   : > { %4833 = vmatmul.mubr.msk.f32.gmra.mrb[84].mxu0 %vm8459_vm8, %v8645_v18  ;;  %4939 = vmatmul.mubr.msk.f32.gmra.mrb[80].mxu1 %vm8459_vm8, %v8645_v18 }
 0x5a6   : > { %v3180_v43 = vadd.f32 %v8441_v5, %v3157_v26  ;;  %3560 = vmatprep.mubr.f32.mxu0 %v8641_v33  ;;  %4179 = vmatprep.mubr.f32.mxu1 %v8641_v33  ;;  %v3238_v28 = vrot.slane %v8641_v33, 7  ;;  %v3363_v26 = vld [vmem:[%s9376_s10 + $0x98] sm:$0xff] }
 0x5a7   : > { %v3108_v2 = vpop.f32.mrb[58].mxu0 }
 0x5a8   : > { %v8657_v3 = vmax.f32 %v3180_v43, 0.0  ;;  %v3158_v45 = vmul.f32 %v8436_v61, %v3108_v2  ;;  %v3110_v1 = vpop.f32.mrb[59].mxu0  ;;  %v8661_v0 = vsel %vm585_vm0, %v3236_v4, %v3238_v28  ;;  %v3283_v4 = vrot.slane %v8482_v7, 1 }
 0x5a9   : > { %3561 = vmatmul.mubr.f32.gmra.mrb[86].mxu0 %v8661_v0  ;;  %4180 = vmatmul.mubr.f32.gmra.mrb[82].mxu1 %v8661_v0  ;;  %v8733_v43 = vsel %vm1093_vm4, %v3280_v34, %v3281_v60  ;;  %v5847_v1 = vpack.c.bf16 %v3363_v26, %v3362_v39  ;;  %v3351_v39 = vld [vmem:[%s9376_s10 + $0x38] sm:$0xff] }
 0x5aa   : > { %v3181_v24 = vadd.f32 %v8441_v5, %v3158_v45  ;;  %3565 = vmatprep.mubr.f32.mxu0 %v8657_v3  ;;  %4184 = vmatprep.mubr.f32.mxu1 %v8657_v3  ;;  %v3240_v44 = vrot.slane %v8657_v3, 7  ;;  %v5845_v45 = vpack.c.bf16 %v3345_v9, %v3344_v59  ;;  %v3293_v59 = vrot.slane %v8579_v55, 1 }
 0x5ab   : > { %v3113_v36 = vpop.f32.mrb[60].mxu0 }
 0x5ac   : > { %v8669_v50 = vmax.f32 %v3181_v24, 0.0  ;;  %v3159_v21 = vmul.f32 %v8436_v61, %v3113_v36  ;;  %v3115_v63 = vpop.f32.mrb[61].mxu0  ;;  %v8673_v53 = vsel %vm585_vm0, %v3238_v28, %v3240_v44  ;;  %v3285_v28 = vrot.slane %v8499_v6, 1  ;;  %v3346_v24 = vld [vmem:[%s9376_s10 + $0x10] sm:$0xff] }
 0x5ad   : > { %4835 = vmatmul.mubr.msk.f32.gmra.mrb[88].mxu0 %vm8459_vm8, %v8673_v53  ;;  %4941 = vmatmul.mubr.msk.f32.gmra.mrb[84].mxu1 %vm8459_vm8, %v8673_v53  ;;  %v8751_v36 = vsel %vm1093_vm4, %v3281_v60, %v3283_v4  ;;  %v3365_v63 = vld [vmem:[%s9376_s10 + $0xa8] sm:$0xff]  ;;  %v3366_v60 = vld [vmem:[%s9376_s10 + $0xb0] sm:$0xff] }
 0x5ae   : > { %v3182_v13 = vadd.f32 %v8441_v5, %v3159_v21  ;;  %3570 = vmatprep.mubr.f32.mxu0 %v8669_v50  ;;  %4189 = vmatprep.mubr.f32.mxu1 %v8669_v50  ;;  %v3242_v47 = vrot.slane %v8669_v50, 7  ;;  %v3364_v21 = vld [vmem:[%s9376_s10 + $0xa0] sm:$0xff] }
 0x5af   : > { %v3118_v15 = vpop.f32.mrb[62].mxu0 }
 0x5b0   : > { %v8685_v31 = vmax.f32 %v3182_v13, 0.0  ;;  %v3160_v10 = vmul.f32 %v8436_v61, %v3118_v15  ;;  %v3120_v56 = vpop.f32.mrb[63].mxu0  ;;  %v8689_v30 = vsel %vm585_vm0, %v3240_v44, %v3242_v47  ;;  %v3347_v44 = vld [vmem:[%s9376_s10 + $0x18] sm:$0xff]  ;;  %v8764_v13 = vsel %vm1093_vm4, %v3283_v4, %v3285_v28  ;;  %v3350_v4 = vld [vmem:[%s9376_s10 + $0x30] sm:$0xff] }
 0x5b1   : > { %3571 = vmatmul.mubr.f32.gmra.mrb[90].mxu0 %v8689_v30  ;;  %4190 = vmatmul.mubr.f32.gmra.mrb[86].mxu1 %v8689_v30  ;;  %v5849_v15 = vpack.c.bf16 %v3347_v44, %v3346_v24  ;;  %v3348_v56 = vld [vmem:[%s9376_s10 + $0x20] sm:$0xff]  ;;  %v3297_v44 = vrot.slane %v8613_v46, 1 }
 0x5b2   : > { %v3183_v51 = vadd.f32 %v8441_v5, %v3160_v10  ;;  %3575 = vmatprep.mubr.f32.mxu0 %v8685_v31  ;;  %4194 = vmatprep.mubr.f32.mxu1 %v8685_v31  ;;  %v3244_v58 = vrot.slane %v8685_v31, 7  ;;  %v3307_v12 = vrot.slane %v8685_v31, 1  ;;  %v5851_v10 = vpack.c.bf16 %v3365_v63, %v3364_v21  ;;  %v3352_v63 = vld [vmem:[%s9376_s10 + $0x40] sm:$0xff] }
 0x5b4   : > { %v8697_v8 = vmax.f32 %v3183_v51, 0.0  ;;  %v3245_v61 = vsel %vm585_vm0, %v3242_v47, %v3244_v58  ;;  %v3289_v47 = vrot.slane %v8539_v27, 1  ;;  %v3349_v51 = vld [vmem:[%s9376_s10 + $0x28] sm:$0xff] }
 0x5b5   : > { %4837 = vmatmul.mubr.msk.f32.gmra.mrb[92].mxu0 %vm8459_vm8, %v3245_v61  ;;  %4943 = vmatmul.mubr.msk.f32.gmra.mrb[88].mxu1 %vm8459_vm8, %v3245_v61  ;;  %v3291_v61 = vrot.slane %v8561_v57, 1  ;;  %v5853_v9 = vpack.c.bf16 %v3349_v51, %v3348_v56  ;;  %v3370_v56 = vld [vmem:[%s9376_s10 + $0xd0] sm:$0xff]  ;;  %v3371_v51 = vld [vmem:[%s9376_s10 + $0xd8] sm:$0xff] }
 0x5b6   : > { %3580 = vmatprep.mubr.f32.mxu0 %v8697_v8  ;;  %4199 = vmatprep.mubr.f32.mxu1 %v8697_v8  ;;  %v3246_v5 = vrot.slane %v8697_v8, 7  ;;  %v3309_v35 = vrot.slane %v8697_v8, 1  ;;  %v8790_v34 = vsel %vm1093_vm4, %v3287_v49, %v3289_v47 }
 0x5b7   : > { %v8802_v26 = vsel %vm1093_vm4, %v3289_v47, %v3291_v61  ;;  %v8815_v24 = vsel %vm1093_vm4, %v3291_v61, %v3293_v59  ;;  %v3353_v47 = vld [vmem:[%s9376_s10 + $0x48] sm:$0xff] }
 0x5b8   : > { %v3247_v23 = vsel %vm585_vm0, %v3244_v58, %v3246_v5  ;;  %v8730_v19 = vsel %vm1093_vm4, %v3307_v12, %v3309_v35  ;;  %v8777_v58 = vsel %vm1093_vm4, %v3285_v28, %v3287_v49  ;;  %v3367_v5 = vld [vmem:[%s9376_s10 + $0xb8] sm:$0xff]  ;;  %v3295_v28 = vrot.slane %v8601_v37, 1 }
 0x5b9   : > { %3581 = vmatmul.mubr.f32.gmra.mrb[94].mxu0 %v3247_v23  ;;  %4200 = vmatmul.mubr.f32.gmra.mrb[90].mxu1 %v3247_v23  ;;  %v5855_v23 = vpack.c.bf16 %v3367_v5, %v3366_v60  ;;  %v5857_v49 = vpack.c.bf16 %v3351_v39, %v3350_v4  ;;  %v3301_v60 = vrot.slane %v8641_v33, 1  ;;  %v5861_v5 = vpack.c.bf16 %v3353_v47, %v3352_v63  ;;  %v3356_v63 = vld [vmem:[%s9376_s10 + $0x60] sm:$0xff]  ;;  %v3357_v47 = vld [vmem:[%s9376_s10 + $0x68] sm:$0xff] }
 0x5ba   : > { %5421 = vmatprep.mubr.f32.mxu0 %v8733_v43  ;;  %4204 = vmatprep.mubr.f32.mxu1 %v9460_v40  ;;  %v8839_v61 = vsel %vm1093_vm4, %v3295_v28, %v3297_v44  ;;  %v3303_v39 = vrot.slane %v8657_v3, 1 }
 0x5bd   : > { %5422 = vmatmul.mubr.msk.f32.vlgmr.msra.gmra.mrb[96].mxu0 %vm8739_vm9, %v8751_v36  ;;  %4205 = vmatmul.mubr.f32.gmra.mrb[92].mxu1 %v9460_v40 }
 0x5be   : > { %5846 = vmatpush3.bf16.msra.mxu0 %v5845_v45  ;;  %5424 = vmatprep.mubr.f32.mxu0 %v8764_v13  ;;  %v3368_v45 = vld [vmem:[%s9376_s10 + $0xc0] sm:$0xff] }
 0x5bf   : > { %5848 = vmatprep.subr.bf16.mxu0 %v5847_v1  ;;  %4209 = vmatprep.mubr.f32.mxu1 %v9460_v40  ;;  %v3369_v1 = vld [vmem:[%s9376_s10 + $0xc8] sm:$0xff] }
 0x5c0   : > { %v5859_v21 = vpack.c.bf16 %v3369_v1, %v3368_v45  ;;  %v3373_v45 = vld [vmem:[%s9376_s10 + $0xe8] sm:$0xff] }
 0x5c1   : > { %5425 = vmatmul.mubr.msk.f32.gmra.mrb[98].mxu0 %vm8739_vm9, %v8777_v58  ;;  %4210 = vmatmul.mubr.f32.gmra.mrb[94].mxu1 %v9460_v40 }
 0x5c2   : > { %5850 = vmatpush3.bf16.msra.mxu0 %v5849_v15  ;;  %5427 = vmatprep.mubr.f32.mxu0 %v8790_v34  ;;  %v8826_v15 = vsel %vm1093_vm4, %v3293_v59, %v3295_v28  ;;  %v5863_v59 = vpack.c.bf16 %v3371_v51, %v3370_v56  ;;  %v3372_v28 = vld [vmem:[%s9376_s10 + $0xe0] sm:$0xff]  ;;  %v8874_v56 = vsel %vm1093_vm4, %v3301_v60, %v3303_v39  ;;  %v3375_v51 = vld [vmem:[%s9376_s10 + $0xf8] sm:$0xff] }
 0x5c3   : > { %5852 = vmatprep.subr.bf16.mxu0 %v5851_v10  ;;  %v3299_v10 = vrot.slane %v8629_v32, 1 }
 0x5c5   : > { %5428 = vmatmul.mubr.msk.f32.gmra.mrb[100].mxu0 %vm8739_vm9, %v8802_v26  ;;  %v8850_v4 = vsel %vm1093_vm4, %v3297_v44, %v3299_v10  ;;  %v8863_v1 = vsel %vm1093_vm4, %v3299_v10, %v3301_v60  ;;  %v3305_v44 = vrot.slane %v8669_v50, 1  ;;  %v3374_v10 = vld [vmem:[%s9376_s10 + $0xf0] sm:$0xff]  ;;  %v5869_v60 = vpack.c.bf16 %v3357_v47, %v3356_v63 }
 0x5c6   : > { %5854 = vmatpush3.bf16.msra.mxu0 %v5853_v9  ;;  %5430 = vmatprep.mubr.f32.mxu0 %v8815_v24  ;;  %v3354_v9 = vld [vmem:[%s9376_s10 + $0x50] sm:$0xff] }
 0x5c7   : > { %5856 = vmatprep.subr.bf16.mxu0 %v5855_v23  ;;  %v3355_v23 = vld [vmem:[%s9376_s10 + $0x58] sm:$0xff]  ;;  %v3382_v47 = vld [vmem:[%s9376_s10 + $0x130] sm:$0xff] }
 0x5c9   : > { %5431 = vmatmul.mubr.msk.f32.gmra.mrb[102].mxu0 %vm8739_vm9, %v8826_v15 }
 0x5ca   : > { %5858 = vmatpush3.bf16.msra.mxu0 %v5857_v49  ;;  %5433 = vmatprep.mubr.f32.mxu0 %v8839_v61  ;;  %v5865_v49 = vpack.c.bf16 %v3355_v23, %v3354_v9  ;;  %v3358_v9 = vld [vmem:[%s9376_s10 + $0x70] sm:$0xff]  ;;  %v3359_v23 = vld [vmem:[%s9376_s10 + $0x78] sm:$0xff] }
 0x5cb   : > { %5860 = vmatprep.subr.bf16.mxu0 %v5859_v21  ;;  %v5867_v21 = vpack.c.bf16 %v3373_v45, %v3372_v28  ;;  %v8898_v28 = vsel %vm1093_vm4, %v3305_v44, %v3307_v12  ;;  %v3377_v45 = vld [vmem:[%s9376_s10 + $0x108] sm:$0xff]  ;;  %v8914_v12 = vsel %vm1093_vm4, %v3309_v35, %v9478_v14  ;;  %v3380_v14 = vld [vmem:[%s9376_s10 + $0x120] sm:$0xff] }
 0x5cc   : > { %v3381_v35 = vld [vmem:[%s9376_s10 + $0x128] sm:$0xff] }
 0x5cd   : > { %5434 = vmatmul.mubr.msk.f32.gmra.mrb[104].mxu0 %vm8739_vm9, %v8850_v4  ;;  %v5883_v63 = vpack.c.bf16 %v3381_v35, %v3380_v14 }
 0x5ce   : > { %5862 = vmatpush3.bf16.msra.mxu0 %v5861_v5  ;;  %5436 = vmatprep.mubr.f32.mxu0 %v8863_v1  ;;  %v8886_v5 = vsel %vm1093_vm4, %v3303_v39, %v3305_v44  ;;  %v3376_v39 = vld [vmem:[%s9376_s10 + $0x100] sm:$0xff]  ;;  %v3378_v44 = vld [vmem:[%s9376_s10 + $0x110] sm:$0xff] }
 0x5cf   : > { %5864 = vmatprep.subr.bf16.mxu0 %v5863_v59  ;;  %v5871_v59 = vpack.c.bf16 %v3375_v51, %v3374_v10  ;;  %v5875_v31 = vpack.c.bf16 %v3377_v45, %v3376_v39  ;;  %v3383_v10 = vld [vmem:[%s9376_s10 + $0x138] sm:$0xff]  ;;  %v3389_v39 = vld [vmem:[%s9376_s10 + $0x168] sm:$0xff] }
 0x5d0   : > { %v5887_v51 = vpack.c.bf16 %v3383_v10, %v3382_v47  ;;  %v3391_v45 = vld [vmem:[%s9376_s10 + $0x178] sm:$0xff] }
 0x5d1   : > { %5437 = vmatmul.mubr.msk.f32.gmra.mrb[106].mxu0 %vm8739_vm9, %v8874_v56 }
 0x5d2   : > { %5866 = vmatpush3.bf16.msra.mxu0 %v5865_v49  ;;  %5439 = vmatprep.mubr.f32.mxu0 %v8886_v5  ;;  %v5873_v49 = vpack.c.bf16 %v3359_v23, %v3358_v9  ;;  %v3386_v9 = vld [vmem:[%s9376_s10 + $0x150] sm:$0xff]  ;;  %v3387_v23 = vld [vmem:[%s9376_s10 + $0x158] sm:$0xff] }
 0x5d3   : > { %5868 = vmatprep.subr.bf16.mxu0 %v5867_v21  ;;  %v3379_v21 = vld [vmem:[%s9376_s10 + $0x118] sm:$0xff] }
 0x5d4   : > { %v5879_v8 = vpack.c.bf16 %v3379_v21, %v3378_v44 }
 0x5d5   : > { %5440 = vmatmul.mubr.msk.f32.gmra.mrb[108].mxu0 %vm8739_vm9, %v8898_v28 }
 0x5d6   : > { %5870 = vmatpush3.bf16.msra.mxu0 %v5869_v60  ;;  %5442 = vmatprep.mubr.f32.mxu0 %v8730_v19  ;;  %v3384_v60 = vld [vmem:[%s9376_s10 + $0x140] sm:$0xff] }
 0x5d7   : > { %5872 = vmatprep.subr.bf16.mxu0 %v5871_v59  ;;  %v3385_v59 = vld [vmem:[%s9376_s10 + $0x148] sm:$0xff] }
 0x5d9   : > { %5443 = vmatmul.mubr.msk.f32.gmra.mrb[110].mxu0 %vm8739_vm9, %v8914_v12 }
 0x5da   : > { %5874 = vmatpush3.bf16.msra.mxu0 %v5873_v49  ;;  %3795 = vmatprep.mubr.f32.mxu0 %v9460_v40  ;;  %v4915_v49 = vld [vmem:[%s9376_s10 + $0x408] sm:$0xff] }
 0x5db   : > { %5876 = vmatprep.subr.bf16.mxu0 %v5875_v31 }
 0x5dd   : > { %3796 = vmatmul.mubr.f32.vlgmr.msra.gmra.mrb[112].mxu0 %v9460_v40 }
 0x5de   : > { %5878 = vmatpush3.bf16.msra.mxu0 %v5875_v31  ;;  %3800 = vmatprep.mubr.f32.mxu0 %v9460_v40 }
 0x5df   : > { %5880 = vmatprep.subr.bf16.mxu0 %v5879_v8 }
 0x5e1   : > { %3801 = vmatmul.mubr.f32.gmra.mrb[114].mxu0 %v9460_v40 }
 0x5e2   : > { %3805 = vmatprep.mubr.f32.mxu0 %v8445_v25  ;;  %5882 = vmatpush3.bf16.msra.mxu0 %v5879_v8  ;;  %v5891_v25 = vpack.c.bf16 %v3385_v59, %v3384_v60 }
 0x5e3   : > { %5884 = vmatprep.subr.bf16.mxu0 %v5883_v63 }
 0x5e5   : > { %4855 = vmatmul.mubr.msk.f32.gmra.mrb[116].mxu0 %vm8459_vm8, %v8468_v54  ;;  %v5895_v54 = vpack.c.bf16 %v3387_v23, %v3386_v9 }
 0x5e6   : > { %3810 = vmatprep.mubr.f32.mxu0 %v8463_v22  ;;  %5886 = vmatpush3.bf16.msra.mxu0 %v5883_v63  ;;  %v3388_v22 = vld [vmem:[%s9376_s10 + $0x160] sm:$0xff] }
 0x5e7   : > { %5888 = vmatprep.subr.bf16.mxu0 %v5887_v51 }
 0x5e9   : > { %3811 = vmatmul.mubr.f32.gmra.mrb[118].mxu0 %v8486_v38  ;;  %v3390_v38 = vld [vmem:[%s9376_s10 + $0x170] sm:$0xff] }
 0x5ea   : > { %3815 = vmatprep.mubr.f32.mxu0 %v8482_v7  ;;  %5890 = vmatpush3.bf16.msra.mxu0 %v5887_v51  ;;  %v5899_v7 = vpack.c.bf16 %v3389_v39, %v3388_v22 }
 0x5eb   : > { %5892 = vmatprep.subr.bf16.mxu0 %v5891_v25 }
 0x5ed   : > { %4857 = vmatmul.mubr.msk.f32.gmra.mrb[120].mxu0 %vm8459_vm8, %v8503_v48  ;;  %v5903_v48 = vpack.c.bf16 %v3391_v45, %v3390_v38 }
 0x5ee   : > { %3820 = vmatprep.mubr.f32.mxu0 %v8499_v6  ;;  %5894 = vmatpush3.bf16.msra.mxu0 %v5891_v25  ;;  %v4914_v6 = vld [vmem:[%s9376_s10 + $0x400] sm:$0xff] }
 0x5ef   : > { %5896 = vmatprep.subr.bf16.mxu0 %v5895_v54 }
 0x5f1   : > { %3821 = vmatmul.mubr.f32.gmra.mrb[122].mxu0 %v8525_v52  ;;  %v4916_v52 = vld [vmem:[%s9376_s10 + $0x410] sm:$0xff] }
 0x5f2   : > { %3825 = vmatprep.mubr.f32.mxu0 %v8521_v17  ;;  %5898 = vmatpush3.bf16.msra.mxu0 %v5895_v54  ;;  %v5939_v17 = vpack.c.bf16 %v4915_v49, %v4914_v6 }
 0x5f3   : > { %5900 = vmatprep.subr.bf16.mxu0 %v5899_v7 }
 0x5f5   : > { %4859 = vmatmul.mubr.msk.f32.gmra.mrb[124].mxu0 %vm8459_vm8, %v8543_v42 }
 0x5f6   : > { %3830 = vmatprep.mubr.f32.mxu0 %v8539_v27  ;;  %5902 = vmatpush3.bf16.msra.mxu0 %v5899_v7  ;;  %v4917_v27 = vld [vmem:[%s9376_s10 + $0x418] sm:$0xff] }
 0x5f7   : > { %5904 = vmatprep.subr.bf16.mxu0 %v5903_v48  ;;  %v5943_v42 = vpack.c.bf16 %v4917_v27, %v4916_v52 }
 0x5f9   : > { %3831 = vmatmul.mubr.f32.gmra.mrb[126].mxu0 %v8565_v29 }
 0x5fa   : > { %3835 = vmatprep.mubr.f32.mxu0 %v8561_v57  ;;  %5906 = vmatpush3.bf16.msra.mxu0 %v5903_v48  ;;  %v4919_v57 = vld [vmem:[%s9376_s10 + $0x428] sm:$0xff] }
 0x5fb   : > { %5940 = vmatprep.subr.bf16.mxu0 %v5939_v17  ;;  %v5947_v29 = vpack.c.bf16 %v4919_v57, %v4918_v11 }
 0x5fd   : > { %4861 = vmatmul.mubr.msk.f32.gmra.mrb[128].mxu0 %vm8459_vm8, %v8583_v41  ;;  %v4921_v41 = vld [vmem:[%s9376_s10 + $0x438] sm:$0xff] }
 0x5fe   : > { %3840 = vmatprep.mubr.f32.mxu0 %v8579_v55  ;;  %v4920_v55 = vld [vmem:[%s9376_s10 + $0x430] sm:$0xff] }
 0x601   : > { %3841 = vmatmul.mubr.f32.gmra.mrb[130].mxu0 %v8605_v20  ;;  %v4922_v20 = vld [vmem:[%s9376_s10 + $0x440] sm:$0xff] }
 0x602   : > { %3845 = vmatprep.mubr.f32.mxu0 %v8601_v37  ;;  %v5951_v37 = vpack.c.bf16 %v4921_v41, %v4920_v55 }
 0x605   : > { %4863 = vmatmul.mubr.msk.f32.gmra.mrb[132].mxu0 %vm8459_vm8, %v8617_v16 }
 0x606   : > { %3850 = vmatprep.mubr.f32.mxu0 %v8613_v46  ;;  %v4923_v46 = vld [vmem:[%s9376_s10 + $0x448] sm:$0xff] }
 0x607   : > { %v5955_v16 = vpack.c.bf16 %v4923_v46, %v4922_v20 }
 0x609   : > { %3851 = vmatmul.mubr.f32.gmra.mrb[134].mxu0 %v8633_v62  ;;  %v4925_v62 = vld [vmem:[%s9376_s10 + $0x458] sm:$0xff] }
 0x60a   : > { %3855 = vmatprep.mubr.f32.mxu0 %v8629_v32  ;;  %v4924_v32 = vld [vmem:[%s9376_s10 + $0x450] sm:$0xff] }
 0x60d   : > { %4865 = vmatmul.mubr.msk.f32.gmra.mrb[136].mxu0 %vm8459_vm8, %v8645_v18  ;;  %v4926_v18 = vld [vmem:[%s9376_s10 + $0x460] sm:$0xff] }
 0x60e   : > { %3860 = vmatprep.mubr.f32.mxu0 %v8641_v33  ;;  %v5959_v33 = vpack.c.bf16 %v4925_v62, %v4924_v32 }
 0x611   : > { %3861 = vmatmul.mubr.f32.gmra.mrb[138].mxu0 %v8661_v0 }
 0x612   : > { %3865 = vmatprep.mubr.f32.mxu0 %v8657_v3  ;;  %v4927_v3 = vld [vmem:[%s9376_s10 + $0x468] sm:$0xff] }
 0x613   : > { %v5963_v0 = vpack.c.bf16 %v4927_v3, %v4926_v18 }
 0x615   : > { %4867 = vmatmul.mubr.msk.f32.gmra.mrb[140].mxu0 %vm8459_vm8, %v8673_v53  ;;  %v4929_v53 = vld [vmem:[%s9376_s10 + $0x478] sm:$0xff] }
 0x616   : > { %3870 = vmatprep.mubr.f32.mxu0 %v8669_v50  ;;  %v4928_v50 = vld [vmem:[%s9376_s10 + $0x470] sm:$0xff] }
 0x619   : > { %3871 = vmatmul.mubr.f32.gmra.mrb[142].mxu0 %v8689_v30  ;;  %v5967_v30 = vpack.c.bf16 %v4929_v53, %v4928_v50 }
 0x61a   : > { %5477 = vmatprep.mubr.f32.mxu0 %v9460_v40 }
 0x61d   : > { %5478 = vmatmul.mubr.f32.vlgmr.msra.gmra.mrb[96].mxu0 %v9460_v40 }
 0x61e   : > { %5942 = vmatpush3.bf16.msra.mxu0 %v5939_v17  ;;  %5480 = vmatprep.mubr.f32.mxu0 %v8733_v43 }
 0x61f   : > { %5944 = vmatprep.subr.bf16.mxu0 %v5943_v42 }
 0x621   : > { %5481 = vmatmul.mubr.msk.f32.gmra.mrb[98].mxu0 %vm8739_vm9, %v8751_v36 }
 0x622   : > { %5946 = vmatpush3.bf16.msra.mxu0 %v5943_v42  ;;  %5483 = vmatprep.mubr.f32.mxu0 %v8764_v13 }
 0x623   : > { %5948 = vmatprep.subr.bf16.mxu0 %v5947_v29 }
 0x625   : > { %5484 = vmatmul.mubr.msk.f32.gmra.mrb[100].mxu0 %vm8739_vm9, %v8777_v58 }
 0x626   : > { %5950 = vmatpush3.bf16.msra.mxu0 %v5947_v29  ;;  %5486 = vmatprep.mubr.f32.mxu0 %v8790_v34 }
 0x627   : > { %5952 = vmatprep.subr.bf16.mxu0 %v5951_v37 }
 0x629   : > { %5487 = vmatmul.mubr.msk.f32.gmra.mrb[102].mxu0 %vm8739_vm9, %v8802_v26 }
 0x62a   : > { %5954 = vmatpush3.bf16.msra.mxu0 %v5951_v37  ;;  %5489 = vmatprep.mubr.f32.mxu0 %v8815_v24 }
 0x62b   : > { %5956 = vmatprep.subr.bf16.mxu0 %v5955_v16 }
 0x62d   : > { %5490 = vmatmul.mubr.msk.f32.gmra.mrb[104].mxu0 %vm8739_vm9, %v8826_v15 }
 0x62e   : > { %5958 = vmatpush3.bf16.msra.mxu0 %v5955_v16  ;;  %5492 = vmatprep.mubr.f32.mxu0 %v8839_v61 }
 0x62f   : > { %5960 = vmatprep.subr.bf16.mxu0 %v5959_v33 }
 0x631   : > { %5493 = vmatmul.mubr.msk.f32.gmra.mrb[106].mxu0 %vm8739_vm9, %v8850_v4 }
 0x632   : > { %5962 = vmatpush3.bf16.msra.mxu0 %v5959_v33  ;;  %5495 = vmatprep.mubr.f32.mxu0 %v8863_v1 }
 0x633   : > { %5964 = vmatprep.subr.bf16.mxu0 %v5963_v0 }
 0x635   : > { %5496 = vmatmul.mubr.msk.f32.gmra.mrb[108].mxu0 %vm8739_vm9, %v8874_v56 }
 0x636   : > { %5966 = vmatpush3.bf16.msra.mxu0 %v5963_v0  ;;  %5498 = vmatprep.mubr.f32.mxu0 %v8886_v5 }
 0x637   : > { %5968 = vmatprep.subr.bf16.mxu0 %v5967_v30 }
 0x639   : > { %5499 = vmatmul.mubr.msk.f32.gmra.mrb[110].mxu0 %vm8739_vm9, %v8898_v28 }
 0x63a   : > { %5970 = vmatpush3.bf16.msra.mxu0 %v5967_v30  ;;  %5533 = vmatprep.mubr.f32.mxu0 %v8764_v13 }
 0x63d   : > { %5534 = vmatmul.mubr.msk.f32.vlgmr.msra.gmra.mrb[96].mxu0 %vm8739_vm9, %v8777_v58 }
 0x63e   : > { %5536 = vmatprep.mubr.f32.mxu0 %v8790_v34 }
 0x641   : > { %5537 = vmatmul.mubr.msk.f32.gmra.mrb[98].mxu0 %vm8739_vm9, %v8802_v26 }
 0x642   : > { %5539 = vmatprep.mubr.f32.mxu0 %v8815_v24 }
 0x645   : > { %5540 = vmatmul.mubr.msk.f32.gmra.mrb[100].mxu0 %vm8739_vm9, %v8826_v15 }
 0x646   : > { %5542 = vmatprep.mubr.f32.mxu0 %v8839_v61 }
 0x649   : > { %5543 = vmatmul.mubr.msk.f32.gmra.mrb[102].mxu0 %vm8739_vm9, %v8850_v4 }
 0x64a   : > { %5545 = vmatprep.mubr.f32.mxu0 %v8863_v1 }
 0x64d   : > { %5546 = vmatmul.mubr.msk.f32.gmra.mrb[104].mxu0 %vm8739_vm9, %v8874_v56 }
 0x64e   : > { %5548 = vmatprep.mubr.f32.mxu0 %v8886_v5 }
 0x650   : > { %v5033_v43 = vpop.f32.mrb[64].mxu0 }
 0x651   : > { %v5034_v36 = vpop.f32.mrb[65].mxu0  ;;  %5549 = vmatmul.mubr.msk.f32.gmra.mrb[106].mxu0 %vm8739_vm9, %v8898_v28 }
 0x652   : > { %v9109_v13 = vadd.f32 %v5034_v36, %v5033_v43  ;;  %5551 = vmatprep.mubr.f32.mxu0 %v8730_v19 }
 0x654   : > { %v5036_v58 = vpop.f32.mrb[66].mxu0 }
 0x655   : > { %v5037_v34 = vpop.f32.mrb[67].mxu0  ;;  %5552 = vmatmul.mubr.msk.f32.gmra.mrb[108].mxu0 %vm8739_vm9, %v8914_v12 }
 0x656   : > { %v9115_v26 = vadd.f32 %v5037_v34, %v5036_v58  ;;  %5554 = vmatprep.mubr.f32.mxu0 %v9460_v40 }
 0x658   : > { %v5039_v24 = vpop.f32.mrb[68].mxu0  ;;  %v5257_v15 = vpop.f32.mrb[64].mxu1 }
 0x659   : > { %v5040_v61 = vpop.f32.mrb[69].mxu0  ;;  %v5258_v4 = vpop.f32.mrb[65].mxu1  ;;  %5555 = vmatmul.mubr.f32.gmra.mrb[110].mxu0 %v9460_v40 }
 0x65a   : > { %v9119_v1 = vadd.f32 %v5040_v61, %v5039_v24  ;;  %v9121_v56 = vadd.f32 %v5258_v4, %v5257_v15 }
 0x65c   : > { %v5042_v19 = vpop.f32.mrb[70].mxu0  ;;  %v5260_v5 = vpop.f32.mrb[66].mxu1 }
 0x65d   : > { %v5043_v28 = vpop.f32.mrb[71].mxu0  ;;  %v5261_v31 = vpop.f32.mrb[67].mxu1 }
 0x65e   : > { %v9123_v2 = vadd.f32 %v5043_v28, %v5042_v19  ;;  %v9125_v12 = vadd.f32 %v5261_v31, %v5260_v5 }
 0x660   : > { %v5045_v44 = vpop.f32.mrb[72].mxu0  ;;  %v5263_v21 = vpop.f32.mrb[68].mxu1 }
 0x661   : > { %v5046_v8 = vpop.f32.mrb[73].mxu0  ;;  %v5264_v14 = vpop.f32.mrb[69].mxu1 }
 0x662   : > { %v9127_v35 = vadd.f32 %v5046_v8, %v5045_v44  ;;  %v9129_v63 = vadd.f32 %v5264_v14, %v5263_v21 }
 0x664   : > { %v5048_v40 = vpop.f32.mrb[74].mxu0  ;;  %v5266_v47 = vpop.f32.mrb[70].mxu1 }
 0x665   : > { %v5049_v10 = vpop.f32.mrb[75].mxu0  ;;  %v5267_v51 = vpop.f32.mrb[71].mxu1 }
 0x666   : > { %v9131_v60 = vadd.f32 %v5049_v10, %v5048_v40  ;;  %v9133_v59 = vadd.f32 %v5267_v51, %v5266_v47 }
 0x668   : > { %v5051_v25 = vpop.f32.mrb[76].mxu0  ;;  %v5269_v9 = vpop.f32.mrb[72].mxu1 }
 0x669   : > { %v5052_v23 = vpop.f32.mrb[77].mxu0  ;;  %v5270_v54 = vpop.f32.mrb[73].mxu1 }
 0x66a   : > { %v9135_v22 = vadd.f32 %v5052_v23, %v5051_v25  ;;  %v9137_v39 = vadd.f32 %v5270_v54, %v5269_v9 }
 0x66c   : > { %v5054_v7 = vpop.f32.mrb[78].mxu0  ;;  %v5272_v38 = vpop.f32.mrb[74].mxu1 }
 0x66d   : > { %v5055_v45 = vpop.f32.mrb[79].mxu0  ;;  %v5273_v48 = vpop.f32.mrb[75].mxu1 }
 0x66e   : > { %v9139_v6 = vadd.f32 %v5055_v45, %v5054_v7  ;;  %v9141_v49 = vadd.f32 %v5273_v48, %v5272_v38 }
 0x670   : > { %v5057_v17 = vpop.f32.mrb[80].mxu0  ;;  %v5275_v52 = vpop.f32.mrb[76].mxu1 }
 0x671   : > { %v5058_v27 = vpop.f32.mrb[81].mxu0  ;;  %v5276_v42 = vpop.f32.mrb[77].mxu1 }
 0x672   : > { %v9143_v11 = vadd.f32 %v5058_v27, %v5057_v17  ;;  %v9145_v57 = vadd.f32 %v5276_v42, %v5275_v52 }
 0x674   : > { %v5060_v29 = vpop.f32.mrb[82].mxu0  ;;  %v5278_v55 = vpop.f32.mrb[78].mxu1 }
 0x675   : > { %v5061_v41 = vpop.f32.mrb[83].mxu0  ;;  %v5279_v37 = vpop.f32.mrb[79].mxu1 }
 0x676   : > { %v9147_v20 = vadd.f32 %v5061_v41, %v5060_v29  ;;  %v9149_v46 = vadd.f32 %v5279_v37, %v5278_v55 }
 0x678   : > { %v5063_v16 = vpop.f32.mrb[84].mxu0  ;;  %v5281_v32 = vpop.f32.mrb[80].mxu1 }
 0x679   : > { %v5064_v62 = vpop.f32.mrb[85].mxu0  ;;  %v5282_v33 = vpop.f32.mrb[81].mxu1 }
 0x67a   : > { %v9151_v18 = vadd.f32 %v5064_v62, %v5063_v16  ;;  %v9153_v3 = vadd.f32 %v5282_v33, %v5281_v32 }
 0x67c   : > { %v5066_v0 = vpop.f32.mrb[86].mxu0  ;;  %v5284_v50 = vpop.f32.mrb[82].mxu1 }
 0x67d   : > { %v5067_v53 = vpop.f32.mrb[87].mxu0  ;;  %v5285_v30 = vpop.f32.mrb[83].mxu1 }
 0x67e   : > { %v9155_v43 = vadd.f32 %v5067_v53, %v5066_v0  ;;  %v9157_v36 = vadd.f32 %v5285_v30, %v5284_v50 }
 0x680   : > { %v5069_v58 = vpop.f32.mrb[88].mxu0  ;;  %v5287_v34 = vpop.f32.mrb[84].mxu1 }
 0x681   : > { %v5070_v24 = vpop.f32.mrb[89].mxu0  ;;  %v5288_v15 = vpop.f32.mrb[85].mxu1 }
 0x682   : > { %v9159_v61 = vadd.f32 %v5070_v24, %v5069_v58  ;;  %v9161_v4 = vadd.f32 %v5288_v15, %v5287_v34 }
 0x684   : > { %v5072_v19 = vpop.f32.mrb[90].mxu0  ;;  %v5290_v5 = vpop.f32.mrb[86].mxu1 }
 0x685   : > { %v5073_v28 = vpop.f32.mrb[91].mxu0  ;;  %v5291_v31 = vpop.f32.mrb[87].mxu1 }
 0x686   : > { %v9163_v44 = vadd.f32 %v5073_v28, %v5072_v19  ;;  %v9165_v21 = vadd.f32 %v5291_v31, %v5290_v5 }
 0x688   : > { %v5075_v8 = vpop.f32.mrb[92].mxu0  ;;  %v5293_v14 = vpop.f32.mrb[88].mxu1 }
 0x689   : > { %v5076_v40 = vpop.f32.mrb[93].mxu0  ;;  %v5294_v47 = vpop.f32.mrb[89].mxu1 }
 0x68a   : > { %v9167_v10 = vadd.f32 %v5076_v40, %v5075_v8  ;;  %v9169_v51 = vadd.f32 %v5294_v47, %v5293_v14 }
 0x68c   : > { %v5078_v25 = vpop.f32.mrb[94].mxu0  ;;  %v5296_v9 = vpop.f32.mrb[90].mxu1 }
 0x68d   : > { %v5079_v23 = vpop.f32.mrb[95].mxu0  ;;  %v5297_v54 = vpop.f32.mrb[91].mxu1 }
 0x68e   : > { %v9171_v7 = vadd.f32 %v5079_v23, %v5078_v25  ;;  %v9173_v38 = vadd.f32 %v5297_v54, %v5296_v9 }
 0x690   : > { %v5299_v45 = vpop.f32.mrb[92].mxu1 }
 0x691   : > { %v5300_v48 = vpop.f32.mrb[93].mxu1 }
 0x692   : > { %v9175_v17 = vadd.f32 %v5300_v48, %v5299_v45 }
 0x694   : > { %v5302_v52 = vpop.f32.mrb[94].mxu1 }
 0x695   : > { %v5303_v27 = vpop.f32.mrb[95].mxu1 }
 0x696   : > { %v9177_v42 = vadd.f32 %v5303_v27, %v5302_v52 }
 0x6b0   : > { %v5145_v29 = vpop.f32.mrb[112].mxu0 }
 0x6b1   : > { %v5146_v55 = vpop.f32.mrb[113].mxu0 }
 0x6b2   : > { %v5147_v41 = vadd.f32 %v5146_v55, %v5145_v29 }
 0x6b4   : > { %v5974_v37 = vadd.f32 %v5147_v41, %v9109_v13  ;;  %v5148_v16 = vpop.f32.mrb[114].mxu0 }
 0x6b5   : > { %v5149_v32 = vpop.f32.mrb[115].mxu0 }
 0x6b6   : > { %v5150_v62 = vadd.f32 %v5149_v32, %v5148_v16  ;;  %v9181_v33 = vadd.f32 %v5974_v37, %v9121_v56 }
 0x6b8   : > { %v5971_v0 = vadd.f32 %v5150_v62, %v9115_v26  ;;  %v5151_v50 = vpop.f32.mrb[116].mxu0 }
 0x6b9   : > { %v5152_v53 = vpop.f32.mrb[117].mxu0 }
 0x6ba   : > { %v5153_v30 = vadd.f32 %v5152_v53, %v5151_v50  ;;  %v9185_v58 = vadd.f32 %v5971_v0, %v9125_v12 }
 0x6bc   : > { %v5980_v34 = vadd.f32 %v5153_v30, %v9119_v1  ;;  %v5154_v24 = vpop.f32.mrb[118].mxu0 }
 0x6bd   : > { %v5155_v15 = vpop.f32.mrb[119].mxu0 }
 0x6be   : > { %v5156_v19 = vadd.f32 %v5155_v15, %v5154_v24  ;;  %v9189_v13 = vadd.f32 %v5980_v34, %v9129_v63 }
 0x6c0   : > { %v5977_v5 = vadd.f32 %v5156_v19, %v9123_v2  ;;  %v5157_v56 = vpop.f32.mrb[120].mxu0 }
 0x6c1   : > { %v5158_v28 = vpop.f32.mrb[121].mxu0 }
 0x6c2   : > { %v5159_v31 = vadd.f32 %v5158_v28, %v5157_v56  ;;  %v9193_v26 = vadd.f32 %v5977_v5, %v9133_v59 }
 0x6c4   : > { %v5986_v8 = vadd.f32 %v5159_v31, %v9127_v35  ;;  %v5160_v12 = vpop.f32.mrb[122].mxu0 }
 0x6c5   : > { %v5161_v14 = vpop.f32.mrb[123].mxu0 }
 0x6c6   : > { %v5162_v40 = vadd.f32 %v5161_v14, %v5160_v12  ;;  %v9197_v1 = vadd.f32 %v5986_v8, %v9137_v39 }
 0x6c8   : > { %v5983_v47 = vadd.f32 %v5162_v40, %v9131_v60  ;;  %v5163_v63 = vpop.f32.mrb[124].mxu0 }
 0x6c9   : > { %v5164_v25 = vpop.f32.mrb[125].mxu0 }
 0x6ca   : > { %v5165_v9 = vadd.f32 %v5164_v25, %v5163_v63  ;;  %v9201_v2 = vadd.f32 %v5983_v47, %v9141_v49 }
 0x6cc   : > { %v5992_v23 = vadd.f32 %v5165_v9, %v9135_v22  ;;  %v5166_v59 = vpop.f32.mrb[126].mxu0 }
 0x6cd   : > { %v5167_v54 = vpop.f32.mrb[127].mxu0 }
 0x6ce   : > { %v5168_v45 = vadd.f32 %v5167_v54, %v5166_v59  ;;  %v9205_v35 = vadd.f32 %v5992_v23, %v9145_v57 }
 0x6d0   : > { %v5989_v48 = vadd.f32 %v5168_v45, %v9139_v6  ;;  %v5169_v39 = vpop.f32.mrb[128].mxu0 }
 0x6d1   : > { %v5170_v52 = vpop.f32.mrb[129].mxu0 }
 0x6d2   : > { %v5171_v27 = vadd.f32 %v5170_v52, %v5169_v39  ;;  %v9209_v60 = vadd.f32 %v5989_v48, %v9149_v46 }
 0x6d4   : > { %v5998_v29 = vadd.f32 %v5171_v27, %v9143_v11  ;;  %v5172_v49 = vpop.f32.mrb[130].mxu0 }
 0x6d5   : > { %v5173_v55 = vpop.f32.mrb[131].mxu0 }
 0x6d6   : > { %v5174_v41 = vadd.f32 %v5173_v55, %v5172_v49  ;;  %v9213_v22 = vadd.f32 %v5998_v29, %v9153_v3 }
 0x6d8   : > { %v5995_v37 = vadd.f32 %v5174_v41, %v9147_v20  ;;  %v5175_v57 = vpop.f32.mrb[132].mxu0 }
 0x6d9   : > { %v5176_v16 = vpop.f32.mrb[133].mxu0 }
 0x6da   : > { %v5177_v32 = vadd.f32 %v5176_v16, %v5175_v57  ;;  %v9217_v6 = vadd.f32 %v5995_v37, %v9157_v36 }
 0x6dc   : > { %v6004_v62 = vadd.f32 %v5177_v32, %v9151_v18  ;;  %v5178_v46 = vpop.f32.mrb[134].mxu0 }
 0x6dd   : > { %v5179_v0 = vpop.f32.mrb[135].mxu0 }
 0x6de   : > { %v5180_v50 = vadd.f32 %v5179_v0, %v5178_v46  ;;  %v9221_v11 = vadd.f32 %v6004_v62, %v9161_v4 }
 0x6e0   : > { %v6001_v53 = vadd.f32 %v5180_v50, %v9155_v43  ;;  %v5181_v3 = vpop.f32.mrb[136].mxu0 }
 0x6e1   : > { %v5182_v30 = vpop.f32.mrb[137].mxu0 }
 0x6e2   : > { %v5183_v34 = vadd.f32 %v5182_v30, %v5181_v3  ;;  %v9225_v20 = vadd.f32 %v6001_v53, %v9165_v21 }
 0x6e4   : > { %v6010_v24 = vadd.f32 %v5183_v34, %v9159_v61  ;;  %v5184_v36 = vpop.f32.mrb[138].mxu0 }
 0x6e5   : > { %v5185_v15 = vpop.f32.mrb[139].mxu0 }
 0x6e6   : > { %v5186_v19 = vadd.f32 %v5185_v15, %v5184_v36  ;;  %v9229_v18 = vadd.f32 %v6010_v24, %v9169_v51 }
 0x6e8   : > { %v6007_v5 = vadd.f32 %v5186_v19, %v9163_v44  ;;  %v5187_v4 = vpop.f32.mrb[140].mxu0 }
 0x6e9   : > { %v5188_v56 = vpop.f32.mrb[141].mxu0 }
 0x6ea   : > { %v5189_v28 = vadd.f32 %v5188_v56, %v5187_v4  ;;  %v9233_v43 = vadd.f32 %v6007_v5, %v9173_v38  ;;  %v9246_v38 = vld [vmem:[%s9377_s11] ss:$0 sm:$0xff] }
 0x6ec   : > { %v6016_v31 = vadd.f32 %v5189_v28, %v9167_v10  ;;  %v5190_v21 = vpop.f32.mrb[142].mxu0 }
 0x6ed   : > { %v5191_v8 = vpop.f32.mrb[143].mxu0 }
 0x6ee   : > { %v5192_v61 = vadd.f32 %v5191_v8, %v5190_v21  ;;  %v9237_v12 = vadd.f32 %v6016_v31, %v9175_v17 }
 0x6f0   : > { %v6013_v51 = vadd.f32 %v5192_v61, %v9171_v7  ;;  %v9254_v7 = vld [vmem:[%s9378_s12] ss:$0 sm:$0xff] }
 0x6f2   : > { %v9241_v14 = vadd.f32 %v6013_v51, %v9177_v42 }
 0x710   : > { %v5535_v44 = vpop.f32.mrb[96].mxu0 }
 0x711   : > { %v5973_v10 = vadd.f32 %v9185_v58, %v5535_v44  ;;  %v4281_v40 = vpop.f32.mrb[97].mxu0 }
 0x712   : > { %v5976_v47 = vadd.f32 %v9181_v33, %v4281_v40 }
 0x713   : > { %v4384_v17 = vmul.f32 %v5973_v10, %v9246_v38 }
 0x714   : > { %v4383_v42 = vmul.f32 %v5976_v47, %v9246_v38  ;;  %v5538_v63 = vpop.f32.mrb[98].mxu0 }
 0x715   : > { %v5979_v25 = vadd.f32 %v9193_v26, %v5538_v63  ;;  %v4291_v9 = vpop.f32.mrb[99].mxu0  ;;  %v4407_v23 = vadd.f32 %v9254_v7, %v4384_v17 }
 0x716   : > { %v5982_v58 = vadd.f32 %v9189_v13, %v4291_v9  ;;  %v4406_v59 = vadd.f32 %v9254_v7, %v4383_v42 }
 0x717   : > { %v4386_v33 = vmul.f32 %v5979_v25, %v9246_v38  ;;  %v4423_v27 = vmax.f32 %v4407_v23, 0.0 }
 0x718   : > { %v4385_v54 = vmul.f32 %v5982_v58, %v9246_v38  ;;  %v5541_v45 = vpop.f32.mrb[100].mxu0  ;;  %v4422_v55 = vmax.f32 %v4406_v59, 0.0 }
 0x719   : > { %v4409_v48 = vadd.f32 %v9254_v7, %v4386_v33  ;;  %v5985_v39 = vadd.f32 %v9201_v2, %v5541_v45  ;;  %v4301_v26 = vpop.f32.mrb[101].mxu0 }
 0x71a   : > { %v4408_v52 = vadd.f32 %v9254_v7, %v4385_v54  ;;  %v5988_v13 = vadd.f32 %v9197_v1, %v4301_v26 }
 0x71b   : > { %v4425_v29 = vmax.f32 %v4409_v48, 0.0  ;;  %v4388_v49 = vmul.f32 %v5985_v39, %v9246_v38 }
 0x71c   : > { %v4424_v41 = vmax.f32 %v4408_v52, 0.0  ;;  %v4387_v37 = vmul.f32 %v5988_v13, %v9246_v38  ;;  %v5544_v57 = vpop.f32.mrb[102].mxu0 }
 0x71d   : > { %v4439_v16 = vmax.f32 %v4423_v27, %v4425_v29  ;;  %v5991_v32 = vadd.f32 %v9209_v60, %v5544_v57  ;;  %v4311_v62 = vpop.f32.mrb[103].mxu0  ;;  %v4411_v1 = vadd.f32 %v9254_v7, %v4388_v49 }
 0x71e   : > { %v4438_v46 = vmax.f32 %v4422_v55, %v4424_v41  ;;  %v5994_v2 = vadd.f32 %v9205_v35, %v4311_v62  ;;  %v4410_v50 = vadd.f32 %v9254_v7, %v4387_v37 }
 0x71f   : > { %4447 = vst [vmem:[%s9274_s17 + $0x8] sm:$0xff] %v4439_v16  ;;  %v4390_v0 = vmul.f32 %v5991_v32, %v9246_v38  ;;  %v4427_v36 = vmax.f32 %v4411_v1, 0.0 }
 0x720   : > { %4446 = vst [vmem:[%s9274_s17] sm:$0xff] %v4438_v46  ;;  %v4389_v53 = vmul.f32 %v5994_v2, %v9246_v38  ;;  %v5547_v3 = vpop.f32.mrb[104].mxu0  ;;  %v4426_v5 = vmax.f32 %v4410_v50, 0.0 }
 0x721   : > { %v4413_v60 = vadd.f32 %v9254_v7, %v4390_v0  ;;  %v5997_v30 = vadd.f32 %v9217_v6, %v5547_v3  ;;  %v4321_v35 = vpop.f32.mrb[105].mxu0 }
 0x722   : > { %v4412_v34 = vadd.f32 %v9254_v7, %v4389_v53  ;;  %v6000_v24 = vadd.f32 %v9213_v22, %v4321_v35 }
 0x723   : > { %v4429_v15 = vmax.f32 %v4413_v60, 0.0  ;;  %v4392_v19 = vmul.f32 %v5997_v30, %v9246_v38 }
 0x724   : > { %v4428_v4 = vmax.f32 %v4412_v34, 0.0  ;;  %v4391_v56 = vmul.f32 %v6000_v24, %v9246_v38  ;;  %v5550_v28 = vpop.f32.mrb[106].mxu0 }
 0x725   : > { %v4441_v31 = vmax.f32 %v4427_v36, %v4429_v15  ;;  %v6003_v21 = vadd.f32 %v9225_v20, %v5550_v28  ;;  %v4331_v6 = vpop.f32.mrb[107].mxu0  ;;  %v4415_v22 = vadd.f32 %v9254_v7, %v4392_v19 }
 0x726   : > { %v4440_v8 = vmax.f32 %v4426_v5, %v4428_v4  ;;  %v6006_v61 = vadd.f32 %v9221_v11, %v4331_v6  ;;  %v4414_v44 = vadd.f32 %v9254_v7, %v4391_v56 }
 0x727   : > { %4449 = vst [vmem:[%s9274_s17 + $0x18] sm:$0xff] %v4441_v31  ;;  %v4394_v51 = vmul.f32 %v6003_v21, %v9246_v38  ;;  %v4431_v63 = vmax.f32 %v4415_v22, 0.0 }
 0x728   : > { %4448 = vst [vmem:[%s9274_s17 + $0x10] sm:$0xff] %v4440_v8  ;;  %v4393_v10 = vmul.f32 %v6006_v61, %v9246_v38  ;;  %v5553_v40 = vpop.f32.mrb[108].mxu0  ;;  %v4430_v58 = vmax.f32 %v4414_v44, 0.0 }
 0x729   : > { %v4417_v47 = vadd.f32 %v9254_v7, %v4394_v51  ;;  %v6009_v17 = vadd.f32 %v9233_v43, %v5553_v40  ;;  %v4341_v20 = vpop.f32.mrb[109].mxu0 }
 0x72a   : > { %v4416_v42 = vadd.f32 %v9254_v7, %v4393_v10  ;;  %v6012_v11 = vadd.f32 %v9229_v18, %v4341_v20 }
 0x72b   : > { %v4433_v25 = vmax.f32 %v4417_v47, 0.0  ;;  %v4396_v9 = vmul.f32 %v6009_v17, %v9246_v38 }
 0x72c   : > { %v4432_v23 = vmax.f32 %v4416_v42, 0.0  ;;  %v4395_v33 = vmul.f32 %v6012_v11, %v9246_v38  ;;  %v5556_v59 = vpop.f32.mrb[110].mxu0 }
 0x72d   : > { %v4443_v54 = vmax.f32 %v4431_v63, %v4433_v25  ;;  %v6015_v43 = vadd.f32 %v9241_v14, %v5556_v59  ;;  %v4351_v45 = vpop.f32.mrb[111].mxu0  ;;  %v4419_v18 = vadd.f32 %v9254_v7, %v4396_v9 }
 0x72e   : > { %v4442_v48 = vmax.f32 %v4430_v58, %v4432_v23  ;;  %v6018_v39 = vadd.f32 %v9237_v12, %v4351_v45  ;;  %v4418_v52 = vadd.f32 %v9254_v7, %v4395_v33 }
 0x72f   : > { %4451 = vst [vmem:[%s9274_s17 + $0x28] sm:$0xff] %v4443_v54  ;;  %v4398_v26 = vmul.f32 %v6015_v43, %v9246_v38  ;;  %v4435_v12 = vmax.f32 %v4419_v18, 0.0 }
 0x730   : > { %4450 = vst [vmem:[%s9274_s17 + $0x20] sm:$0xff] %v4442_v48  ;;  %v4397_v13 = vmul.f32 %v6018_v39, %v9246_v38  ;;  %v4434_v49 = vmax.f32 %v4418_v52, 0.0 }
 0x731   : > { %v4421_v27 = vadd.f32 %v9254_v7, %v4398_v26 }
 0x732   : > { %v4420_v14 = vadd.f32 %v9254_v7, %v4397_v13 }
 0x733   : > { %v4437_v29 = vmax.f32 %v4421_v27, 0.0 }
 0x734   : > { %v4436_v55 = vmax.f32 %v4420_v14, 0.0 }
 0x735   : > { %v4445_v41 = vmax.f32 %v4435_v12, %v4437_v29 }
 0x736   : > { %v4444_v38 = vmax.f32 %v4434_v49, %v4436_v55 }
 0x737   : > { %4453 = vst [vmem:[%s9274_s17 + $0x38] sm:$0xff] %v4445_v41 }
 0x738   : > { %4452 = vst [vmem:[%s9274_s17 + $0x30] sm:$0xff] %v4444_v38 }
 0x739   : > { %6342 = shalt.err (!%p6339_p7)
}
 0x73a   : > { %s6343_s21 = scalar_lea.hbm %s9317_s14, 1024  ;;  %s6347_s16 = scalar_lea.hbm %s9379_s13, 2048 }
 0x73b   : > { %p6344_p8 = scmp.ne.s32.totalorder %s9317_s14, %s6343_s21  ;;  %p6348_p1 = scmp.lt.u32.totalorder %s9317_s14, %s9379_s13 }
 0x73c   : > { %p6349_p0 = scmp.lt.u32.totalorder %s6347_s16, %s6343_s21  ;;  %p6351_p6 = scmp.lt.u32.totalorder %s6343_s21, %s9317_s14 }
 0x73d   : > { %p6345_p11 = pnand %p6344_p8, %p9483_p9 }
 0x73e   : > { %p6350_p5 = por %p6349_p0, %p6348_p1 }
 0x73f   : > { %p6346_p13 = pneg %p6345_p11 }
 0x740   : > { %p6352_p10 = por %p6351_p6, %p6350_p5 }
 0x742   : > { %p6353_p12 = pnand %p6352_p10, %p6346_p13 }
 0x744   : > { %6356 = shalt.err (!%p6353_p12)
}
 0x745   : > { %s6405_s23 = smov 128   ;;  %s6406_s20 = smov 8  }
 0x746   : > { %6247 = dma.vmem_to_hbm [thread:$0]  (%p9483_p9), %s9319_s30, 1024, %s9317_s14, %s9325_s29, %s6405_s23, %s6405_s23, %s6406_s20  }
 0x747 PF: > { %p6259_p2 = scmp.ge.s32.totalorder %s6395_s28, 2  ;;  %s4483_s22 = sand.u32 1, %s6383_s25  }
 0x748   : > { %p9484_p3 = scmp.ne.s32.totalorder %s9421_s19, 0  ;;  %s4484_s21 = scalar_lea.sflag [#allocation4], %s4483_s22 }
 0x74a   : > { %p6254_p4 = pnand %p6259_p2, %p9484_p3 }
 0x74c   : > { %6378 = dma.done.wait (!%p6254_p4), %s4484_s21, 1024  }
 0x74d   : > { %6380 = vsyncadd (!%p6254_p4), %s4484_s21, 4294966272  ;;  %s9485_s28 = sld [smem:[#allocation9_spill]]  ;;  %s9486_s17 = sld [smem:[#allocation8_spill]] }
 0x74e   : > { %s9487_s27 = sld [smem:[#allocation10_spill]]  ;;  %s9488_s25 = smov %s6387_s26 }
 0x753   : > { %p24_p7 = scmp.ge.s32.totalorder %s9485_s28, 4   ;;  %s9489_s26 = smov %s9486_s17 }
 0x755   :  { %26 = sbr.rel (!%p24_p7) target bundleno = 4 (0x4), region = 118 }
 0x75c   :  { %4489 = vsyncpa [#allocation3], 1 }
 0x75d   :  { %4491 = vsyncpa [#allocation3 + $0x1], 1 }
 0x75e   :  { %4492 = vsyncpa [#allocation4], 1 }
 0x75f   :  { %4494 = vsyncpa [#allocation4 + $0x1], 1 }

</bundles_post_ra>
